<compile_context>
chip_gen: v6e
topology: v6e:2x2x1
jax: 0.10.0
libtpu: 0.0.40
codegen_flags: <defaults>
</compile_context>

<pallas_src>
import functools

import jax
import jax.numpy as jnp
from jax.experimental import pallas as pl
from jax.experimental.pallas import tpu as pltpu

EPS = 1e-5


def _ceil_to(a, b):
    return -(-a // b) * b


def _se_conv_bn_conv_bn_kernel(x_ref, gate_ref, w1_ref, g1_ref, b1_ref,
                               w2_ref, g2_ref, b2_ref, out_ref,
                               *, hw_real, chunk_widths):
    n, hw_pad, c_in = x_ref.shape
    m_tot = n * hw_pad
    inv_m = jnp.float32(1.0 / (n * hw_real))   # real (unpadded) row count

    # ---- SE excite: sigmoid on the tiny (N, C_in) gate, multiply in bf16 ----
    g = jax.nn.sigmoid(gate_ref[...]).astype(jnp.bfloat16)      # (n, c_in)
    h = (x_ref[...] * g[:, None, :]).reshape(m_tot, c_in)       # bf16, padded rows 0

    # ---- conv2d113 (1x1 == matmul), f32 accumulate ---------------------------
    y1 = jnp.dot(h, w1_ref[...], preferred_element_type=jnp.float32)  # (m, c_mid)

    # ---- batchnorm2d67 (training-mode biased batch stats; padded rows of y1
    #      are exactly zero, so sums over axis 0 only see real rows) ----------
    mean1 = jnp.sum(y1, axis=0, keepdims=True) * inv_m
    var1 = jnp.maximum(
        jnp.sum(y1 * y1, axis=0, keepdims=True) * inv_m - mean1 * mean1, 0.0)
    z1 = (y1 - mean1) * jax.lax.rsqrt(var1 + EPS) * g1_ref[...] + b1_ref[...]

    # zero the padded rows (BN1 affine made them nonzero) so conv2's output is
    # zero there and BN2 batch stats stay exact; cast once to bf16 for matmul 2.
    hw_ids = jax.lax.broadcasted_iota(jnp.int32, (n, hw_pad, 1), 1)
    mask = (hw_ids < hw_real).astype(jnp.float32).reshape(m_tot, 1)
    z1b = (z1 * mask).astype(jnp.bfloat16)                      # (m, c_mid)

    # ---- conv2d114 + batchnorm2d68, chunked along output channels -----------
    col = 0
    for width in chunk_widths:                                  # static, unrolled
        y2 = jnp.dot(z1b, w2_ref[:, col:col + width],
                     preferred_element_type=jnp.float32)        # (m, width)
        mean2 = jnp.sum(y2, axis=0, keepdims=True) * inv_m
        var2 = jnp.maximum(
            jnp.sum(y2 * y2, axis=0, keepdims=True) * inv_m - mean2 * mean2, 0.0)
        out_ref[:, col:col + width] = (
            (y2 - mean2) * jax.lax.rsqrt(var2 + EPS)
            * g2_ref[:, col:col + width] + b2_ref[:, col:col + width])
        col += width


def module_forward(x349, x345, params):
    """x349: (N, 960, 1, 1) gate;  x345: (N, 960, 7, 7) features.  NCHW in/out."""
    w1, g1, b1, w2, g2, b2 = params
    N, C_in, H, W = x345.shape
    C_mid = w1.shape[1]
    C_out = w2.shape[1]

    hw_real = H * W
    hw_pad = _ceil_to(hw_real, 8)
    m_tot = N * hw_pad

    c_out_pad = _ceil_to(C_out, 128)                  # 1632 -> 1664 (13*128)
    # two lane-aligned chunks for stage 2 (cap the live f32 accumulator)
    first = min(_ceil_to(c_out_pad // 2, 128), c_out_pad)
    chunk_widths = (first,) if first == c_out_pad else (first, c_out_pad - first)

    # ---- layout glue (NCHW -> (N, HW_pad, C)), casts / padding ---------------
    x = jnp.transpose(x345, (0, 2, 3, 1)).reshape(N, hw_real, C_in)
    x = jnp.pad(x, ((0, 0), (0, hw_pad - hw_real), (0, 0)))      # zero-pad rows
    x = x.astype(jnp.bfloat16)
    gate = x349.reshape(N, C_in)

    w1b = w1.astype(jnp.bfloat16)
    w2b = jnp.pad(w2, ((0, 0), (0, c_out_pad - C_out))).astype(jnp.bfloat16)
    g2p = jnp.pad(g2, ((0, 0), (0, c_out_pad - C_out)))
    b2p = jnp.pad(b2, ((0, 0), (0, c_out_pad - C_out)))

    out_flat = pl.pallas_call(
        functools.partial(_se_conv_bn_conv_bn_kernel,
                          hw_real=hw_real, chunk_widths=chunk_widths),
        out_shape=jax.ShapeDtypeStruct((m_tot, c_out_pad), jnp.float32),
        grid_spec=pltpu.PrefetchScalarGridSpec(
            num_scalar_prefetch=0,
            grid=(1,),                                           # single shot
            in_specs=[
                pl.BlockSpec((N, hw_pad, C_in), lambda i: (0, 0, 0)),  # x (bf16)
                pl.BlockSpec((N, C_in), lambda i: (0, 0)),             # gate
                pl.BlockSpec((C_in, C_mid), lambda i: (0, 0)),         # w1 (bf16)
                pl.BlockSpec((1, C_mid), lambda i: (0, 0)),            # gamma1
                pl.BlockSpec((1, C_mid), lambda i: (0, 0)),            # beta1
                pl.BlockSpec((C_mid, c_out_pad), lambda i: (0, 0)),    # w2 (bf16)
                pl.BlockSpec((1, c_out_pad), lambda i: (0, 0)),        # gamma2
                pl.BlockSpec((1, c_out_pad), lambda i: (0, 0)),        # beta2
            ],
            out_specs=pl.BlockSpec((m_tot, c_out_pad), lambda i: (0, 0)),
        ),
        compiler_params=pltpu.CompilerParams(
            dimension_semantics=("arbitrary",),
            vmem_limit_bytes=64 << 20),
    )(x, gate, w1b, g1, b1, w2b, g2p, b2p)

    out = out_flat.reshape(N, hw_pad, c_out_pad)[:, :hw_real, :C_out]
    out = out.reshape(N, H, W, C_out)
    return jnp.transpose(out, (0, 3, 1, 2))           # back to NCHW
    # TODO(synk): BatchNorm running_mean/var momentum updates (module state
    # side effects) are not materialized; only the forward output is returned.


def make_params(key):
    """Deterministic parameter init matching the module's shapes.

    Conv weights are stored as (Cin, Cout) (PyTorch (Cout, Cin, 1, 1)
    transposed and squeezed) so the 1x1 convs are plain matmuls.
    """
    k1, k2 = jax.random.split(key)
    w1 = jax.random.normal(k1, (960, 272), dtype=jnp.float32) * 0.05
    w2 = jax.random.normal(k2, (272, 1632), dtype=jnp.float32) * 0.05
    g1 = jnp.ones((1, 272), jnp.float32)    # batchnorm2d67 gamma
    b1 = jnp.zeros((1, 272), jnp.float32)   # batchnorm2d67 beta
    g2 = jnp.ones((1, 1632), jnp.float32)   # batchnorm2d68 gamma
    b2 = jnp.zeros((1, 1632), jnp.float32)  # batchnorm2d68 beta
    return (w1, g1, b1, w2, g2, b2)


if __name__ == "__main__":
    key = jax.random.PRNGKey(0)
    k_x, k_g, k_p = jax.random.split(key, 3)

    # Shapes implied by the module's forward (channel dims fixed by the convs).
    x345 = jax.random.normal(k_x, (1, 960, 7, 7), dtype=jnp.float32)
    x349 = jax.random.normal(k_g, (1, 960, 1, 1), dtype=jnp.float32)
    params = make_params(k_p)

    out = module_forward(x349, x345, params)
    jax.block_until_ready(out)
    assert out.shape == (1, 1632, 7, 7), out.shape
    assert bool(jnp.all(jnp.isfinite(out)))
    print("KERNEL_OK")
</pallas_src>

<mosaic_0001>
module attributes {stable_mosaic.version = 11 : i64} {
  func.func @_se_conv_bn_conv_bn_kernel(%arg0: i32, %arg1: memref<1x56x960xbf16, #tpu.memory_space<vmem>>, %arg2: memref<1x960xf32, #tpu.memory_space<vmem>>, %arg3: memref<960x272xbf16, #tpu.memory_space<vmem>>, %arg4: memref<1x272xf32, #tpu.memory_space<vmem>>, %arg5: memref<1x272xf32, #tpu.memory_space<vmem>>, %arg6: memref<272x1664xbf16, #tpu.memory_space<vmem>>, %arg7: memref<1x1664xf32, #tpu.memory_space<vmem>>, %arg8: memref<1x1664xf32, #tpu.memory_space<vmem>>, %arg9: memref<56x1664xf32, #tpu.memory_space<vmem>>) attributes {dimension_semantics = [#tpu.dimension_semantics<arbitrary>], iteration_bounds = array<i64: 1>, scalar_prefetch = 0 : i64, scratch_operands = 0 : i64, tpu.core_type = #tpu.core_type<tc>, window_params = [{pipeline_mode = #tpu.pipeline_mode<synchronous>, transform_indices = @transform_0, window_bounds = array<i64: 1, 56, 960>}, {pipeline_mode = #tpu.pipeline_mode<synchronous>, transform_indices = @transform_1, window_bounds = array<i64: 1, 960>}, {pipeline_mode = #tpu.pipeline_mode<synchronous>, transform_indices = @transform_2, window_bounds = array<i64: 960, 272>}, {pipeline_mode = #tpu.pipeline_mode<synchronous>, transform_indices = @transform_3, window_bounds = array<i64: 1, 272>}, {pipeline_mode = #tpu.pipeline_mode<synchronous>, transform_indices = @transform_4, window_bounds = array<i64: 1, 272>}, {pipeline_mode = #tpu.pipeline_mode<synchronous>, transform_indices = @transform_5, window_bounds = array<i64: 272, 1664>}, {pipeline_mode = #tpu.pipeline_mode<synchronous>, transform_indices = @transform_6, window_bounds = array<i64: 1, 1664>}, {pipeline_mode = #tpu.pipeline_mode<synchronous>, transform_indices = @transform_7, window_bounds = array<i64: 1, 1664>}, {pipeline_mode = #tpu.pipeline_mode<synchronous>, transform_indices = @transform_8, window_bounds = array<i64: 56, 1664>}]} {
    %c0 = arith.constant 0 : index
    %c0_0 = arith.constant 0 : index
    %0 = vector.load %arg2[%c0, %c0_0] : memref<1x960xf32, #tpu.memory_space<vmem>>, vector<1x960xf32>
    %1 = arith.negf %0 : vector<1x960xf32>
    %2 = math.exp %1 : vector<1x960xf32>
    %cst = arith.constant 1.000000e+00 : f32
    %3 = vector.broadcast %cst : f32 to vector<1x960xf32>
    %4 = arith.addf %3, %2 : vector<1x960xf32>
    %5 = arith.divf %3, %4 : vector<1x960xf32>
    %6 = arith.truncf %5 : vector<1x960xf32> to vector<1x960xbf16>
    %c0_1 = arith.constant 0 : index
    %c0_2 = arith.constant 0 : index
    %c0_3 = arith.constant 0 : index
    %7 = vector.load %arg1[%c0_1, %c0_2, %c0_3] : memref<1x56x960xbf16, #tpu.memory_space<vmem>>, vector<1x56x960xbf16>
    %8 = vector.shape_cast %6 : vector<1x960xbf16> to vector<1x1x960xbf16>
    %9 = vector.broadcast %8 : vector<1x1x960xbf16> to vector<1x56x960xbf16>
    %10 = arith.mulf %7, %9 : vector<1x56x960xbf16>
    %11 = vector.shape_cast %10 : vector<1x56x960xbf16> to vector<56x960xbf16>
    %c0_4 = arith.constant 0 : index
    %c0_5 = arith.constant 0 : index
    %12 = vector.load %arg3[%c0_4, %c0_5] : memref<960x272xbf16, #tpu.memory_space<vmem>>, vector<960x272xbf16>
    %cst_6 = arith.constant dense<0.000000e+00> : vector<56x272xf32>
    %13 = tpu.matmul %11, %12, %cst_6 {dimension_numbers = #tpu.dot_dimension_numbers<[1], [0], [0], [1], [0, 0, 1, 1], [], []>} : vector<56x960xbf16>, vector<960x272xbf16>, vector<56x272xf32> -> vector<56x272xf32>
    %cst_7 = arith.constant dense<0.000000e+00> : vector<272xf32>
    %14 = vector.multi_reduction <add>, %13, %cst_7 [0] : vector<56x272xf32> to vector<272xf32>
    %15 = vector.shape_cast %14 : vector<272xf32> to vector<1x272xf32>
    %cst_8 = arith.constant 0.0204081628 : f32
    %16 = vector.broadcast %cst_8 : f32 to vector<1x272xf32>
    %17 = arith.mulf %15, %16 : vector<1x272xf32>
    %18 = arith.mulf %13, %13 : vector<56x272xf32>
    %cst_9 = arith.constant dense<0.000000e+00> : vector<272xf32>
    %19 = vector.multi_reduction <add>, %18, %cst_9 [0] : vector<56x272xf32> to vector<272xf32>
    %20 = vector.shape_cast %19 : vector<272xf32> to vector<1x272xf32>
    %cst_10 = arith.constant 0.0204081628 : f32
    %21 = vector.broadcast %cst_10 : f32 to vector<1x272xf32>
    %22 = arith.mulf %20, %21 : vector<1x272xf32>
    %23 = arith.mulf %17, %17 : vector<1x272xf32>
    %24 = arith.subf %22, %23 : vector<1x272xf32>
    %cst_11 = arith.constant 0.000000e+00 : f32
    %25 = vector.broadcast %cst_11 : f32 to vector<1x272xf32>
    %26 = arith.maximumf %24, %25 : vector<1x272xf32>
    %27 = vector.broadcast %17 : vector<1x272xf32> to vector<56x272xf32>
    %28 = arith.subf %13, %27 : vector<56x272xf32>
    %cst_12 = arith.constant 9.99999974E-6 : f32
    %29 = vector.broadcast %cst_12 : f32 to vector<1x272xf32>
    %30 = arith.addf %26, %29 : vector<1x272xf32>
    %31 = math.rsqrt %30 : vector<1x272xf32>
    %32 = vector.broadcast %31 : vector<1x272xf32> to vector<56x272xf32>
    %33 = arith.mulf %28, %32 : vector<56x272xf32>
    %c0_13 = arith.constant 0 : index
    %c0_14 = arith.constant 0 : index
    %34 = vector.load %arg4[%c0_13, %c0_14] : memref<1x272xf32, #tpu.memory_space<vmem>>, vector<1x272xf32>
    %35 = vector.broadcast %34 : vector<1x272xf32> to vector<56x272xf32>
    %36 = arith.mulf %33, %35 : vector<56x272xf32>
    %c0_15 = arith.constant 0 : index
    %c0_16 = arith.constant 0 : index
    %37 = vector.load %arg5[%c0_15, %c0_16] : memref<1x272xf32, #tpu.memory_space<vmem>>, vector<1x272xf32>
    %38 = vector.broadcast %37 : vector<1x272xf32> to vector<56x272xf32>
    %39 = arith.addf %36, %38 : vector<56x272xf32>
    %40 = tpu.iota {dimensions = array<i32: 1>} : vector<1x56x1xi32>
    %c49_i32 = arith.constant 49 : i32
    %41 = vector.broadcast %c49_i32 : i32 to vector<1x56x1xi32>
    %42 = arith.cmpi slt, %40, %41 : vector<1x56x1xi32>
    %43 = arith.extui %42 : vector<1x56x1xi1> to vector<1x56x1xi32>
    %44 = arith.sitofp %43 : vector<1x56x1xi32> to vector<1x56x1xf32>
    %45 = vector.shape_cast %44 : vector<1x56x1xf32> to vector<56x1xf32>
    %46 = vector.broadcast %45 : vector<56x1xf32> to vector<56x272xf32>
    %47 = arith.mulf %39, %46 : vector<56x272xf32>
    %48 = arith.truncf %47 : vector<56x272xf32> to vector<56x272xbf16>
    %c0_17 = arith.constant 0 : index
    %c0_18 = arith.constant 0 : index
    %49 = vector.load %arg6[%c0_17, %c0_18] : memref<272x1664xbf16, #tpu.memory_space<vmem>>, vector<272x896xbf16>
    %cst_19 = arith.constant dense<0.000000e+00> : vector<56x896xf32>
    %50 = tpu.matmul %48, %49, %cst_19 {dimension_numbers = #tpu.dot_dimension_numbers<[1], [0], [0], [1], [0, 0, 1, 1], [], []>} : vector<56x272xbf16>, vector<272x896xbf16>, vector<56x896xf32> -> vector<56x896xf32>
    %cst_20 = arith.constant dense<0.000000e+00> : vector<896xf32>
    %51 = vector.multi_reduction <add>, %50, %cst_20 [0] : vector<56x896xf32> to vector<896xf32>
    %52 = vector.shape_cast %51 : vector<896xf32> to vector<1x896xf32>
    %cst_21 = arith.constant 0.0204081628 : f32
    %53 = vector.broadcast %cst_21 : f32 to vector<1x896xf32>
    %54 = arith.mulf %52, %53 : vector<1x896xf32>
    %55 = arith.mulf %50, %50 : vector<56x896xf32>
    %cst_22 = arith.constant dense<0.000000e+00> : vector<896xf32>
    %56 = vector.multi_reduction <add>, %55, %cst_22 [0] : vector<56x896xf32> to vector<896xf32>
    %57 = vector.shape_cast %56 : vector<896xf32> to vector<1x896xf32>
    %cst_23 = arith.constant 0.0204081628 : f32
    %58 = vector.broadcast %cst_23 : f32 to vector<1x896xf32>
    %59 = arith.mulf %57, %58 : vector<1x896xf32>
    %60 = arith.mulf %54, %54 : vector<1x896xf32>
    %61 = arith.subf %59, %60 : vector<1x896xf32>
    %cst_24 = arith.constant 0.000000e+00 : f32
    %62 = vector.broadcast %cst_24 : f32 to vector<1x896xf32>
    %63 = arith.maximumf %61, %62 : vector<1x896xf32>
    %64 = vector.broadcast %54 : vector<1x896xf32> to vector<56x896xf32>
    %65 = arith.subf %50, %64 : vector<56x896xf32>
    %cst_25 = arith.constant 9.99999974E-6 : f32
    %66 = vector.broadcast %cst_25 : f32 to vector<1x896xf32>
    %67 = arith.addf %63, %66 : vector<1x896xf32>
    %68 = math.rsqrt %67 : vector<1x896xf32>
    %69 = vector.broadcast %68 : vector<1x896xf32> to vector<56x896xf32>
    %70 = arith.mulf %65, %69 : vector<56x896xf32>
    %c0_26 = arith.constant 0 : index
    %c0_27 = arith.constant 0 : index
    %71 = vector.load %arg7[%c0_26, %c0_27] : memref<1x1664xf32, #tpu.memory_space<vmem>>, vector<1x896xf32>
    %72 = vector.broadcast %71 : vector<1x896xf32> to vector<56x896xf32>
    %73 = arith.mulf %70, %72 : vector<56x896xf32>
    %c0_28 = arith.constant 0 : index
    %c0_29 = arith.constant 0 : index
    %74 = vector.load %arg8[%c0_28, %c0_29] : memref<1x1664xf32, #tpu.memory_space<vmem>>, vector<1x896xf32>
    %75 = vector.broadcast %74 : vector<1x896xf32> to vector<56x896xf32>
    %76 = arith.addf %73, %75 : vector<56x896xf32>
    %c0_30 = arith.constant 0 : index
    %c0_31 = arith.constant 0 : index
    %77 = vector.load %arg9[%c0_30, %c0_31] : memref<56x1664xf32, #tpu.memory_space<vmem>>, vector<56x896xf32>
    tpu.vector_store %arg9[%c0_30, %c0_31], %76 {strides = array<i32>} : memref<56x1664xf32, #tpu.memory_space<vmem>>, vector<56x896xf32>,
    %c0_32 = arith.constant 0 : index
    %c896 = arith.constant 896 : index
    %78 = vector.load %arg6[%c0_32, %c896] : memref<272x1664xbf16, #tpu.memory_space<vmem>>, vector<272x768xbf16>
    %cst_33 = arith.constant dense<0.000000e+00> : vector<56x768xf32>
    %79 = tpu.matmul %48, %78, %cst_33 {dimension_numbers = #tpu.dot_dimension_numbers<[1], [0], [0], [1], [0, 0, 1, 1], [], []>} : vector<56x272xbf16>, vector<272x768xbf16>, vector<56x768xf32> -> vector<56x768xf32>
    %cst_34 = arith.constant dense<0.000000e+00> : vector<768xf32>
    %80 = vector.multi_reduction <add>, %79, %cst_34 [0] : vector<56x768xf32> to vector<768xf32>
    %81 = vector.shape_cast %80 : vector<768xf32> to vector<1x768xf32>
    %cst_35 = arith.constant 0.0204081628 : f32
    %82 = vector.broadcast %cst_35 : f32 to vector<1x768xf32>
    %83 = arith.mulf %81, %82 : vector<1x768xf32>
    %84 = arith.mulf %79, %79 : vector<56x768xf32>
    %cst_36 = arith.constant dense<0.000000e+00> : vector<768xf32>
    %85 = vector.multi_reduction <add>, %84, %cst_36 [0] : vector<56x768xf32> to vector<768xf32>
    %86 = vector.shape_cast %85 : vector<768xf32> to vector<1x768xf32>
    %cst_37 = arith.constant 0.0204081628 : f32
    %87 = vector.broadcast %cst_37 : f32 to vector<1x768xf32>
    %88 = arith.mulf %86, %87 : vector<1x768xf32>
    %89 = arith.mulf %83, %83 : vector<1x768xf32>
    %90 = arith.subf %88, %89 : vector<1x768xf32>
    %cst_38 = arith.constant 0.000000e+00 : f32
    %91 = vector.broadcast %cst_38 : f32 to vector<1x768xf32>
    %92 = arith.maximumf %90, %91 : vector<1x768xf32>
    %93 = vector.broadcast %83 : vector<1x768xf32> to vector<56x768xf32>
    %94 = arith.subf %79, %93 : vector<56x768xf32>
    %cst_39 = arith.constant 9.99999974E-6 : f32
    %95 = vector.broadcast %cst_39 : f32 to vector<1x768xf32>
    %96 = arith.addf %92, %95 : vector<1x768xf32>
    %97 = math.rsqrt %96 : vector<1x768xf32>
    %98 = vector.broadcast %97 : vector<1x768xf32> to vector<56x768xf32>
    %99 = arith.mulf %94, %98 : vector<56x768xf32>
    %c0_40 = arith.constant 0 : index
    %c896_41 = arith.constant 896 : index
    %100 = vector.load %arg7[%c0_40, %c896_41] : memref<1x1664xf32, #tpu.memory_space<vmem>>, vector<1x768xf32>
    %101 = vector.broadcast %100 : vector<1x768xf32> to vector<56x768xf32>
    %102 = arith.mulf %99, %101 : vector<56x768xf32>
    %c0_42 = arith.constant 0 : index
    %c896_43 = arith.constant 896 : index
    %103 = vector.load %arg8[%c0_42, %c896_43] : memref<1x1664xf32, #tpu.memory_space<vmem>>, vector<1x768xf32>
    %104 = vector.broadcast %103 : vector<1x768xf32> to vector<56x768xf32>
    %105 = arith.addf %102, %104 : vector<56x768xf32>
    %c0_44 = arith.constant 0 : index
    %c896_45 = arith.constant 896 : index
    %106 = vector.load %arg9[%c0_44, %c896_45] : memref<56x1664xf32, #tpu.memory_space<vmem>>, vector<56x768xf32>
    tpu.vector_store %arg9[%c0_44, %c896_45], %105 {strides = array<i32>} : memref<56x1664xf32, #tpu.memory_space<vmem>>, vector<56x768xf32>,
    return
  }
  func.func @transform_0(%arg0: i32) -> (i32, i32, i32) {
    %c0_i32 = arith.constant 0 : i32
    %c0_i32_0 = arith.constant 0 : i32
    %c0_i32_1 = arith.constant 0 : i32
    %c0_i32_2 = arith.constant 0 : i32
    return %c0_i32, %c0_i32_0, %c0_i32_1 : i32, i32, i32
  }
  func.func @transform_1(%arg0: i32) -> (i32, i32) {
    %c0_i32 = arith.constant 0 : i32
    %c0_i32_0 = arith.constant 0 : i32
    %c0_i32_1 = arith.constant 0 : i32
    return %c0_i32, %c0_i32_0 : i32, i32
  }
  func.func @transform_2(%arg0: i32) -> (i32, i32) {
    %c0_i32 = arith.constant 0 : i32
    %c0_i32_0 = arith.constant 0 : i32
    %c0_i32_1 = arith.constant 0 : i32
    return %c0_i32, %c0_i32_0 : i32, i32
  }
  func.func @transform_3(%arg0: i32) -> (i32, i32) {
    %c0_i32 = arith.constant 0 : i32
    %c0_i32_0 = arith.constant 0 : i32
    %c0_i32_1 = arith.constant 0 : i32
    return %c0_i32, %c0_i32_0 : i32, i32
  }
  func.func @transform_4(%arg0: i32) -> (i32, i32) {
    %c0_i32 = arith.constant 0 : i32
    %c0_i32_0 = arith.constant 0 : i32
    %c0_i32_1 = arith.constant 0 : i32
    return %c0_i32, %c0_i32_0 : i32, i32
  }
  func.func @transform_5(%arg0: i32) -> (i32, i32) {
    %c0_i32 = arith.constant 0 : i32
    %c0_i32_0 = arith.constant 0 : i32
    %c0_i32_1 = arith.constant 0 : i32
    return %c0_i32, %c0_i32_0 : i32, i32
  }
  func.func @transform_6(%arg0: i32) -> (i32, i32) {
    %c0_i32 = arith.constant 0 : i32
    %c0_i32_0 = arith.constant 0 : i32
    %c0_i32_1 = arith.constant 0 : i32
    return %c0_i32, %c0_i32_0 : i32, i32
  }
  func.func @transform_7(%arg0: i32) -> (i32, i32) {
    %c0_i32 = arith.constant 0 : i32
    %c0_i32_0 = arith.constant 0 : i32
    %c0_i32_1 = arith.constant 0 : i32
    return %c0_i32, %c0_i32_0 : i32, i32
  }
  func.func @transform_8(%arg0: i32) -> (i32, i32) {
    %c0_i32 = arith.constant 0 : i32
    %c0_i32_0 = arith.constant 0 : i32
    %c0_i32_1 = arith.constant 0 : i32
    return %c0_i32, %c0_i32_0 : i32, i32
  }
}

</mosaic_0001>

<bundles_post_ra>
// kernel: tpu_custom_call.1
= control target key start
LH: loop header
LB: loop body
LE: loop exit
PB: predicated region body
PF: predicated region fallthrough
CT: control target
= control target key end

     0   :  { %vm1567_vm0 = vcmask 523264   ;;  %s10544_s0 = inlined_call_operand.vmem [shape: bf16[1,56,960], index: 0, kind: input, shape index: {}]   ;;  %s10545_s1 = inlined_call_operand.vmem [shape: f32[1,960], index: 1, kind: input, shape index: {}]   ;;  %s10546_s2 = inlined_call_operand.vmem [shape: bf16[960,272], index: 2, kind: input, shape index: {}]   ;;  %s10547_s3 = inlined_call_operand.vmem [shape: f32[1,272], index: 3, kind: input, shape index: {}]   ;;  %s10548_s4 = inlined_call_operand.vmem [shape: f32[1,272], index: 4, kind: input, shape index: {}]   ;;  %s10549_s5 = inlined_call_operand.vmem [shape: bf16[272,1664], index: 5, kind: input, shape index: {}]   ;;  %s10550_s6 = inlined_call_operand.vmem [shape: f32[1,1664], index: 6, kind: input, shape index: {}]   ;;  %s10551_s7 = inlined_call_operand.vmem [shape: f32[1,1664], index: 7, kind: input, shape index: {}]   ;;  %s10552_s8 = inlined_call_operand.hbm [shape: f32[56,1664], index: 8, kind: output, shape index: {}]  }
   0x1   :  { %v6539_v0 = vld [vmem:[%s10546_s2 + $0xac] ss:$12 sps:$4 sm:$0xff]   ;;  %v6543_v2 = vld [vmem:[%s10546_s2 + $0xa8] ss:$12 sps:$4 sm:$0xff]   ;;  %v6549_v6 = vld [vmem:[%s10546_s2 + $0x90] ss:$12 sps:$4 sm:$0xff]  }
   0x2   :  { %v6541_v1 = vld [vmem:[%s10546_s2 + $0x22c] ss:$12 sps:$4 sm:$0xff]   ;;  %1580 = vmatprep.subr.bf16.mxu0 %v6539_v0  ;;  %v6544_v3 = vld [vmem:[%s10546_s2 + $0x228] ss:$12 sps:$4 sm:$0xff]   ;;  %v6550_v7 = vld [vmem:[%s10546_s2 + $0x210] ss:$12 sps:$4 sm:$0xff]  }
   0x3   :  { %1651 = vmatprep.subr.bf16.mxu1 %v6541_v1  ;;  %v6545_v4 = vld [vmem:[%s10546_s2 + $0x94] ss:$12 sps:$4 sm:$0xff]   ;;  %1581 = vmatpush1.bf16.msra.mxu0 %v6543_v2  ;;  %v6551_v8 = vld [vmem:[%s10546_s2 + $0x7c] ss:$12 sps:$4 sm:$0xff]   ;;  %v6555_v10 = vld [vmem:[%s10546_s2 + $0x78] ss:$12 sps:$4 sm:$0xff]  }
   0x4   :  { %1652 = vmatpush1.bf16.msra.mxu1 %v6544_v3  ;;  %v6547_v5 = vld [vmem:[%s10546_s2 + $0x214] ss:$12 sps:$4 sm:$0xff]   ;;  %1582 = vmatprep.subr.bf16.mxu0 %v6545_v4  ;;  %v6553_v9 = vld [vmem:[%s10546_s2 + $0x1fc] ss:$12 sps:$4 sm:$0xff]   ;;  %v6556_v11 = vld [vmem:[%s10546_s2 + $0x1f8] ss:$12 sps:$4 sm:$0xff]  }
   0x5   :  { %1653 = vmatprep.subr.bf16.mxu1 %v6547_v5  ;;  %v6557_v12 = vld [vmem:[%s10546_s2 + $0x64] ss:$12 sps:$4 sm:$0xff]   ;;  %v6561_v14 = vld [vmem:[%s10546_s2 + $0x60] ss:$12 sps:$4 sm:$0xff]   ;;  %v6567_v18 = vld [vmem:[%s10546_s2 + $0x48] ss:$12 sps:$4 sm:$0xff]  }
   0x6   :  { %v6559_v13 = vld [vmem:[%s10546_s2 + $0x1e4] ss:$12 sps:$4 sm:$0xff]   ;;  %v6562_v15 = vld [vmem:[%s10546_s2 + $0x1e0] ss:$12 sps:$4 sm:$0xff]   ;;  %v6568_v19 = vld [vmem:[%s10546_s2 + $0x1c8] ss:$12 sps:$4 sm:$0xff]  }
   0x7   :  { %1583 = vmatpush1.bf16.msra.mxu0 %v6549_v6  ;;  %v6563_v16 = vld [vmem:[%s10546_s2 + $0x4c] ss:$12 sps:$4 sm:$0xff]   ;;  %v6569_v20 = vld [vmem:[%s10546_s2 + $0x34] ss:$12 sps:$4 sm:$0xff]   ;;  %v6573_v22 = vld [vmem:[%s10546_s2 + $0x30] ss:$12 sps:$4 sm:$0xff]   ;;  %v39_v6 = vlaneseq }
   0x8   :  { %1654 = vmatpush1.bf16.msra.mxu1 %v6550_v7  ;;  %1584 = vmatprep.subr.bf16.mxu0 %v6551_v8  ;;  %v6565_v17 = vld [vmem:[%s10546_s2 + $0x1cc] ss:$12 sps:$4 sm:$0xff]   ;;  %v6571_v21 = vld [vmem:[%s10546_s2 + $0x1b4] ss:$12 sps:$4 sm:$0xff]   ;;  %v6574_v23 = vld [vmem:[%s10546_s2 + $0x1b0] ss:$12 sps:$4 sm:$0xff]  }
   0x9   :  { %1655 = vmatprep.subr.bf16.mxu1 %v6553_v9  ;;  %v6575_v24 = vld [vmem:[%s10546_s2 + $0x1c] ss:$12 sps:$4 sm:$0xff]   ;;  %v6579_v26 = vld [vmem:[%s10546_s2 + $0x18] ss:$12 sps:$4 sm:$0xff]   ;;  %v6585_v30 = vld [vmem:[%s10546_s2] ss:$12 sps:$4 sm:$0xff]  }
   0xa   :  { %v6577_v25 = vld [vmem:[%s10546_s2 + $0x19c] ss:$12 sps:$4 sm:$0xff]   ;;  %v6580_v27 = vld [vmem:[%s10546_s2 + $0x198] ss:$12 sps:$4 sm:$0xff]   ;;  %v6586_v31 = vld [vmem:[%s10546_s2 + $0x180] ss:$12 sps:$4 sm:$0xff]  }
   0xb   :  { %1585 = vmatpush1.bf16.msra.mxu0 %v6555_v10  ;;  %v6581_v28 = vld [vmem:[%s10546_s2 + $0x4] ss:$12 sps:$4 sm:$0xff]   ;;  %v6587_v32 = vld [vmem:[%s10546_s2 + $0x16c] ss:$12 sps:$4 sm:$0xff]   ;;  %v6591_v34 = vld [vmem:[%s10546_s2 + $0x168] ss:$12 sps:$4 sm:$0xff]  }
   0xc   :  { %1656 = vmatpush1.bf16.msra.mxu1 %v6556_v11  ;;  %1586 = vmatprep.subr.bf16.mxu0 %v6557_v12  ;;  %v6583_v29 = vld [vmem:[%s10546_s2 + $0x184] ss:$12 sps:$4 sm:$0xff]   ;;  %v6589_v33 = vld [vmem:[%s10546_s2 + $0x2ec] ss:$12 sps:$4 sm:$0xff]   ;;  %v6592_v35 = vld [vmem:[%s10546_s2 + $0x2e8] ss:$12 sps:$4 sm:$0xff]  }
   0xd   :  { %1657 = vmatprep.subr.bf16.mxu1 %v6559_v13  ;;  %v6593_v36 = vld [vmem:[%s10546_s2 + $0x154] ss:$12 sps:$4 sm:$0xff]   ;;  %v6597_v38 = vld [vmem:[%s10546_s2 + $0x150] ss:$12 sps:$4 sm:$0xff]   ;;  %v6603_v42 = vld [vmem:[%s10546_s2 + $0x138] ss:$12 sps:$4 sm:$0xff]  }
   0xe   :  { %v6595_v37 = vld [vmem:[%s10546_s2 + $0x2d4] ss:$12 sps:$4 sm:$0xff]   ;;  %v6598_v39 = vld [vmem:[%s10546_s2 + $0x2d0] ss:$12 sps:$4 sm:$0xff]   ;;  %v6604_v43 = vld [vmem:[%s10546_s2 + $0x2b8] ss:$12 sps:$4 sm:$0xff]  }
   0xf   :  { %1587 = vmatpush1.bf16.msra.mxu0 %v6561_v14  ;;  %v6599_v40 = vld [vmem:[%s10546_s2 + $0x13c] ss:$12 sps:$4 sm:$0xff]   ;;  %v6605_v44 = vld [vmem:[%s10546_s2 + $0x124] ss:$12 sps:$4 sm:$0xff]   ;;  %v6609_v47 = vld [vmem:[%s10546_s2 + $0x120] ss:$12 sps:$4 sm:$0xff]  }
  0x10   :  { %1658 = vmatpush1.bf16.msra.mxu1 %v6562_v15  ;;  %1588 = vmatprep.subr.bf16.mxu0 %v6563_v16  ;;  %v6601_v41 = vld [vmem:[%s10546_s2 + $0x2bc] ss:$12 sps:$4 sm:$0xff]   ;;  %v6607_v45 = vld [vmem:[%s10546_s2 + $0x2a4] ss:$12 sps:$4 sm:$0xff]   ;;  %v6610_v49 = vld [vmem:[%s10546_s2 + $0x2a0] ss:$12 sps:$4 sm:$0xff]  }
  0x11   :  { %1659 = vmatprep.subr.bf16.mxu1 %v6565_v17  ;;  %v31_v46 = vld [vmem:[%s10545_s1] sm:$0xff]  ;;  %v6611_v50 = vld [vmem:[%s10546_s2 + $0x10c] ss:$12 sps:$4 sm:$0xff]   ;;  %v6615_v52 = vld [vmem:[%s10546_s2 + $0x108] ss:$12 sps:$4 sm:$0xff]   ;;  %v7413_v7 = vshrl.u32 %v39_v6, 7 }
  0x12   :  { %v5884_v48 = vmul.f32 -1.442695, %v31_v46  ;;  %v6613_v51 = vld [vmem:[%s10546_s2 + $0x28c] ss:$12 sps:$4 sm:$0xff]   ;;  %v6616_v53 = vld [vmem:[%s10546_s2 + $0x288] ss:$12 sps:$4 sm:$0xff]  }
  0x13   :  { %1589 = vmatpush1.bf16.msra.mxu0 %v6567_v18  ;;  %v6617_v54 = vld [vmem:[%s10546_s2 + $0xf4] ss:$12 sps:$4 sm:$0xff]   ;;  %v6621_v56 = vld [vmem:[%s10546_s2 + $0xf0] ss:$12 sps:$4 sm:$0xff]   ;;  %v6627_v60 = vld [vmem:[%s10546_s2 + $0xd8] ss:$12 sps:$4 sm:$0xff]  }
  0x14   :  { %1660 = vmatpush1.bf16.msra.mxu1 %v6568_v19  ;;  %1590 = vmatprep.subr.bf16.mxu0 %v6569_v20  ;;  %7102 = vpow2.f32 %v5884_v48  ;;  %v6619_v55 = vld [vmem:[%s10546_s2 + $0x274] ss:$12 sps:$4 sm:$0xff]   ;;  %v6622_v57 = vld [vmem:[%s10546_s2 + $0x270] ss:$12 sps:$4 sm:$0xff]   ;;  %v6628_v61 = vld [vmem:[%s10546_s2 + $0x258] ss:$12 sps:$4 sm:$0xff]  }
  0x15   :  { %1661 = vmatprep.subr.bf16.mxu1 %v6571_v21  ;;  %v6623_v58 = vld [vmem:[%s10546_s2 + $0xdc] ss:$12 sps:$4 sm:$0xff]   ;;  %v6629_v62 = vld [vmem:[%s10546_s2 + $0xc4] ss:$12 sps:$4 sm:$0xff]   ;;  %v6633_v2 = vld [vmem:[%s10546_s2 + $0xc0] ss:$12 sps:$4 sm:$0xff]  }
  0x16   :  { %v6625_v59 = vld [vmem:[%s10546_s2 + $0x25c] ss:$12 sps:$4 sm:$0xff]   ;;  %v6631_v63 = vld [vmem:[%s10546_s2 + $0x244] ss:$12 sps:$4 sm:$0xff]   ;;  %v6634_v3 = vld [vmem:[%s10546_s2 + $0x240] ss:$12 sps:$4 sm:$0xff]  }
  0x17   :  { %1591 = vmatpush1.bf16.msra.mxu0 %v6573_v22  ;;  %v6637_v4 = vld [vmem:[%s10546_s2 + $0x3ac] ss:$12 sps:$4 sm:$0xff]   ;;  %v7416_v8 = vsub.s32 0, %v7413_v7  ;;  %v7419_v9 = vsub.s32 1, %v7413_v7  ;;  %v7422_v10 = vsub.s32 2, %v7413_v7  ;;  %v7425_v11 = vsub.s32 3, %v7413_v7 }
  0x18   :  { %1662 = vmatpush1.bf16.msra.mxu1 %v6574_v23  ;;  %1592 = vmatprep.subr.bf16.mxu0 %v6575_v24  ;;  %v6640_v5 = vld [vmem:[%s10546_s2 + $0x52c] ss:$12 sps:$4 sm:$0xff]   ;;  %v6638_v46 = vld [vmem:[%s10546_s2 + $0x528] ss:$12 sps:$4 sm:$0xff]  }
  0x19   :  { %1663 = vmatprep.subr.bf16.mxu1 %v6577_v25  ;;  %10580 = vst [vmem:[#allocation5_spill] sm:$0xff] %v7416_v8  ;;  %10581 = vst [vmem:[#allocation6_spill] sm:$0xff] %v7419_v9  ;;  %v87_v25 = vld [vmem:[%s10544_s0] sm:$0xff]  ;;  %v6649_v6 = vld [vmem:[%s10546_s2 + $0x37c] ss:$12 sps:$4 sm:$0xff]  }
  0x1a   :  { %10582 = vst [vmem:[#allocation7_spill] sm:$0xff] %v7422_v10  ;;  %10583 = vst [vmem:[#allocation8_spill] sm:$0xff] %v7425_v11 }
  0x1b   :  { %1593 = vmatpush1.bf16.msra.mxu0 %v6579_v26  ;;  %v91_v26 = vld [vmem:[%s10544_s0 + $0x20] sm:$0xff] }
  0x1c   :  { %1664 = vmatpush1.bf16.msra.mxu1 %v6580_v27  ;;  %1594 = vmatprep.subr.bf16.mxu0 %v6581_v28  ;;  %v7438_v27 = vsub.s32 6, %v7413_v7 }
  0x1d   :  { %1665 = vmatprep.subr.bf16.mxu1 %v6583_v29 }
  0x1e   :  { %10584 = vst [vmem:[#allocation9_spill] sm:$0xff] %v7438_v27 }
  0x1f   :  { %1595 = vmatpush1.bf16.msra.mxu0 %v6585_v30  ;;  %v88_v30 = vld [vmem:[%s10544_s0 + $0x8] sm:$0xff] }
  0x20   :  { %1666 = vmatpush1.bf16.msra.mxu1 %v6586_v31  ;;  %1596 = vmatprep.subr.bf16.mxu0 %v6587_v32 }
  0x21   :  { %1667 = vmatprep.subr.bf16.mxu1 %v6589_v33  ;;  %v7103_v0 = vpop.eup %7102  ;;  %v92_v33 = vld [vmem:[%s10544_s0 + $0x28] sm:$0xff] }
  0x22   :  { %v35_v1 = vadd.f32 1.0, %v7103_v0  ;;  %v6644_v0 = vld [vmem:[%s10546_s2 + $0x510] ss:$12 sps:$4 sm:$0xff]  }
  0x23   :  { %1597 = vmatpush2.bf16.msra.mxu0 %v6591_v34  ;;  %v69_v34 = vsub.s32 7, %v7413_v7 }
  0x24   :  { %1668 = vmatpush2.bf16.msra.mxu1 %v6592_v35  ;;  %1598 = vmatprep.subr.bf16.mxu0 %v6593_v36  ;;  %7104 = vrcp.f32 %v35_v1 }
  0x25   :  { %1669 = vmatprep.subr.bf16.mxu1 %v6595_v37  ;;  %v96_v37 = vld [vmem:[%s10544_s0 + $0x48] sm:$0xff] }
  0x27   :  { %1599 = vmatpush2.bf16.msra.mxu0 %v6597_v38  ;;  %v100_v38 = vld [vmem:[%s10544_s0 + $0x68] sm:$0xff] }
  0x28   :  { %1670 = vmatpush2.bf16.msra.mxu1 %v6598_v39  ;;  %1600 = vmatprep.subr.bf16.mxu0 %v6599_v40  ;;  %v7462_v39 = vsub.s32 4, %v7413_v7  ;;  %v7465_v40 = vsub.s32 5, %v7413_v7 }
  0x29   :  { %1671 = vmatprep.subr.bf16.mxu1 %v6601_v41 }
  0x2a   :  { %10585 = vst [vmem:[#allocation10_spill] sm:$0xff] %v7462_v39  ;;  %10586 = vst [vmem:[#allocation11_spill] sm:$0xff] %v7465_v40 }
  0x2b   :  { %1601 = vmatpush2.bf16.msra.mxu0 %v6603_v42 }
  0x2c   :  { %1672 = vmatpush2.bf16.msra.mxu1 %v6604_v43  ;;  %1602 = vmatprep.subr.bf16.mxu0 %v6605_v44 }
  0x2d   :  { %1673 = vmatprep.subr.bf16.mxu1 %v6607_v45  ;;  %v6635_v45 = vld [vmem:[%s10546_s2 + $0x3a8] ss:$12 sps:$4 sm:$0xff]  }
  0x2f   :  { %1603 = vmatpush2.bf16.msra.mxu0 %v6609_v47  ;;  %v95_v47 = vld [vmem:[%s10544_s0 + $0x40] sm:$0xff] }
  0x30   :  { %1674 = vmatpush2.bf16.msra.mxu1 %v6610_v49  ;;  %1604 = vmatprep.subr.bf16.mxu0 %v6611_v50  ;;  %v99_v50 = vld [vmem:[%s10544_s0 + $0x60] sm:$0xff] }
  0x31   :  { %1675 = vmatprep.subr.bf16.mxu1 %v6613_v51  ;;  %v7105_v12 = vpop.eup %7104 }
  0x32   :  { %v42_v13 = vrot.slane %v7105_v12, %v7416_v8  ;;  %v46_v14 = vrot.slane %v7105_v12, %v7419_v9  ;;  %v50_v15 = vrot.slane %v7105_v12, %v7422_v10  ;;  %v54_v16 = vrot.slane %v7105_v12, %v7425_v11 }
  0x33   :  { %1605 = vmatpush2.bf16.msra.mxu0 %v6615_v52  ;;  %v66_v51 = vrot.slane %v7105_v12, %v7438_v27  ;;  %v70_v52 = vrot.slane %v7105_v12, %v69_v34 }
  0x34   :  { %1676 = vmatpush2.bf16.msra.mxu1 %v6616_v53  ;;  %1606 = vmatprep.subr.bf16.mxu0 %v6617_v54  ;;  %v79_v17 = vpack.c.bf16 %v42_v13, %v42_v13  ;;  %v80_v18 = vpack.c.bf16 %v46_v14, %v46_v14  ;;  %v81_v19 = vpack.c.bf16 %v50_v15, %v50_v15  ;;  %v6652_v15 = vld [vmem:[%s10546_s2 + $0x4fc] ss:$12 sps:$4 sm:$0xff]  }
  0x35   :  { %1677 = vmatprep.subr.bf16.mxu1 %v6619_v55  ;;  %v82_v20 = vpack.c.bf16 %v54_v16, %v54_v16  ;;  %v85_v13 = vpack.c.bf16 %v66_v51, %v66_v51  ;;  %v86_v14 = vpack.c.bf16 %v70_v52, %v70_v52  ;;  %v6662_v52 = vld [vmem:[%s10546_s2 + $0x4c8] ss:$12 sps:$4 sm:$0xff]  }
  0x36   :  { %v116_v21 = vpack.i.b16 %v79_v17, %v79_v17  ;;  %v123_v22 = vpack.i.b16 %v80_v18, %v80_v18  ;;  %v130_v23 = vpack.i.b16 %v81_v19, %v81_v19 }
  0x37   :  { %1607 = vmatpush2.bf16.msra.mxu0 %v6621_v56  ;;  %v137_v24 = vpack.i.b16 %v82_v20, %v82_v20 }
  0x38   :  { %1678 = vmatpush2.bf16.msra.mxu1 %v6622_v57  ;;  %1608 = vmatprep.subr.bf16.mxu0 %v6623_v58  ;;  %v121_v28 = vrot.slane %v116_v21, %v7416_v8  ;;  %v128_v29 = vrot.slane %v123_v22, %v7416_v8  ;;  %v135_v31 = vrot.slane %v130_v23, %v7416_v8  ;;  %v6643_v57 = vld [vmem:[%s10546_s2 + $0x394] ss:$12 sps:$4 sm:$0xff]   ;;  %v6647_v22 = vld [vmem:[%s10546_s2 + $0x378] ss:$12 sps:$4 sm:$0xff]  }
  0x39   :  { %1679 = vmatprep.subr.bf16.mxu1 %v6625_v59  ;;  %v142_v32 = vrot.slane %v137_v24, %v7416_v8  ;;  %v6646_v58 = vld [vmem:[%s10546_s2 + $0x514] ss:$12 sps:$4 sm:$0xff]   ;;  %v104_v59 = vld [vmem:[%s10544_s0 + $0x88] sm:$0xff] }
  0x3a   :  { %v7451_v35 = vcombine.low %v121_v28, %v128_v29  ;;  %v6658_v28 = vld [vmem:[%s10546_s2 + $0x4e4] ss:$12 sps:$4 sm:$0xff]   ;;  %v158_v29 = vpack.i.b16 %v85_v13, %v85_v13  ;;  %v6676_v13 = vld [vmem:[%s10546_s2 + $0x49c] ss:$12 sps:$4 sm:$0xff]  }
  0x3b   :  { %1609 = vmatpush2.bf16.msra.mxu0 %v6627_v60  ;;  %v7453_v36 = vcombine.low %v135_v31, %v142_v32  ;;  %v108_v60 = vld [vmem:[%s10544_s0 + $0xa8] sm:$0xff] }
  0x3c   :  { %1680 = vmatpush2.bf16.msra.mxu1 %v6628_v61  ;;  %1610 = vmatprep.subr.bf16.mxu0 %v6629_v62  ;;  %v195_v41 = vmul.bf16 %v7451_v35, %v87_v25  ;;  %v199_v42 = vmul.bf16 %v7451_v35, %v91_v26  ;;  %v58_v61 = vrot.slane %v7105_v12, %v7462_v39  ;;  %v6650_v25 = vld [vmem:[%s10546_s2 + $0x4f8] ss:$12 sps:$4 sm:$0xff]   ;;  %v6653_v32 = vld [vmem:[%s10546_s2 + $0x360] ss:$12 sps:$4 sm:$0xff]  }
  0x3d   :  { %1681 = vmatprep.subr.bf16.mxu1 %v6631_v63  ;;  %v196_v43 = vmul.bf16 %v7453_v36, %v88_v30  ;;  %v200_v44 = vmul.bf16 %v7453_v36, %v92_v33  ;;  %v204_v48 = vmul.bf16 %v7453_v36, %v96_v37  ;;  %v208_v49 = vmul.bf16 %v7453_v36, %v100_v38  ;;  %v6641_v63 = vld [vmem:[%s10546_s2 + $0x390] ss:$12 sps:$4 sm:$0xff]   ;;  %v6656_v33 = vld [vmem:[%s10546_s2 + $0x4e0] ss:$12 sps:$4 sm:$0xff]  }
  0x3e   :  { %v7486_v53 = vcombine.high %v195_v41, %v199_v42  ;;  %v7490_v55 = vcombine.low %v195_v41, %v199_v42  ;;  %v62_v62 = vrot.slane %v7105_v12, %v7465_v40  ;;  %v212_v16 = vmul.bf16 %v7453_v36, %v104_v59  ;;  %v6655_v26 = vld [vmem:[%s10546_s2 + $0x364] ss:$12 sps:$4 sm:$0xff]   ;;  %v112_v37 = vld [vmem:[%s10544_s0 + $0xc8] sm:$0xff]  ;;  %v90_v59 = vld [vmem:[%s10544_s0 + $0x18] sm:$0xff] }
  0x3f   :  { %1611 = vmatpush2.bf16.msra.mxu0 %v6633_v2  ;;  %v7488_v54 = vcombine.high %v196_v43, %v200_v44  ;;  %v7492_v56 = vcombine.low %v196_v43, %v200_v44  ;;  %v7516_v1 = vcombine.high %v204_v48, %v208_v49  ;;  %v203_v2 = vmul.bf16 %v7451_v35, %v95_v47  ;;  %v111_v42 = vld [vmem:[%s10544_s0 + $0xc0] sm:$0xff]  ;;  %v6661_v43 = vld [vmem:[%s10546_s2 + $0x34c] ss:$12 sps:$4 sm:$0xff]  }
  0x40   :  { %1682 = vmatpush2.bf16.msra.mxu1 %v6634_v3  ;;  %1722 = vmatprep.subr.bf16.mxu0 %v6637_v4  ;;  %v207_v3 = vmul.bf16 %v7451_v35, %v99_v50  ;;  %v103_v4 = vld [vmem:[%s10544_s0 + $0x80] sm:$0xff]  ;;  %v83_v17 = vpack.c.bf16 %v58_v61, %v58_v61  ;;  %v84_v18 = vpack.c.bf16 %v62_v62, %v62_v62  ;;  %v6664_v44 = vld [vmem:[%s10546_s2 + $0x4cc] ss:$12 sps:$4 sm:$0xff]   ;;  %v6665_v62 = vld [vmem:[%s10546_s2 + $0x330] ss:$12 sps:$4 sm:$0xff]  }
  0x41   :  { %1793 = vmatprep.subr.bf16.mxu1 %v6640_v5  ;;  %1612 = vmatprep.mubr.bf16.mxu0 %v7486_v53  ;;  %v107_v5 = vld [vmem:[%s10544_s0 + $0xa0] sm:$0xff]  ;;  %v216_v19 = vmul.bf16 %v7453_v36, %v108_v60  ;;  %v211_v20 = vmul.bf16 %v7451_v35, %v103_v4  ;;  %v7545_v23 = vcombine.low %v204_v48, %v208_v49  ;;  %v6659_v48 = vld [vmem:[%s10546_s2 + $0x348] ss:$12 sps:$4 sm:$0xff]   ;;  %v94_v60 = vld [vmem:[%s10544_s0 + $0x38] sm:$0xff] }
  0x42   :  { %1683 = vmatprep.mubr.bf16.mxu1 %v7488_v54  ;;  %1613 = vmatmul.mubr.bf16.vlgmr.msra.gmra.mxu0 %v7490_v55  ;;  %v7531_v12 = vcombine.high %v203_v2, %v207_v3  ;;  %v215_v21 = vmul.bf16 %v7451_v35, %v107_v5  ;;  %v7547_v24 = vcombine.low %v203_v2, %v207_v3  ;;  %v89_v3 = vld [vmem:[%s10544_s0 + $0x10] sm:$0xff] }
  0x43   :  { %1684 = vmatmul.mubr.bf16.vlgmr.msra.gmra.mxu1 %v7492_v56  ;;  %1723 = vmatpush1.bf16.msra.mxu0 %v6635_v45  ;;  %v165_v30 = vpack.i.b16 %v86_v14, %v86_v14  ;;  %v144_v31 = vpack.i.b16 %v83_v17, %v83_v17  ;;  %v7564_v34 = vcombine.high %v212_v16, %v216_v19  ;;  %v93_v5 = vld [vmem:[%s10544_s0 + $0x30] sm:$0xff] }
  0x44   :  { %1794 = vmatpush1.bf16.msra.mxu1 %v6638_v46  ;;  %1724 = vmatprep.subr.bf16.mxu0 %v6643_v57  ;;  %v7569_v38 = vcombine.high %v211_v20, %v215_v21  ;;  %v151_v41 = vpack.i.b16 %v84_v18, %v84_v18  ;;  %v163_v45 = vrot.slane %v158_v29, %v7416_v8  ;;  %v6671_v18 = vld [vmem:[%s10546_s2 + $0x318] ss:$12 sps:$4 sm:$0xff]  }
  0x45   :  { %1795 = vmatprep.subr.bf16.mxu1 %v6646_v58  ;;  %1693 = vmatprep.mubr.bf16.mxu1 %v7516_v1  ;;  %v170_v46 = vrot.slane %v165_v30, %v7416_v8  ;;  %v149_v47 = vrot.slane %v144_v31, %v7416_v8  ;;  %v220_v49 = vmul.bf16 %v7453_v36, %v112_v37  ;;  %v6667_v36 = vld [vmem:[%s10546_s2 + $0x334] ss:$12 sps:$4 sm:$0xff]   ;;  %v6685_v31 = vld [vmem:[%s10546_s2 + $0x46c] ss:$12 sps:$4 sm:$0xff]  }
  0x46   :  { %1622 = vmatprep.mubr.bf16.mxu0 %v7531_v12  ;;  %v219_v50 = vmul.bf16 %v7451_v35, %v111_v42  ;;  %v156_v51 = vrot.slane %v151_v41, %v7416_v8  ;;  %v7596_v57 = vcombine.low %v212_v16, %v216_v19  ;;  %v7598_v58 = vcombine.low %v211_v20, %v215_v21  ;;  %v6670_v35 = vld [vmem:[%s10546_s2 + $0x4b4] ss:$12 sps:$4 sm:$0xff]   ;;  %v6674_v21 = vld [vmem:[%s10546_s2 + $0x498] ss:$12 sps:$4 sm:$0xff]  }
  0x47   :  { %1725 = vmatpush1.bf16.msra.mxu0 %v6641_v63  ;;  %v7612_v61 = vcombine.low %v163_v45, %v170_v46  ;;  %v6668_v63 = vld [vmem:[%s10546_s2 + $0x4b0] ss:$12 sps:$4 sm:$0xff]   ;;  %v7657_v19 = vcombine.low %v220_v49, %v220_v49  ;;  %v6680_v30 = vld [vmem:[%s10546_s2 + $0x480] ss:$12 sps:$4 sm:$0xff]   ;;  %v6686_v37 = vld [vmem:[%s10546_s2 + $0x588] ss:$12 sps:$4 sm:$0xff]  }
  0x48   :  { %1796 = vmatpush1.bf16.msra.mxu1 %v6644_v0  ;;  %1726 = vmatprep.subr.bf16.mxu0 %v6649_v6  ;;  %v7620_v0 = vcombine.high %v220_v49, %v220_v49  ;;  %v7622_v2 = vcombine.high %v219_v50, %v219_v50  ;;  %v7627_v4 = vcombine.low %v149_v47, %v156_v51  ;;  %v6673_v6 = vld [vmem:[%s10546_s2 + $0x31c] ss:$12 sps:$4 sm:$0xff]   ;;  %v6691_v41 = vld [vmem:[%s10546_s2 + $0x454] ss:$12 sps:$4 sm:$0xff]   ;;  %v6695_v47 = vld [vmem:[%s10546_s2 + $0x438] ss:$12 sps:$4 sm:$0xff]  }
  0x49   :  { %1797 = vmatprep.subr.bf16.mxu1 %v6652_v15  ;;  %v7641_v14 = vmul.bf16 %v7612_v61, %v90_v59  ;;  %v7645_v15 = vmul.bf16 %v7612_v61, %v94_v60  ;;  %v7659_v20 = vcombine.low %v219_v50, %v219_v50  ;;  %v6694_v42 = vld [vmem:[%s10546_s2 + $0x574] ss:$12 sps:$4 sm:$0xff]   ;;  %v6697_v45 = vld [vmem:[%s10546_s2 + $0x43c] ss:$12 sps:$4 sm:$0xff]   ;;  %v6703_v49 = vld [vmem:[%s10546_s2 + $0x424] ss:$12 sps:$4 sm:$0xff]  }
  0x4a   :  { %1623 = vmatmul.mubr.bf16.gmra.mxu0 %v7547_v24  ;;  %v7649_v16 = vmul.bf16 %v7627_v4, %v89_v3  ;;  %v7652_v17 = vmul.bf16 %v7627_v4, %v93_v5  ;;  %v6700_v46 = vld [vmem:[%s10546_s2 + $0x55c] ss:$12 sps:$4 sm:$0xff]   ;;  %v6706_v50 = vld [vmem:[%s10546_s2 + $0x544] ss:$12 sps:$4 sm:$0xff]   ;;  %v6701_v51 = vld [vmem:[%s10546_s2 + $0x420] ss:$12 sps:$4 sm:$0xff]  }
  0x4b   :  { %1694 = vmatmul.mubr.bf16.gmra.mxu1 %v7545_v23  ;;  %1727 = vmatpush1.bf16.msra.mxu0 %v6647_v22  ;;  %v6679_v22 = vld [vmem:[%s10546_s2 + $0x304] ss:$12 sps:$4 sm:$0xff]   ;;  %v6709_v59 = vld [vmem:[%s10546_s2 + $0x40c] ss:$12 sps:$4 sm:$0xff]   ;;  %v7756_v5 = vcombine.low %v7641_v14, %v7645_v15 }
  0x4c   :  { %1798 = vmatpush1.bf16.msra.mxu1 %v6650_v25  ;;  %1728 = vmatprep.subr.bf16.mxu0 %v6655_v26  ;;  %v6682_v25 = vld [vmem:[%s10546_s2 + $0x484] ss:$12 sps:$4 sm:$0xff]   ;;  %v6677_v26 = vld [vmem:[%s10546_s2 + $0x300] ss:$12 sps:$4 sm:$0xff]   ;;  %v7679_v29 = vcombine.high %v7649_v16, %v7652_v17 }
  0x4d   :  { %1799 = vmatprep.subr.bf16.mxu1 %v6658_v28  ;;  %1703 = vmatprep.mubr.bf16.mxu1 %v7564_v34  ;;  %v7675_v28 = vcombine.high %v7641_v14, %v7645_v15  ;;  %v6710_v60 = vld [vmem:[%s10546_s2 + $0x170] ss:$12 sps:$4 sm:$0xff]   ;;  %v6716_v15 = vld [vmem:[%s10546_s2 + $0x98] ss:$12 sps:$4 sm:$0xff]  }
  0x4e   :  { %1632 = vmatprep.mubr.bf16.mxu0 %v7569_v38  ;;  %v6712_v14 = vld [vmem:[%s10546_s2 + $0x3f0] ss:$12 sps:$4 sm:$0xff]  }
  0x4f   :  { %1729 = vmatpush1.bf16.msra.mxu0 %v6653_v32  ;;  %v6688_v32 = vld [vmem:[%s10546_s2 + $0x58c] ss:$12 sps:$4 sm:$0xff]  }
  0x50   :  { %1800 = vmatpush1.bf16.msra.mxu1 %v6656_v33  ;;  %1730 = vmatprep.subr.bf16.mxu0 %v6661_v43  ;;  %v6683_v33 = vld [vmem:[%s10546_s2 + $0x468] ss:$12 sps:$4 sm:$0xff]   ;;  %v6689_v43 = vld [vmem:[%s10546_s2 + $0x450] ss:$12 sps:$4 sm:$0xff]  }
  0x51   :  { %1801 = vmatprep.subr.bf16.mxu1 %v6664_v44  ;;  %v6692_v44 = vld [vmem:[%s10546_s2 + $0x570] ss:$12 sps:$4 sm:$0xff]  }
  0x52   :  { %1633 = vmatmul.mubr.bf16.gmra.mxu0 %v7598_v58 }
  0x53   :  { %1704 = vmatmul.mubr.bf16.gmra.mxu1 %v7596_v57  ;;  %1731 = vmatpush1.bf16.msra.mxu0 %v6659_v48  ;;  %v6698_v48 = vld [vmem:[%s10546_s2 + $0x558] ss:$12 sps:$4 sm:$0xff]  }
  0x54   :  { %1802 = vmatpush1.bf16.msra.mxu1 %v6662_v52  ;;  %1732 = vmatprep.subr.bf16.mxu0 %v6667_v36  ;;  %v6704_v52 = vld [vmem:[%s10546_s2 + $0x540] ss:$12 sps:$4 sm:$0xff]   ;;  %v98_v36 = vld [vmem:[%s10544_s0 + $0x58] sm:$0xff] }
  0x55   :  { %1803 = vmatprep.subr.bf16.mxu1 %v6670_v35  ;;  %1713 = vmatprep.mubr.bf16.mxu1 %v7620_v0  ;;  %v102_v35 = vld [vmem:[%s10544_s0 + $0x78] sm:$0xff] }
  0x56   :  { %1642 = vmatprep.mubr.bf16.mxu0 %v7622_v2  ;;  %v210_v3 = vmul.bf16 %v7612_v61, %v102_v35 }
  0x57   :  { %1733 = vmatpush1.bf16.msra.mxu0 %v6665_v62  ;;  %v6707_v62 = vld [vmem:[%s10546_s2 + $0x408] ss:$12 sps:$4 sm:$0xff]  }
  0x58   :  { %1804 = vmatpush1.bf16.msra.mxu1 %v6668_v63  ;;  %1734 = vmatprep.subr.bf16.mxu0 %v6673_v6  ;;  %v206_v63 = vmul.bf16 %v7612_v61, %v98_v36  ;;  %v6711_v6 = vld [vmem:[%s10546_s2 + $0xb0] ss:$12 sps:$4 sm:$0xff]  }
  0x59   :  { %1805 = vmatprep.subr.bf16.mxu1 %v6676_v13  ;;  %v6714_v13 = vld [vmem:[%s10546_s2 + $0x3f4] ss:$12 sps:$4 sm:$0xff]   ;;  %v6730_v36 = vld [vmem:[%s10546_s2 + $0x230] ss:$12 sps:$4 sm:$0xff]  }
  0x5a   :  { %1643 = vmatmul.mubr.bf16.gmra.mxu0 %v7659_v20 }
  0x5b   :  { %1714 = vmatmul.mubr.bf16.gmra.mxu1 %v7657_v19  ;;  %1735 = vmatpush1.bf16.msra.mxu0 %v6671_v18  ;;  %v6715_v18 = vld [vmem:[%s10546_s2 + $0x158] ss:$12 sps:$4 sm:$0xff]  }
  0x5c   :  { %1806 = vmatpush1.bf16.msra.mxu1 %v6674_v21  ;;  %1736 = vmatprep.subr.bf16.mxu0 %v6679_v22  ;;  %v7773_v21 = vcombine.high %v206_v63, %v210_v3  ;;  %v106_v22 = vld [vmem:[%s10544_s0 + $0x98] sm:$0xff] }
  0x5d   :  { %1807 = vmatprep.subr.bf16.mxu1 %v6682_v25  ;;  %6101 = vmatprep.mubr.msk.bf16.mxu1 %vm1567_vm0, %v7675_v28  ;;  %v110_v25 = vld [vmem:[%s10544_s0 + $0xb8] sm:$0xff] }
  0x5e   :  { %1754 = vmatprep.mubr.bf16.mxu0 %v7679_v29 }
  0x5f   :  { %1737 = vmatpush1.bf16.msra.mxu0 %v6677_v26  ;;  %v6719_v26 = vld [vmem:[%s10546_s2 + $0x3dc] ss:$12 sps:$4 sm:$0xff]  }
  0x60   :  { %1808 = vmatpush1.bf16.msra.mxu1 %v6680_v30  ;;  %1738 = vmatprep.subr.bf16.mxu0 %v6685_v31  ;;  %v6720_v30 = vld [vmem:[%s10546_s2 + $0x140] ss:$12 sps:$4 sm:$0xff]   ;;  %v6717_v31 = vld [vmem:[%s10546_s2 + $0x3d8] ss:$12 sps:$4 sm:$0xff]  }
  0x61   :  { %1817 = vmatprep.subr.bf16.mxu1 %v6688_v32  ;;  %v6721_v32 = vld [vmem:[%s10546_s2 + $0x80] ss:$12 sps:$4 sm:$0xff]  }
  0x63   :  { %1739 = vmatpush2.bf16.msra.mxu0 %v6683_v33  ;;  %v214_v33 = vmul.bf16 %v7612_v61, %v106_v22  ;;  %v6736_v22 = vld [vmem:[%s10546_s2 + $0x2c0] ss:$12 sps:$4 sm:$0xff]  }
  0x64   :  { %1818 = vmatpush2.bf16.msra.mxu1 %v6686_v37  ;;  %1740 = vmatprep.subr.bf16.mxu0 %v6691_v41  ;;  %v218_v37 = vmul.bf16 %v7612_v61, %v110_v25  ;;  %v7798_v41 = vcombine.low %v206_v63, %v210_v3  ;;  %v6731_v3 = vld [vmem:[%s10546_s2 + $0xf8] ss:$12 sps:$4 sm:$0xff]   ;;  %v6737_v25 = vld [vmem:[%s10546_s2 + $0x20] ss:$12 sps:$4 sm:$0xff]  }
  0x65   :  { %1819 = vmatprep.subr.bf16.mxu1 %v6694_v42  ;;  %v6724_v42 = vld [vmem:[%s10546_s2 + $0x3c4] ss:$12 sps:$4 sm:$0xff]  }
  0x66   :  { %v7845_v63 = vcombine.low %v214_v33, %v218_v37 }
  0x67   :  { %1741 = vmatpush2.bf16.msra.mxu0 %v6689_v43  ;;  %v6725_v43 = vld [vmem:[%s10546_s2 + $0x128] ss:$12 sps:$4 sm:$0xff]  }
  0x68   :  { %1820 = vmatpush2.bf16.msra.mxu1 %v6692_v44  ;;  %1742 = vmatprep.subr.bf16.mxu0 %v6697_v45  ;;  %v97_v44 = vld [vmem:[%s10544_s0 + $0x50] sm:$0xff]  ;;  %v6722_v45 = vld [vmem:[%s10546_s2 + $0x3c0] ss:$12 sps:$4 sm:$0xff]  }
  0x69   :  { %1821 = vmatprep.subr.bf16.mxu1 %v6700_v46  ;;  %v6726_v46 = vld [vmem:[%s10546_s2 + $0x68] ss:$12 sps:$4 sm:$0xff]   ;;  %v205_v35 = vmul.bf16 %v7627_v4, %v97_v44 }
  0x6a   :  { %v6741_v44 = vld [vmem:[%s10546_s2 + $0x8] ss:$12 sps:$4 sm:$0xff]  }
  0x6b   :  { %1743 = vmatpush2.bf16.msra.mxu0 %v6695_v47  ;;  %v7815_v47 = vcombine.high %v214_v33, %v218_v37  ;;  %v6739_v37 = vld [vmem:[%s10546_s2 + $0xc8] ss:$12 sps:$4 sm:$0xff]  }
  0x6c   :  { %1822 = vmatpush2.bf16.msra.mxu1 %v6698_v48  ;;  %1744 = vmatprep.subr.bf16.mxu0 %v6703_v49  ;;  %v101_v48 = vld [vmem:[%s10544_s0 + $0x70] sm:$0xff]  ;;  %v114_v49 = vld [vmem:[%s10544_s0 + $0xd8] sm:$0xff] }
  0x6d   :  { %1823 = vmatprep.subr.bf16.mxu1 %v6706_v50  ;;  %v6727_v50 = vld [vmem:[%s10546_s2 + $0x110] ss:$12 sps:$4 sm:$0xff]  }
  0x6f   :  { %1745 = vmatpush2.bf16.msra.mxu0 %v6701_v51  ;;  %v6728_v51 = vld [vmem:[%s10546_s2 + $0x2f0] ss:$12 sps:$4 sm:$0xff]  }
  0x70   :  { %1824 = vmatpush2.bf16.msra.mxu1 %v6704_v52  ;;  %1746 = vmatprep.subr.bf16.mxu0 %v6709_v59  ;;  %v6729_v52 = vld [vmem:[%s10546_s2 + $0x50] ss:$12 sps:$4 sm:$0xff]   ;;  %v209_v59 = vmul.bf16 %v7627_v4, %v101_v48 }
  0x71   :  { %6359 = vmatprep.subr.bf16.mxu1 %v6710_v60  ;;  %v222_v60 = vmul.bf16 %v7612_v61, %v114_v49  ;;  %v105_v61 = vld [vmem:[%s10544_s0 + $0x90] sm:$0xff] }
  0x72   :  { %v6743_v48 = vld [vmem:[%s10546_s2 + $0x290] ss:$12 sps:$4 sm:$0xff]  }
  0x73   :  { %1826 = vmatmul.mubr.bf16.vlgmr.msra.gmra.mxu1 %v7756_v5  ;;  %1747 = vmatpush2.bf16.msra.mxu0 %v6707_v62  ;;  %v7843_v62 = vcombine.low %v7649_v16, %v7652_v17  ;;  %v109_v16 = vld [vmem:[%s10544_s0 + $0xb0] sm:$0xff]  ;;  %v6733_v17 = vld [vmem:[%s10546_s2 + $0x38] ss:$12 sps:$4 sm:$0xff]   ;;  %v7890_v33 = vcombine.low %v222_v60, %v222_v60 }
  0x74   :  { %6360 = vmatpush3.bf16.msra.mxu1 %v6711_v6  ;;  %1748 = vmatprep.subr.bf16.mxu0 %v6714_v13  ;;  %v6732_v6 = vld [vmem:[%s10546_s2 + $0x2d8] ss:$12 sps:$4 sm:$0xff]   ;;  %v6744_v49 = vld [vmem:[%s10546_s2 + $0x470] ss:$12 sps:$4 sm:$0xff]  }
  0x75   :  { %6361 = vmatprep.subr.bf16.mxu1 %v6715_v18  ;;  %6102 = vmatprep.mubr.msk.bf16.mxu1 %vm1567_vm0, %v7773_v21  ;;  %v6734_v13 = vld [vmem:[%s10546_s2 + $0x218] ss:$12 sps:$4 sm:$0xff]   ;;  %v7865_v18 = vcombine.high %v205_v35, %v209_v59 }
  0x77   :  { %1749 = vmatpush2.bf16.msra.mxu0 %v6712_v14  ;;  %v7867_v14 = vcombine.high %v222_v60, %v222_v60 }
  0x78   :  { %6362 = vmatpush3.bf16.msra.mxu1 %v6716_v15  ;;  %1750 = vmatprep.subr.bf16.mxu0 %v6719_v26  ;;  %v6735_v15 = vld [vmem:[%s10546_s2 + $0xe0] ss:$12 sps:$4 sm:$0xff]  }
  0x79   :  { %6363 = vmatprep.subr.bf16.mxu1 %v6720_v30  ;;  %v6738_v26 = vld [vmem:[%s10546_s2 + $0x200] ss:$12 sps:$4 sm:$0xff]   ;;  %v213_v30 = vmul.bf16 %v7627_v4, %v105_v61 }
  0x7a   :  { %v6754_v61 = vld [vmem:[%s10546_s2 + $0x380] ss:$12 sps:$4 sm:$0xff]  }
  0x7b   :  { %1836 = vmatmul.mubr.bf16.gmra.mxu1 %v7798_v41  ;;  %1751 = vmatpush2.bf16.msra.mxu0 %v6717_v31  ;;  %v217_v31 = vmul.bf16 %v7627_v4, %v109_v16 }
  0x7c   :  { %6364 = vmatpush3.bf16.msra.mxu1 %v6721_v32  ;;  %1752 = vmatprep.subr.bf16.mxu0 %v6724_v42  ;;  %v7888_v32 = vcombine.low %v205_v35, %v209_v59  ;;  %v6740_v42 = vld [vmem:[%s10546_s2 + $0x2a8] ss:$12 sps:$4 sm:$0xff]   ;;  %v6747_v35 = vld [vmem:[%s10546_s2 + $0x278] ss:$12 sps:$4 sm:$0xff]  }
  0x7d   :  { %6365 = vmatprep.subr.bf16.mxu1 %v6725_v43  ;;  %6103 = vmatprep.mubr.msk.bf16.mxu1 %vm1567_vm0, %v7815_v47  ;;  %v113_v43 = vld [vmem:[%s10544_s0 + $0xd0] sm:$0xff]  ;;  %v6749_v59 = vld [vmem:[%s10546_s2 + $0x1b8] ss:$12 sps:$4 sm:$0xff]  }
  0x7f   :  { %1753 = vmatpush2.bf16.msra.mxu0 %v6722_v45  ;;  %v6742_v45 = vld [vmem:[%s10546_s2 + $0x1e8] ss:$12 sps:$4 sm:$0xff]  }
  0x80   :  { %6366 = vmatpush3.bf16.msra.mxu1 %v6726_v46  ;;  %6399 = vmatprep.subr.bf16.mxu0 %v6728_v51  ;;  %v7907_v46 = vcombine.high %v213_v30, %v217_v31  ;;  %v6746_v51 = vld [vmem:[%s10546_s2 + $0x3b0] ss:$12 sps:$4 sm:$0xff]  }
  0x81   :  { %6367 = vmatprep.subr.bf16.mxu1 %v6727_v50  ;;  %v6745_v50 = vld [vmem:[%s10546_s2 + $0x1d0] ss:$12 sps:$4 sm:$0xff]  }
  0x82   :  { %1755 = vmatmul.mubr.bf16.vlgmr.msra.gmra.mxu0 %v7843_v62 }
  0x83   :  { %1846 = vmatmul.mubr.bf16.gmra.mxu1 %v7845_v63  ;;  %6400 = vmatpush3.bf16.msra.mxu0 %v6730_v36  ;;  %v7926_v36 = vcombine.low %v213_v30, %v217_v31  ;;  %v10553_v30 = vmov 0   ;;  %v6765_v31 = vld [vmem:[%s10546_s2 + $0x3e0] ss:$12 sps:$4 sm:$0xff]  }
  0x84   :  { %6368 = vmatpush3.bf16.msra.mxu1 %v6729_v52  ;;  %6401 = vmatprep.subr.bf16.mxu0 %v6732_v6  ;;  %v221_v52 = vmul.bf16 %v7627_v4, %v113_v43  ;;  %v6750_v4 = vld [vmem:[%s10546_s2 + $0x398] ss:$12 sps:$4 sm:$0xff]   ;;  %v6752_v6 = vld [vmem:[%s10546_s2 + $0x440] ss:$12 sps:$4 sm:$0xff]  }
  0x85   :  { %6369 = vmatprep.subr.bf16.mxu1 %v6731_v3  ;;  %1764 = vmatprep.mubr.bf16.mxu0 %v7865_v18  ;;  %v6751_v3 = vld [vmem:[%s10546_s2 + $0x260] ss:$12 sps:$4 sm:$0xff]  }
  0x86   :  { %6104 = vmatprep.mubr.msk.bf16.mxu1 %vm1567_vm0, %v7867_v14  ;;  %v7940_v60 = vcombine.high %v221_v52, %v221_v52  ;;  %v7958_v16 = vcombine.low %v221_v52, %v221_v52 }
  0x87   :  { %6402 = vmatpush3.bf16.msra.mxu0 %v6734_v13  ;;  %v6756_v13 = vld [vmem:[%s10546_s2 + $0x428] ss:$12 sps:$4 sm:$0xff]  }
  0x88   :  { %6370 = vmatpush3.bf16.msra.mxu1 %v6733_v17  ;;  %6403 = vmatprep.subr.bf16.mxu0 %v6736_v22  ;;  %v6755_v17 = vld [vmem:[%s10546_s2 + $0x248] ss:$12 sps:$4 sm:$0xff]   ;;  %v6759_v22 = vld [vmem:[%s10546_s2 + $0x410] ss:$12 sps:$4 sm:$0xff]  }
  0x89   :  { %6371 = vmatprep.subr.bf16.mxu1 %v6735_v15  ;;  %v6758_v15 = vld [vmem:[%s10546_s2 + $0x368] ss:$12 sps:$4 sm:$0xff]  }
  0x8a   :  { %1765 = vmatmul.mubr.bf16.gmra.mxu0 %v7888_v32 }
  0x8b   :  { %1856 = vmatmul.mubr.bf16.gmra.mxu1 %v7890_v33  ;;  %6404 = vmatpush3.bf16.msra.mxu0 %v6738_v26  ;;  %v6762_v26 = vld [vmem:[%s10546_s2 + $0x3f8] ss:$12 sps:$4 sm:$0xff]  }
  0x8c   :  { %6372 = vmatpush3.bf16.msra.mxu1 %v6737_v25  ;;  %6405 = vmatprep.subr.bf16.mxu0 %v6740_v42  ;;  %v6760_v25 = vld [vmem:[%s10546_s2 + $0x350] ss:$12 sps:$4 sm:$0xff]   ;;  %v6770_v42 = vld [vmem:[%s10546_s2 + $0x4e8] ss:$12 sps:$4 sm:$0xff]  }
  0x8d   :  { %6373 = vmatprep.subr.bf16.mxu1 %v6739_v37  ;;  %1774 = vmatprep.mubr.bf16.mxu0 %v7907_v46  ;;  %v6766_v37 = vld [vmem:[%s10546_s2 + $0x320] ss:$12 sps:$4 sm:$0xff]  }
  0x8e   :  { %1896 = vmatprep.mubr.bf16.mxu1 %v7486_v53  ;;  %v6748_v53 = vld [vmem:[%s10546_s2 + $0x458] ss:$12 sps:$4 sm:$0xff]  }
  0x8f   :  { %6406 = vmatpush3.bf16.msra.mxu0 %v6742_v45 }
  0x90   :  { %6374 = vmatpush3.bf16.msra.mxu1 %v6741_v44  ;;  %6407 = vmatprep.subr.bf16.mxu0 %v6743_v48 }
  0x91   :  { %6439 = vmatprep.subr.bf16.mxu1 %v6744_v49 }
  0x92   :  { %1775 = vmatmul.mubr.bf16.gmra.mxu0 %v7926_v36 }
  0x93   :  { %1897 = vmatmul.mubr.bf16.vlgmr.msra.gmra.mxu1 %v7490_v55  ;;  %6408 = vmatpush3.bf16.msra.mxu0 %v6745_v50  ;;  %v6753_v55 = vld [vmem:[%s10546_s2 + $0x1a0] ss:$12 sps:$4 sm:$0xff]  }
  0x94   :  { %6440 = vmatpush3.bf16.msra.mxu1 %v6746_v51  ;;  %6409 = vmatprep.subr.bf16.mxu0 %v6747_v35 }
  0x95   :  { %6441 = vmatprep.subr.bf16.mxu1 %v6748_v53  ;;  %1784 = vmatprep.mubr.bf16.mxu0 %v7940_v60 }
  0x96   :  { %1904 = vmatprep.mubr.bf16.mxu1 %v7531_v12  ;;  %v6757_v12 = vld [vmem:[%s10546_s2 + $0x188] ss:$12 sps:$4 sm:$0xff]  }
  0x97   :  { %6410 = vmatpush3.bf16.msra.mxu0 %v6749_v59 }
  0x98   :  { %6442 = vmatpush3.bf16.msra.mxu1 %v6750_v4  ;;  %6411 = vmatprep.subr.bf16.mxu0 %v6751_v3 }
  0x99   :  { %6443 = vmatprep.subr.bf16.mxu1 %v6752_v6 }
  0x9a   :  { %1785 = vmatmul.mubr.bf16.gmra.mxu0 %v7958_v16 }
  0x9b   :  { %1905 = vmatmul.mubr.bf16.gmra.mxu1 %v7547_v24  ;;  %6412 = vmatpush3.bf16.msra.mxu0 %v6753_v55  ;;  %v6761_v24 = vld [vmem:[%s10546_s2 + $0x530] ss:$12 sps:$4 sm:$0xff]  }
  0x9c   :  { %6444 = vmatpush3.bf16.msra.mxu1 %v6754_v61  ;;  %6413 = vmatprep.subr.bf16.mxu0 %v6755_v17 }
  0x9d   :  { %6445 = vmatprep.subr.bf16.mxu1 %v6756_v13  ;;  %1912 = vmatprep.mubr.bf16.mxu1 %v7569_v38  ;;  %v6764_v38 = vld [vmem:[%s10546_s2 + $0x518] ss:$12 sps:$4 sm:$0xff]  }
  0x9e   :  { %1960 = vmatprep.mubr.bf16.mxu0 %v7488_v54  ;;  %v6763_v54 = vld [vmem:[%s10546_s2 + $0x338] ss:$12 sps:$4 sm:$0xff]  }
  0x9f   :  { %6414 = vmatpush3.bf16.msra.mxu0 %v6757_v12 }
  0xa0   :  { %6446 = vmatpush3.bf16.msra.mxu1 %v6758_v15  ;;  %2056 = vmatprep.subr.bf16.mxu0 %v10553_v30 }
  0xa1   :  { %6447 = vmatprep.subr.bf16.mxu1 %v6759_v22 }
  0xa2   :  { %1961 = vmatmul.mubr.bf16.vlgmr.msra.gmra.mxu0 %v7492_v56  ;;  %v6768_v56 = vld [vmem:[%s10546_s2 + $0x3c8] ss:$12 sps:$4 sm:$0xff]  }
  0xa3   :  { %1913 = vmatmul.mubr.bf16.gmra.mxu1 %v7598_v58  ;;  %2057 = vmatpush1.bf16.msra.mxu0 %v6761_v24  ;;  %v6767_v58 = vld [vmem:[%s10546_s2 + $0x500] ss:$12 sps:$4 sm:$0xff]  }
  0xa4   :  { %6448 = vmatpush3.bf16.msra.mxu1 %v6760_v25  ;;  %2058 = vmatprep.subr.bf16.mxu0 %v10553_v30 }
  0xa5   :  { %6449 = vmatprep.subr.bf16.mxu1 %v6762_v26  ;;  %1920 = vmatprep.mubr.bf16.mxu1 %v7622_v2  ;;  %v6769_v2 = vld [vmem:[%s10546_s2 + $0x308] ss:$12 sps:$4 sm:$0xff]  }
  0xa6   :  { %1968 = vmatprep.mubr.bf16.mxu0 %v7516_v1  ;;  %v6771_v1 = vld [vmem:[%s10546_s2 + $0x4d0] ss:$12 sps:$4 sm:$0xff]  }
  0xa7   :  { %2059 = vmatpush1.bf16.msra.mxu0 %v6764_v38 }
  0xa8   :  { %6450 = vmatpush3.bf16.msra.mxu1 %v6763_v54  ;;  %2060 = vmatprep.subr.bf16.mxu0 %v10553_v30 }
  0xa9   :  { %6451 = vmatprep.subr.bf16.mxu1 %v6765_v31 }
  0xaa   :  { %1969 = vmatmul.mubr.bf16.gmra.mxu0 %v7545_v23  ;;  %v6772_v23 = vld [vmem:[%s10546_s2 + $0x4b8] ss:$12 sps:$4 sm:$0xff]  }
  0xab   :  { %1921 = vmatmul.mubr.bf16.gmra.mxu1 %v7659_v20  ;;  %2061 = vmatpush1.bf16.msra.mxu0 %v6767_v58  ;;  %v6774_v20 = vld [vmem:[%s10546_s2 + $0x488] ss:$12 sps:$4 sm:$0xff]  }
  0xac   :  { %6452 = vmatpush3.bf16.msra.mxu1 %v6766_v37  ;;  %2062 = vmatprep.subr.bf16.mxu0 %v10553_v30 }
  0xad   :  { %6453 = vmatprep.subr.bf16.mxu1 %v6768_v56  ;;  %2024 = vmatprep.mubr.bf16.mxu1 %v7679_v29 }
  0xae   :  { %1976 = vmatprep.mubr.bf16.mxu0 %v7564_v34  ;;  %v6773_v34 = vld [vmem:[%s10546_s2 + $0x4a0] ss:$12 sps:$4 sm:$0xff]  }
  0xaf   :  { %2063 = vmatpush1.bf16.msra.mxu0 %v6770_v42 }
  0xb0   :  { %6454 = vmatpush3.bf16.msra.mxu1 %v6769_v2  ;;  %2064 = vmatprep.subr.bf16.mxu0 %v10553_v30 }
  0xb2   :  { %1977 = vmatmul.mubr.bf16.gmra.mxu0 %v7596_v57  ;;  %v6775_v57 = vld [vmem:[%s10546_s2 + $0x590] ss:$12 sps:$4 sm:$0xff]  }
  0xb3   :  { %2025 = vmatmul.mubr.bf16.vlgmr.msra.gmra.mxu1 %v7843_v62  ;;  %2065 = vmatpush1.bf16.msra.mxu0 %v6771_v1 }
  0xb4   :  { %2032 = vmatprep.mubr.bf16.mxu1 %v7865_v18  ;;  %2066 = vmatprep.subr.bf16.mxu0 %v10553_v30 }
  0xb5   :  { %1984 = vmatprep.mubr.bf16.mxu0 %v7620_v0  ;;  %v6776_v0 = vld [vmem:[%s10546_s2 + $0x578] ss:$12 sps:$4 sm:$0xff]  }
  0xb7   :  { %2067 = vmatpush1.bf16.msra.mxu0 %v6772_v23 }
  0xb8   :  { %2068 = vmatprep.subr.bf16.mxu0 %v10553_v30 }
  0xba   :  { %1985 = vmatmul.mubr.bf16.gmra.mxu0 %v7657_v19  ;;  %v6777_v19 = vld [vmem:[%s10546_s2 + $0x560] ss:$12 sps:$4 sm:$0xff]  }
  0xbb   :  { %2033 = vmatmul.mubr.bf16.gmra.mxu1 %v7888_v32  ;;  %2069 = vmatpush1.bf16.msra.mxu0 %v6773_v34 }
  0xbc   :  { %2040 = vmatprep.mubr.bf16.mxu1 %v7907_v46  ;;  %2070 = vmatprep.subr.bf16.mxu0 %v10553_v30 }
  0xbd   :  { %6105 = vmatprep.mubr.msk.bf16.mxu0 %vm1567_vm0, %v7675_v28  ;;  %v6778_v28 = vld [vmem:[%s10546_s2 + $0x548] ss:$12 sps:$4 sm:$0xff]  }
  0xbf   :  { %2071 = vmatpush1.bf16.msra.mxu0 %v6774_v20 }
  0xc0   :  { %2080 = vmatprep.subr.bf16.mxu0 %v10553_v30 }
  0xc3   :  { %2041 = vmatmul.mubr.bf16.gmra.mxu1 %v7926_v36  ;;  %2081 = vmatpush2.bf16.msra.mxu0 %v6775_v57 }
  0xc4   :  { %2048 = vmatprep.mubr.bf16.mxu1 %v7940_v60  ;;  %2082 = vmatprep.subr.bf16.mxu0 %v10553_v30 }
  0xc7   :  { %2083 = vmatpush2.bf16.msra.mxu0 %v6776_v0 }
  0xc8   :  { %2084 = vmatprep.subr.bf16.mxu0 %v10553_v30 }
  0xcb   :  { %2049 = vmatmul.mubr.bf16.gmra.mxu1 %v7958_v16  ;;  %2085 = vmatpush2.bf16.msra.mxu0 %v6777_v19 }
  0xcc   :  { %2086 = vmatprep.subr.bf16.mxu0 %v10553_v30 }
  0xcd   :  { %13 = vsyncpa [#allocation3], 0  ;;  %v6781_v29 = vld [vmem:[%s10549_s5 + $0x2dc] ss:$52 sps:$4 sm:$0xff]   ;;  %v6779_v62 = vld [vmem:[%s10549_s5 + $0x2d8] ss:$52 sps:$4 sm:$0xff]  }
  0xce   :  { %3189 = vmatprep.subr.bf16.mxu1 %v6781_v29  ;;  %v6784_v18 = vld [vmem:[%s10549_s5 + $0x274] ss:$52 sps:$4 sm:$0xff]   ;;  %v6782_v32 = vld [vmem:[%s10549_s5 + $0x270] ss:$52 sps:$4 sm:$0xff]   ;;  %v6787_v43 = vld [vmem:[%s10549_s5 + $0x20c] ss:$52 sps:$4 sm:$0xff]  }
  0xcf   :  { %2087 = vmatpush2.bf16.msra.mxu0 %v6778_v28  ;;  %3190 = vmatpush1.bf16.msra.mxu1 %v6779_v62  ;;  %v6788_v44 = vld [vmem:[%s10549_s5 + $0x1a0] ss:$52 sps:$4 sm:$0xff]   ;;  %v6793_v45 = vld [vmem:[%s10549_s5 + $0x13c] ss:$52 sps:$4 sm:$0xff]   ;;  %v6814_v53 = vld [vmem:[%s10549_s5 + $0x4e4] ss:$52 sps:$4 sm:$0xff]  }
  0xd0   :  { %3191 = vmatprep.subr.bf16.mxu1 %v6784_v18  ;;  %v6794_v46 = vld [vmem:[%s10549_s5 + $0xd0] ss:$52 sps:$4 sm:$0xff]   ;;  %v6799_v48 = vld [vmem:[%s10549_s5 + $0x6c] ss:$52 sps:$4 sm:$0xff]   ;;  %v6808_v51 = vld [vmem:[%s10549_s5 + $0x5b4] ss:$52 sps:$4 sm:$0xff]  }
  0xd1   :  { %v6800_v49 = vld [vmem:[%s10549_s5] ss:$52 sps:$4 sm:$0xff]   ;;  %v6805_v50 = vld [vmem:[%s10549_s5 + $0x61c] ss:$52 sps:$4 sm:$0xff]   ;;  %v6815_v60 = vld [vmem:[%s10549_s5 + $0x478] ss:$52 sps:$4 sm:$0xff]  }
  0xd2   :  { %2089 = vmatmul.mubr.bf16.vlgmr.msra.gmra.mxu0 %v7756_v5  ;;  %v6785_v5 = vld [vmem:[%s10549_s5 + $0x208] ss:$52 sps:$4 sm:$0xff]   ;;  %v6806_v52 = vld [vmem:[%s10549_s5 + $0x5b0] ss:$52 sps:$4 sm:$0xff]   ;;  %v6811_v36 = vld [vmem:[%s10549_s5 + $0x54c] ss:$52 sps:$4 sm:$0xff]  }
  0xd3   :  { %6106 = vmatprep.mubr.msk.bf16.mxu0 %vm1567_vm0, %v7773_v21  ;;  %3192 = vmatpush1.bf16.msra.mxu1 %v6782_v32  ;;  %v6790_v21 = vld [vmem:[%s10549_s5 + $0x1a4] ss:$52 sps:$4 sm:$0xff]   ;;  %v6809_v35 = vld [vmem:[%s10549_s5 + $0x548] ss:$52 sps:$4 sm:$0xff]   ;;  %v6812_v59 = vld [vmem:[%s10549_s5 + $0x4e0] ss:$52 sps:$4 sm:$0xff]  }
  0xd4   :  { %3193 = vmatprep.subr.bf16.mxu1 %v6787_v43  ;;  %v6817_v4 = vld [vmem:[%s10549_s5 + $0x47c] ss:$52 sps:$4 sm:$0xff]   ;;  %v6820_v61 = vld [vmem:[%s10549_s5 + $0x414] ss:$52 sps:$4 sm:$0xff]   ;;  %v6823_v24 = vld [vmem:[%s10549_s5 + $0x3ac] ss:$52 sps:$4 sm:$0xff]  }
  0xd5   :  { %v6818_v13 = vld [vmem:[%s10549_s5 + $0x410] ss:$52 sps:$4 sm:$0xff]   ;;  %v6821_v38 = vld [vmem:[%s10549_s5 + $0x3a8] ss:$52 sps:$4 sm:$0xff]   ;;  %v6824_v1 = vld [vmem:[%s10549_s5 + $0x340] ss:$52 sps:$4 sm:$0xff]  }
  0xd6   :  { %v6826_v56 = vld [vmem:[%s10549_s5 + $0x344] ss:$52 sps:$4 sm:$0xff]   ;;  %vm2144_vm2 = vcmask 130048  }
  0xd7   :  { %3194 = vmatpush1.bf16.msra.mxu1 %v6785_v5 }
  0xd8   :  { %3195 = vmatprep.subr.bf16.mxu1 %v6790_v21 }
  0xda   :  { %2097 = vmatmul.mubr.bf16.gmra.mxu0 %v7798_v41  ;;  %v6791_v41 = vld [vmem:[%s10549_s5 + $0x138] ss:$52 sps:$4 sm:$0xff]  }
  0xdb   :  { %6107 = vmatprep.mubr.msk.bf16.mxu0 %vm1567_vm0, %v7815_v47  ;;  %3196 = vmatpush1.bf16.msra.mxu1 %v6788_v44  ;;  %v6796_v47 = vld [vmem:[%s10549_s5 + $0xd4] ss:$52 sps:$4 sm:$0xff]  }
  0xdc   :  { %3197 = vmatprep.subr.bf16.mxu1 %v6793_v45 }
  0xdf   :  { %3198 = vmatpush1.bf16.msra.mxu1 %v6791_v41 }
  0xe0   :  { %3199 = vmatprep.subr.bf16.mxu1 %v6796_v47 }
  0xe2   :  { %2105 = vmatmul.mubr.bf16.gmra.mxu0 %v7845_v63  ;;  %v6797_v63 = vld [vmem:[%s10549_s5 + $0x68] ss:$52 sps:$4 sm:$0xff]  }
  0xe3   :  { %6108 = vmatprep.mubr.msk.bf16.mxu0 %vm1567_vm0, %v7867_v14  ;;  %3200 = vmatpush1.bf16.msra.mxu1 %v6794_v46  ;;  %v6802_v14 = vld [vmem:[%s10549_s5 + $0x4] ss:$52 sps:$4 sm:$0xff]  }
  0xe4   :  { %3201 = vmatprep.subr.bf16.mxu1 %v6799_v48 }
  0xe7   :  { %3202 = vmatpush1.bf16.msra.mxu1 %v6797_v63 }
  0xe8   :  { %3203 = vmatprep.subr.bf16.mxu1 %v6802_v14 }
  0xea   :  { %2113 = vmatmul.mubr.bf16.gmra.mxu0 %v7890_v33  ;;  %v6803_v33 = vld [vmem:[%s10549_s5 + $0x618] ss:$52 sps:$4 sm:$0xff]  }
  0xeb   :  { %3292 = vmatprep.mubr.bf16.mxu0 %v10553_v30  ;;  %3204 = vmatpush1.bf16.msra.mxu1 %v6800_v49 }
  0xec   :  { %3205 = vmatprep.subr.bf16.mxu1 %v6805_v50 }
  0xef   :  { %3206 = vmatpush2.bf16.msra.mxu1 %v6803_v33 }
  0xf0   :  { %3207 = vmatprep.subr.bf16.mxu1 %v6808_v51 }
  0xf3   :  { %3208 = vmatpush2.bf16.msra.mxu1 %v6806_v52 }
  0xf4   :  { %3209 = vmatprep.subr.bf16.mxu1 %v6811_v36 }
  0xf7   :  { %3210 = vmatpush2.bf16.msra.mxu1 %v6809_v35 }
  0xf8   :  { %3211 = vmatprep.subr.bf16.mxu1 %v6814_v53 }
  0xfb   :  { %3212 = vmatpush2.bf16.msra.mxu1 %v6812_v59 }
  0xfc   :  { %3213 = vmatprep.subr.bf16.mxu1 %v6817_v4 }
  0xff   :  { %3214 = vmatpush2.bf16.msra.mxu1 %v6815_v60 }
 0x100   :  { %3215 = vmatprep.subr.bf16.mxu1 %v6820_v61 }
 0x102   :  { %v1614_v3 = vpop.f32.mrf.mxu0 }
 0x103   :  { %v1685_v6 = vpop.f32.mrf.mxu1  ;;  %3216 = vmatpush2.bf16.msra.mxu1 %v6818_v13 }
 0x104   :  { %v1686_v55 = vadd.f32 %v1685_v6, %v1614_v3  ;;  %v1616_v16 = vpop.f32.mrf.mxu0  ;;  %3217 = vmatprep.subr.bf16.mxu1 %v6823_v24 }
 0x105   :  { %v1687_v17 = vpop.f32.mrf.mxu1 }
 0x106   :  { %v8163_v12 = vadd.f32 %v1687_v17, %v1616_v16  ;;  %v1618_v15 = vpop.f32.mrf.mxu0 }
 0x107   :  { %v1689_v22 = vpop.f32.mrf.mxu1  ;;  %3218 = vmatpush2.bf16.msra.mxu1 %v6821_v38 }
 0x108   :  { %v1690_v25 = vadd.f32 %v1689_v22, %v1618_v15  ;;  %v1620_v26 = vpop.f32.mrf.mxu0  ;;  %3219 = vmatprep.subr.bf16.mxu1 %v6826_v56 }
 0x109   :  { %v1691_v54 = vpop.f32.mrf.mxu1 }
 0x10a   :  { %v1624_v37 = vpop.f32.mrf.mxu0  ;;  %v1692_v38 = vadd.f32 %v1691_v54, %v1620_v26 }
 0x10b   :  { %v1695_v31 = vpop.f32.mrf.mxu1  ;;  %3220 = vmatpush2.bf16.msra.mxu1 %v6824_v1 }
 0x10c   :  { %v1696_v58 = vadd.f32 %v1695_v31, %v1624_v37  ;;  %v1626_v42 = vpop.f32.mrf.mxu0 }
 0x10d   :  { %v1697_v2 = vpop.f32.mrf.mxu1 }
 0x10e   :  { %v8177_v23 = vadd.f32 %v1697_v2, %v1626_v42  ;;  %v1628_v20 = vpop.f32.mrf.mxu0 }
 0x10f   :  { %v1699_v34 = vpop.f32.mrf.mxu1 }
 0x110   :  { %v8179_v57 = vadd.f32 %v1699_v34, %v1628_v20  ;;  %v1630_v19 = vpop.f32.mrf.mxu0 }
 0x111   :  { %v1701_v0 = vpop.f32.mrf.mxu1 }
 0x112   :  { %v1634_v29 = vpop.f32.mrf.mxu0 }
 0x113   :  { %v1705_v28 = vpop.f32.mrf.mxu1 }
 0x114   :  { %v8181_v62 = vadd.f32 %v1705_v28, %v1634_v29  ;;  %v1636_v32 = vpop.f32.mrf.mxu0 }
 0x115   :  { %v1707_v18 = vpop.f32.mrf.mxu1 }
 0x116   :  { %v8183_v43 = vadd.f32 %v1707_v18, %v1636_v32  ;;  %v1638_v21 = vpop.f32.mrf.mxu0 }
 0x117   :  { %v1709_v5 = vpop.f32.mrf.mxu1 }
 0x118   :  { %v8185_v44 = vadd.f32 %v1709_v5, %v1638_v21  ;;  %v8189_v41 = vpop.f32.mrf.mxu0 }
 0x119   :  { %v8187_v45 = vpop.f32.mrf.mxu1 }
 0x11a   :  { %v1644_v46 = vpop.f32.mrf.mxu0 }
 0x11b   :  { %v1715_v47 = vpop.f32.mrf.mxu1 }
 0x11c   :  { %v8191_v48 = vadd.f32 %v1715_v47, %v1644_v46  ;;  %v8195_v14 = vpop.f32.mrf.mxu0 }
 0x11d   :  { %v8193_v63 = vpop.f32.mrf.mxu1 }
 0x11e   :  { %v1648_v50 = vpop.f32.mrf.mxu0 }
 0x11f   :  { %v1719_v49 = vpop.f32.mrf.mxu1  ;;  %v1702_v50 = vadd.f32 %v1701_v0, %v1630_v19 }
 0x120   :  { %v1649_v51 = vpop.f32.mrf.mxu0 }
 0x121   :  { %v1720_v33 = vpop.f32.mrf.mxu1 }
 0x133   :  { %v1827_v52 = vpop.f32.mrf.mxu1 }
 0x135   :  { %v1829_v36 = vpop.f32.mrf.mxu1 }
 0x137   :  { %v1831_v35 = vpop.f32.mrf.mxu1 }
 0x139   :  { %v1833_v53 = vpop.f32.mrf.mxu1 }
 0x13b   :  { %v1837_v59 = vpop.f32.mrf.mxu1 }
 0x13d   :  { %v1839_v4 = vpop.f32.mrf.mxu1 }
 0x13f   :  { %v1841_v60 = vpop.f32.mrf.mxu1 }
 0x141   :  { %v1843_v3 = vpop.f32.mrf.mxu1 }
 0x142   :  { %v1756_v6 = vpop.f32.mrf.mxu0 }
 0x143   :  { %v1847_v61 = vpop.f32.mrf.mxu1  ;;  %v1757_v16 = vadd.f32 %v1756_v6, %v1686_v55 }
 0x144   :  { %v1758_v17 = vpop.f32.mrf.mxu0 }
 0x145   :  { %v8197_v13 = vpop.f32.mrf.mxu1  ;;  %v8199_v15 = vadd.f32 %v1827_v52, %v1757_v16  ;;  %v1759_v37 = vadd.f32 %v1758_v17, %v8163_v12 }
 0x146   :  { %v1760_v22 = vpop.f32.mrf.mxu0 }
 0x147   :  { %v8201_v24 = vpop.f32.mrf.mxu1  ;;  %v1761_v31 = vadd.f32 %v1760_v22, %v1690_v25  ;;  %v2167_v55 = vmul.f32 %v8199_v15, %v8199_v15  ;;  %v8218_v54 = vadd.f32 %v1829_v36, %v1759_v37 }
 0x148   :  { %v1762_v56 = vpop.f32.mrf.mxu0 }
 0x149   :  { %v8204_v2 = vpop.f32.mrf.mxu1  ;;  %v8206_v42 = vadd.f32 %v1831_v35, %v1761_v31  ;;  %v1763_v1 = vadd.f32 %v1762_v56, %v1692_v38  ;;  %v2168_v52 = vmul.f32 %v8218_v54, %v8218_v54 }
 0x14a   :  { %v1766_v34 = vpop.f32.mrf.mxu0 }
 0x14b   :  { %v8210_v20 = vpop.f32.mrf.mxu1  ;;  %v2120_v28 = vadd.f32 %v8206_v42, %v8199_v15  ;;  %v2170_v25 = vmul.f32 %v8206_v42, %v8206_v42  ;;  %v8216_v26 = vadd.f32 %v1833_v53, %v1763_v1  ;;  %v1767_v12 = vadd.f32 %v1766_v34, %v1696_v58 }
 0x14c   :  { %v1768_v29 = vpop.f32.mrf.mxu0 }
 0x14d   :  { %v8220_v18 = vpop.f32.mrf.mxu1  ;;  %v2188_v32 = vadd.f32 %v2170_v25, %v2167_v55  ;;  %v8222_v5 = vadd.f32 %v1837_v59, %v1767_v12  ;;  %v2171_v21 = vmul.f32 %v8216_v26, %v8216_v26  ;;  %v1769_v47 = vadd.f32 %v1768_v29, %v8177_v23 }
 0x14e   :  { %v1770_v46 = vpop.f32.mrf.mxu0  ;;  %v2132_v36 = vadd.f32 %v8216_v26, %v8218_v54 }
 0x14f   :  { %v1861_v49 = vpop.f32.mrf.mxu1  ;;  %v2121_v33 = vadd.f32 %v2120_v28, %v8222_v5  ;;  %v2173_v58 = vmul.f32 %v8222_v5, %v8222_v5  ;;  %v1771_v51 = vadd.f32 %v1770_v46, %v8179_v57  ;;  %v8235_v35 = vadd.f32 %v1839_v4, %v1769_v47 }
 0x150   :  { %v1772_v53 = vpop.f32.mrf.mxu0  ;;  %v2200_v19 = vadd.f32 %v2171_v21, %v2168_v52 }
 0x151   :  { %v1862_v23 = vpop.f32.mrf.mxu1  ;;  %v2189_v59 = vadd.f32 %v2188_v32, %v2173_v58  ;;  %v8237_v6 = vadd.f32 %v1841_v60, %v1771_v51  ;;  %v1773_v0 = vadd.f32 %v1772_v53, %v1702_v50  ;;  %v2133_v16 = vadd.f32 %v2132_v36, %v8235_v35 }
 0x152   :  { %v2174_v57 = vmul.f32 %v8235_v35, %v8235_v35  ;;  %v1776_v17 = vpop.f32.mrf.mxu0  ;;  %v1718_v23 = vadd.f32 %v8193_v63, %v8195_v14  ;;  %v6835_v63 = vld [vmem:[%s10549_s5 + $0x2e4] ss:$52 sps:$4 sm:$0xff]  }
 0x153   :  { %v6375_v22 = vpop.f32.mrf.mxu1  ;;  %v2122_v38 = vadd.f32 %v2121_v33, %v8237_v6  ;;  %v2176_v4 = vmul.f32 %v8237_v6, %v8237_v6  ;;  %v8245_v31 = vadd.f32 %v1843_v3, %v1773_v0  ;;  %v1777_v37 = vadd.f32 %v1776_v17, %v8181_v62 }
 0x154   :  { %v2201_v60 = vadd.f32 %v2200_v19, %v2174_v57  ;;  %v1778_v56 = vpop.f32.mrf.mxu0  ;;  %v1712_v3 = vadd.f32 %v8187_v45, %v8189_v41  ;;  %v6829_v57 = vld [vmem:[%s10549_s5 + $0x684] ss:$52 sps:$4 sm:$0xff]  }
 0x155   :  { %v6376_v1 = vpop.f32.mrf.mxu1  ;;  %v2190_v55 = vadd.f32 %v2189_v59, %v2176_v4  ;;  %v8248_v34 = vadd.f32 %v1847_v61, %v1777_v37  ;;  %v2177_v28 = vmul.f32 %v8245_v31, %v8245_v31  ;;  %v1779_v25 = vadd.f32 %v1778_v56, %v8183_v43  ;;  %3274 = vmatprep.subr.bf16.mxu0 %v6829_v57 }
 0x156   :  { %v8253_v12 = vadd.f32 %v6376_v1, %v6375_v22  ;;  %v1780_v29 = vpop.f32.mrf.mxu0  ;;  %v2134_v47 = vadd.f32 %v2133_v16, %v8245_v31  ;;  %v6827_v16 = vld [vmem:[%s10549_s5 + $0x680] ss:$52 sps:$4 sm:$0xff]  }
 0x157   :  { %v8255_v32 = vpop.f32.mrf.mxu1  ;;  %v2123_v62 = vadd.f32 %v2122_v38, %v8248_v34  ;;  %v2179_v21 = vmul.f32 %v8248_v34, %v8248_v34  ;;  %v1781_v61 = vadd.f32 %v1780_v29, %v8185_v44  ;;  %v8265_v46 = vadd.f32 %v8197_v13, %v1779_v25  ;;  %3275 = vmatpush1.bf16.msra.mxu0 %v6827_v16 }
 0x158   :  { %v1782_v43 = vpop.f32.mrf.mxu0  ;;  %v2202_v41 = vadd.f32 %v2201_v60, %v2177_v28  ;;  %3331 = vmatprep.subr.bf16.mxu0 %v6835_v63 }
 0x159   :  { %v8267_v49 = vpop.f32.mrf.mxu1  ;;  %v2191_v50 = vadd.f32 %v2190_v55, %v2179_v21  ;;  %v8270_v33 = vadd.f32 %v8201_v24, %v1781_v61  ;;  %v1783_v45 = vadd.f32 %v1782_v43, %v1712_v3  ;;  %v2135_v58 = vadd.f32 %v2134_v47, %v8265_v46 }
 0x15a   :  { %v2180_v51 = vmul.f32 %v8265_v46, %v8265_v46  ;;  %v1786_v44 = vpop.f32.mrf.mxu0 }
 0x15b   :  { %v6381_v52 = vpop.f32.mrf.mxu1  ;;  %v2124_v36 = vadd.f32 %v2123_v62, %v8270_v33  ;;  %v2182_v13 = vmul.f32 %v8270_v33, %v8270_v33  ;;  %v8279_v53 = vadd.f32 %v8204_v2, %v1783_v45  ;;  %v1787_v24 = vadd.f32 %v1786_v44, %v8191_v48  ;;  %v6832_v48 = vld [vmem:[%s10549_s5 + $0x68c] ss:$52 sps:$4 sm:$0xff]  }
 0x15c   :  { %v2203_v59 = vadd.f32 %v2202_v41, %v2180_v51  ;;  %v1788_v0 = vpop.f32.mrf.mxu0  ;;  %3416 = vmatprep.subr.bf16.mxu1 %v6832_v48 }
 0x15d   :  { %v6382_v19 = vpop.f32.mrf.mxu1  ;;  %v2192_v17 = vadd.f32 %v2191_v50, %v2182_v13  ;;  %v8291_v2 = vadd.f32 %v8210_v20, %v1787_v24  ;;  %v2183_v14 = vmul.f32 %v8279_v53, %v8279_v53  ;;  %v1789_v22 = vadd.f32 %v1788_v0, %v1718_v23 }
 0x15e   :  { %v8301_v38 = vadd.f32 %v6382_v19, %v6381_v52  ;;  %v1790_v4 = vpop.f32.mrf.mxu0  ;;  %v2136_v56 = vadd.f32 %v2135_v58, %v8279_v53 }
 0x15f   :  { %v8303_v37 = vpop.f32.mrf.mxu1  ;;  %v2125_v20 = vadd.f32 %v2124_v36, %v8291_v2  ;;  %v2185_v60 = vmul.f32 %v8291_v2, %v8291_v2  ;;  %v8310_v1 = vadd.f32 %v8220_v18, %v1789_v22  ;;  %v2204_v3 = vadd.f32 %v2203_v59, %v2183_v14 }
 0x160   :  { %v1791_v55 = vpop.f32.mrf.mxu0 }
 0x161   :  { %v8312_v28 = vpop.f32.mrf.mxu1  ;;  %v2126_v25 = vrot.slane %v2125_v20, 4  ;;  %v2193_v29 = vadd.f32 %v2192_v17, %v2185_v60  ;;  %v2137_v62 = vadd.f32 %v2136_v56, %v8310_v1  ;;  %v2186_v21 = vmul.f32 %v8310_v1, %v8310_v1 }
 0x162   :  { %v8319_v47 = vpop.f32.mrf.mxu0 }
 0x163   :  { %v8317_v61 = vpop.f32.mrf.mxu1  ;;  %v2127_v43 = vadd.f32 %v2126_v25, %v2125_v20  ;;  %v2194_v50 = vrot.slane %v2193_v29, 4  ;;  %v2138_v18 = vrot.slane %v2137_v62, 4  ;;  %v2205_v45 = vadd.f32 %v2204_v3, %v2186_v21 }
 0x164   :  { %v8323_v58 = vpop.f32.mrf.mxu0 }
 0x165   :  { %v8321_v41 = vpop.f32.mrf.mxu1  ;;  %v2128_v51 = vrot.slane %v2127_v43, 2  ;;  %v2195_v44 = vadd.f32 %v2194_v50, %v2193_v29  ;;  %v2139_v52 = vadd.f32 %v2138_v18, %v2137_v62  ;;  %v2206_v36 = vrot.slane %v2205_v45, 4 }
 0x166   :  { %v8327_v24 = vpop.f32.mrf.mxu0 }
 0x167   :  { %v8325_v13 = vpop.f32.mrf.mxu1  ;;  %v2129_v23 = vadd.f32 %v2128_v51, %v2127_v43  ;;  %v2196_v59 = vrot.slane %v2195_v44, 2  ;;  %v2140_v0 = vrot.slane %v2139_v52, 2  ;;  %v2207_v19 = vadd.f32 %v2206_v36, %v2205_v45 }
 0x168   :  { %v8331_v57 = vpop.f32.mrf.mxu0 }
 0x169   :  { %v8329_v16 = vpop.f32.mrf.mxu1  ;;  %v2130_v17 = vrot.slane %v2129_v23, 1  ;;  %v2197_v48 = vadd.f32 %v2196_v59, %v2195_v44  ;;  %v2141_v63 = vadd.f32 %v2140_v0, %v2139_v52  ;;  %v2208_v14 = vrot.slane %v2207_v19, 2 }
 0x16a   :  { %v8335_v4 = vpop.f32.mrf.mxu0 }
 0x16b   :  { %v8333_v22 = vpop.f32.mrf.mxu1  ;;  %v2131_v20 = vadd.f32 %v2130_v17, %v2129_v23  ;;  %v2198_v60 = vrot.slane %v2197_v48, 1  ;;  %v2142_v56 = vrot.slane %v2141_v63, 1  ;;  %v2209_v55 = vadd.f32 %v2208_v14, %v2207_v19 }
 0x16c   :  { %10587 = vst [vmem:[#allocation12_spill] sm:$0xff] %v8333_v22  ;;  %v8339_v29 = vpop.f32.mrf.mxu0 }
 0x16d   :  { %v8337_v25 = vpop.f32.mrf.mxu1  ;;  %v8341_v3 = vmul.f32 0.020408163, %v2131_v20  ;;  %v2199_v62 = vadd.f32 %v2198_v60, %v2197_v48  ;;  %v2143_v21 = vadd.f32 %v2142_v56, %v2141_v63  ;;  %v2210_v43 = vrot.slane %v2209_v55, 1 }
 0x16e   :  { %10588 = vst [vmem:[#allocation13_spill] sm:$0xff] %v8337_v25  ;;  %v8343_v18 = vpop.f32.mrf.mxu0 }
 0x16f   :  { %v6396_v50 = vpop.f32.mrf.mxu1  ;;  %v2231_v45 = vmul.f32 0.020408163, %v2199_v62  ;;  %v2234_v51 = vmul.f32 %v8341_v3, %v8341_v3  ;;  %v2261_v44 = vsub.f32 %v8291_v2, %v8341_v3  ;;  %v8349_v52 = vmul.f32 0.020408163, %v2143_v21 }
 0x170   :  { %v2211_v36 = vadd.f32 %v2210_v43, %v2209_v55  ;;  %v8351_v59 = vpop.f32.mrf.mxu0  ;;  %v2243_v0 = vsub.f32 %v8199_v15, %v8341_v3  ;;  %v2246_v19 = vsub.f32 %v8206_v42, %v8341_v3  ;;  %v2249_v48 = vsub.f32 %v8222_v5, %v8341_v3 }
 0x171   :  { %v6397_v23 = vpop.f32.mrf.mxu1  ;;  %v2237_v17 = vsub.f32 %v2231_v45, %v2234_v51  ;;  %v2252_v63 = vsub.f32 %v8237_v6, %v8341_v3  ;;  %v2235_v14 = vmul.f32 %v8349_v52, %v8349_v52  ;;  %v2244_v15 = vsub.f32 %v8218_v54, %v8349_v52 }
 0x172   :  { %v2232_v2 = vmul.f32 0.020408163, %v2211_v36  ;;  %v8365_v60 = vpop.f32.mrf.mxu0  ;;  %v2250_v42 = vsub.f32 %v8235_v35, %v8349_v52  ;;  %v2255_v43 = vsub.f32 %v8248_v34, %v8341_v3  ;;  %v2258_v54 = vsub.f32 %v8270_v33, %v8341_v3  ;;  %v8400_v33 = vld [vmem:[%s10547_s3] sm:$0x7] }
 0x173   :  { %v8363_v20 = vpop.f32.mrf.mxu1  ;;  %v2240_v56 = vmax.f32 %v2237_v17, 0.0  ;;  %10593 = vst [vmem:[#allocation18_spill] sm:$0xff] %v8400_v33  ;;  %v8413_v30 = vrot.slane %v8400_v33, %v7416_v8  ;;  %v2262_v27 = vsub.f32 %v8310_v1, %v8349_v52  ;;  %v2247_v11 = vsub.f32 %v8216_v26, %v8349_v52 }
 0x174   :  { %v2238_v55 = vsub.f32 %v2232_v2, %v2235_v14  ;;  %v8371_v62 = vpop.f32.mrf.mxu0  ;;  %v2253_v26 = vsub.f32 %v8245_v31, %v8349_v52 }
 0x175   :  { %v6456_v5 = vpop.f32.mrf.mxu1  ;;  %v2264_v21 = vadd.f32 1e-05, %v2240_v56 }
 0x176   :  { %v2241_v50 = vmax.f32 %v2238_v55, 0.0  ;;  %v8379_v51 = vpop.f32.mrf.mxu0 }
 0x177   :  { %v8377_v45 = vpop.f32.mrf.mxu1  ;;  %10589 = vst [vmem:[#allocation14_spill] sm:$0xff] %v8379_v51  ;;  %7106 = vrsqrt.f32 %v2264_v21 }
 0x178   :  { %v2265_v35 = vadd.f32 1e-05, %v2241_v50  ;;  %v8385_v23 = vpop.f32.mrf.mxu0  ;;  %v8407_v50 = vld [vmem:[%s10548_s4] sm:$0x7] }
 0x179   :  { %v8383_v36 = vpop.f32.mrf.mxu1  ;;  %10590 = vst [vmem:[#allocation15_spill] sm:$0xff] %v8385_v23  ;;  %v8417_v6 = vrot.slane %v8407_v50, %v7416_v8 }
 0x17a   :  { %7108 = vrsqrt.f32 %v2265_v35  ;;  %v8389_v2 = vpop.f32.mrf.mxu0 }
 0x17b   :  { %v8387_v17 = vpop.f32.mrf.mxu1  ;;  %10591 = vst [vmem:[#allocation16_spill] sm:$0xff] %v8389_v2 }
 0x17c   :  { %v8393_v14 = vpop.f32.mrf.mxu0 }
 0x17d   :  { %v8391_v34 = vpop.f32.mrf.mxu1  ;;  %10592 = vst [vmem:[#allocation17_spill] sm:$0xff] %v8393_v14 }
 0x17e   :  { %v6436_v55 = vpop.f32.mrf.mxu0 }
 0x17f   :  { %v8395_v56 = vpop.f32.mrf.mxu1 }
 0x180   :  { %v6437_v21 = vpop.f32.mrf.mxu0 }
 0x181   :  { %v8402_v3 = vpop.f32.mrf.mxu1  ;;  %v8423_v21 = vrot.slane %v8400_v33, %v7419_v9  ;;  %v8435_v33 = vrot.slane %v8407_v50, %v7419_v9 }
 0x183   :  { %v8409_v35 = vpop.f32.mrf.mxu1 }
 0x184   :  { %v7107_v55 = vpop.eup %7106 }
 0x185   :  { %v8425_v40 = vpop.f32.mrf.mxu1  ;;  %v8427_v39 = vmul.f32 %v7107_v55, %v2261_v44  ;;  %v2270_v10 = vmul.f32 %v7107_v55, %v2243_v0  ;;  %v2273_v14 = vmul.f32 %v7107_v55, %v2246_v19  ;;  %v2276_v8 = vmul.f32 %v7107_v55, %v2249_v48 }
 0x186   :  { %v2279_v25 = vmul.f32 %v7107_v55, %v2252_v63  ;;  %v2282_v22 = vmul.f32 %v7107_v55, %v2255_v43  ;;  %v2285_v23 = vmul.f32 %v7107_v55, %v2258_v54  ;;  %v6417_v43 = vadd.f32 %v8323_v58, %v8319_v47 }
 0x187   :  { %v8431_v2 = vpop.f32.mrf.mxu1  ;;  %v7109_v1 = vpop.eup %7108  ;;  %v2308_v51 = vmul.f32 %v8413_v30, %v2270_v10  ;;  %v2311_v44 = vmul.f32 %v8413_v30, %v2273_v14  ;;  %v8448_v10 = vadd.s32 48, %v7413_v7  ;;  %v2314_v58 = vmul.f32 %v8413_v30, %v2276_v8 }
 0x188   :  { %10594 = vst [vmem:[#allocation19_spill] sm:$0xff] %v8431_v2  ;;  %v2289_v0 = vmul.f32 %v7109_v1, %v2262_v27  ;;  %v2271_v2 = vmul.f32 %v7109_v1, %v2244_v15  ;;  %v2274_v48 = vmul.f32 %v7109_v1, %v2247_v11  ;;  %v2277_v63 = vmul.f32 %v7109_v1, %v2250_v42 }
 0x189   :  { %v8441_v19 = vpop.f32.mrf.mxu1  ;;  %v2346_v54 = vadd.f32 %v8417_v6, %v2308_v51  ;;  %v2349_v55 = vadd.f32 %v8417_v6, %v2311_v44  ;;  %v2280_v9 = vmul.f32 %v7109_v1, %v2253_v26  ;;  %v6380_v11 = vadd.f32 %v8267_v49, %v8255_v32 }
 0x18a   :  { %v2309_v31 = vmul.f32 %v8423_v21, %v2271_v2  ;;  %v2312_v27 = vmul.f32 %v8423_v21, %v2274_v48  ;;  %v2315_v47 = vmul.f32 %v8423_v21, %v2277_v63  ;;  %v6457_v42 = vadd.f32 %v6456_v5, %v8363_v20 }
 0x18b   :  { %v8450_v14 = vpop.f32.mrf.mxu1  ;;  %v8456_v15 = vpack.c.bf16 %v2349_v55, %v2346_v54  ;;  %v2318_v44 = vmul.f32 %v8423_v21, %v2280_v9  ;;  %v1963_v26 = vadd.f32 %v6417_v43, %v8253_v12  ;;  %v2317_v49 = vmul.f32 %v8413_v30, %v2279_v25  ;;  %v6830_v9 = vld [vmem:[%s10549_s5 + $0x688] ss:$52 sps:$4 sm:$0xff]  }
 0x18c   :  { %v2347_v51 = vadd.f32 %v8435_v33, %v2309_v31  ;;  %v2350_v2 = vadd.f32 %v8435_v33, %v2312_v27  ;;  %v2353_v32 = vadd.f32 %v8435_v33, %v2315_v47  ;;  %v2259_v48 = vsub.f32 %v8279_v53, %v8349_v52 }
 0x18d   :  { %v8461_v7 = vpop.f32.mrf.mxu1  ;;  %v6420_v8 = vadd.f32 %v8331_v57, %v8327_v24  ;;  %v2356_v5 = vadd.f32 %v8435_v33, %v2318_v44  ;;  %v2352_v63 = vadd.f32 %v8417_v6, %v2314_v58  ;;  %v2355_v12 = vadd.f32 %v8417_v6, %v2317_v49  ;;  %v6838_v57 = vld [vmem:[%s10549_s5 + $0x2ec] ss:$52 sps:$4 sm:$0xff]  }
 0x18e   :  { %v8473_v20 = vpack.c.bf16 %v2350_v2, %v2347_v51  ;;  %v10595_v25 = vsub.f32 %v8265_v46, %v8349_v52  ;;  %v2286_v43 = vmul.f32 %v7109_v1, %v2259_v48  ;;  %v2320_v24 = vmul.f32 %v8413_v30, %v2282_v22 }
 0x18f   :  { %v6476_v54 = vpop.f32.mrf.mxu1  ;;  %v6460_v55 = vadd.f32 %v8383_v36, %v8377_v45  ;;  %v8491_v31 = vpack.c.bf16 %v2356_v5, %v2353_v32  ;;  %v2027_v27 = vadd.f32 %v6457_v42, %v1963_v26  ;;  %v2323_v47 = vmul.f32 %v8413_v30, %v2285_v23 }
 0x190   :  { %v2283_v53 = vmul.f32 %v7109_v1, %v10595_v25  ;;  %3221 = vmatprep.mubr.bf16.mxu1 %v8473_v20  ;;  %v8495_v46 = vpack.c.bf16 %v2355_v12, %v2352_v63  ;;  %v2324_v52 = vmul.f32 %v8423_v21, %v2286_v43  ;;  %v2358_v1 = vadd.f32 %v8417_v6, %v2320_v24 }
 0x191   :  { %v6477_v58 = vpop.f32.mrf.mxu1  ;;  %3222 = vmatmul.mubr.bf16.vlgmr.msra.gmra.mxu1 %v8456_v15  ;;  %v6423_v45 = vadd.f32 %v8339_v29, %v8335_v4  ;;  %v2361_v42 = vadd.f32 %v8417_v6, %v2323_v47  ;;  %v1966_v23 = vadd.f32 %v6420_v8, %v6380_v11  ;;  %v2327_v26 = vmul.f32 %v8423_v21, %v2289_v0  ;;  %v10597_v47 = vld [vmem:[#allocation15_spill] sm:$0xff] }
 0x192   :  { %v2321_v22 = vmul.f32 %v8423_v21, %v2283_v53  ;;  %3231 = vmatprep.mubr.bf16.mxu1 %v8491_v31  ;;  %v2090_v36 = vpop.f32.mrf.mxu0  ;;  %3417 = vmatpush1.bf16.msra.mxu1 %v6830_v9  ;;  %v2362_v44 = vadd.f32 %v8435_v33, %v2324_v52  ;;  %v6463_v32 = vadd.f32 %v8391_v34, %v8387_v17  ;;  %vm2381_vm1 = vcmp.lt.s32.totalorder %v8448_v10, 49 }
 0x193   :  { %v8504_v51 = vadd.f32 %v2090_v36, %v2027_v27  ;;  %3473 = vmatprep.subr.bf16.mxu1 %v6838_v57  ;;  %v8511_v29 = vpack.c.bf16 %v2361_v42, %v2358_v1  ;;  %v2030_v49 = vadd.f32 %v6460_v55, %v1966_v23  ;;  %v6386_v11 = vadd.f32 %v8312_v28, %v8303_v37  ;;  %v10596_v27 = vld [vmem:[#allocation14_spill] sm:$0xff] }
 0x194   :  { %v2359_v2 = vadd.f32 %v8435_v33, %v2321_v22  ;;  %v2092_v4 = vpop.f32.mrf.mxu0  ;;  %v1971_v8 = vadd.f32 %v6423_v45, %v8301_v38  ;;  %v6426_v5 = vadd.f32 %v8351_v59, %v8343_v18  ;;  %v7163_v0 = vmov 0.0  }
 0x195   :  { %v2169_v17 = vmul.f32 %v8504_v51, %v8504_v51  ;;  %v8525_v10 = vsel %vm2381_vm1, 1.0, %v7163_v0  ;;  %v2365_v63 = vadd.f32 %v8435_v33, %v2327_v26  ;;  %v6466_v38 = vadd.f32 %v8402_v3, %v8395_v56  ;;  %v10599_v26 = vld [vmem:[#allocation12_spill] sm:$0xff] }
 0x196   :  { %v8514_v48 = vpack.c.bf16 %v2362_v44, %v2359_v2  ;;  %v2093_v21 = vpop.f32.mrf.mxu0  ;;  %v2035_v9 = vadd.f32 %v6463_v32, %v1971_v8  ;;  %v2145_v37 = vsel %vm2144_vm2, %v8504_v51, 0.0  ;;  %v6389_v59 = vadd.f32 %v8321_v41, %v8317_v61  ;;  %v10598_v2 = vld [vmem:[#allocation19_spill] sm:$0xff]  ;;  %v10600_v32 = vld [vmem:[#allocation13_spill] sm:$0xff] }
 0x197   :  { %v8523_v34 = vadd.f32 %v2093_v21, %v2030_v49  ;;  %v1974_v33 = vadd.f32 %v6426_v5, %v6386_v11  ;;  %v6429_v12 = vadd.f32 %v8371_v62, %v8365_v60  ;;  %v2326_v3 = vmul.f32 %v8413_v30, %v8427_v39  ;;  %v10602_v21 = vld [vmem:[#allocation17_spill] sm:$0xff] }
 0x198   :  { %v2095_v54 = vpop.f32.mrf.mxu0  ;;  %v2212_v53 = vsel %vm2144_vm2, %v2169_v17, 0.0  ;;  %v2415_v57 = vmul.f32 %v8525_v10, %v2365_v63  ;;  %v6469_v60 = vadd.f32 %v8425_v40, %v8409_v35  ;;  %v6392_v30 = vadd.f32 %v8329_v16, %v8325_v13 }
 0x199   :  { %v2146_v28 = vsel %vm2144_vm2, %v8523_v34, 0.0  ;;  %v2172_v18 = vmul.f32 %v8523_v34, %v8523_v34  ;;  %3232 = vmatmul.mubr.bf16.gmra.mxu1 %v8495_v46  ;;  %v2038_v39 = vadd.f32 %v6466_v38, %v1974_v33  ;;  %v6432_v58 = vadd.f32 %v10597_v47, %v10596_v27 }
 0x19a   :  { %v2147_v25 = vadd.f32 %v2146_v28, %v2145_v37  ;;  %3241 = vmatprep.mubr.bf16.mxu1 %v8514_v48  ;;  %v2098_v56 = vpop.f32.mrf.mxu0  ;;  %v2364_v1 = vadd.f32 %v8417_v6, %v2326_v3  ;;  %v1979_v45 = vadd.f32 %v6429_v12, %v6389_v59  ;;  %v8563_v36 = vpack.c.bf16 %v2415_v57, %v2415_v57 }
 0x19b   :  { %v2213_v43 = vsel %vm2144_vm2, %v2172_v18, 0.0  ;;  %v8546_v24 = vadd.f32 %v2098_v56, %v2035_v9  ;;  %v6472_v44 = vadd.f32 %v8441_v19, %v10598_v2  ;;  %v6395_v4 = vadd.f32 %v10600_v32, %v10599_v26  ;;  %v10601_v19 = vld [vmem:[#allocation16_spill] sm:$0xff] }
 0x19c   :  { %v2214_v61 = vadd.f32 %v2213_v43, %v2212_v53  ;;  %v2100_v41 = vpop.f32.mrf.mxu0  ;;  %v2043_v6 = vadd.f32 %v6469_v60, %v1979_v45  ;;  %v1982_v49 = vadd.f32 %v6432_v58, %v6392_v30  ;;  %v2414_v5 = vmul.f32 %v8525_v10, %v2364_v1 }
 0x19d   :  { %v2148_v62 = vsel %vm2144_vm2, %v8546_v24, 0.0  ;;  %v2175_v55 = vmul.f32 %v8546_v24, %v8546_v24  ;;  %v6435_v17 = vadd.f32 %v10602_v21, %v10601_v19  ;;  %v6475_v38 = vadd.f32 %v8461_v7, %v8450_v14 }
 0x19e   :  { %v2149_v22 = vadd.f32 %v2148_v62, %v2147_v25  ;;  %v2101_v52 = vpop.f32.mrf.mxu0  ;;  %v2046_v28 = vadd.f32 %v6472_v44, %v1982_v49  ;;  %v8585_v59 = vpack.c.bf16 %v2414_v5, %v2414_v5 }
 0x19f   :  { %v2215_v40 = vsel %vm2144_vm2, %v2175_v55, 0.0  ;;  %v8561_v35 = vadd.f32 %v2101_v52, %v2038_v39  ;;  %v1987_v33 = vadd.f32 %v6435_v17, %v6395_v4 }
 0x1a0   :  { %v2216_v42 = vadd.f32 %v2215_v40, %v2214_v61  ;;  %v2103_v23 = vpop.f32.mrf.mxu0  ;;  %v10603_v61 = vmov 0  }
 0x1a1   :  { %v2150_v13 = vsel %vm2144_vm2, %v8561_v35, 0.0  ;;  %v2178_v16 = vmul.f32 %v8561_v35, %v8561_v35  ;;  %3242 = vmatmul.mubr.bf16.gmra.mxu1 %v8511_v29  ;;  %v2051_v14 = vadd.f32 %v6475_v38, %v1987_v33 }
 0x1a2   :  { %v2151_v11 = vadd.f32 %v2150_v13, %v2149_v22  ;;  %3251 = vmatprep.mubr.bf16.mxu1 %v8563_v36  ;;  %v2106_v8 = vpop.f32.mrf.mxu0 }
 0x1a3   :  { %v2217_v0 = vsel %vm2144_vm2, %v2178_v16, 0.0  ;;  %v8579_v63 = vadd.f32 %v2106_v8, %v2043_v6 }
 0x1a4   :  { %v2218_v54 = vadd.f32 %v2217_v0, %v2216_v42  ;;  %v2108_v9 = vpop.f32.mrf.mxu0 }
 0x1a5   :  { %v2181_v37 = vmul.f32 %v8579_v63, %v8579_v63  ;;  %v2152_v12 = vsel %vm2144_vm2, %v8579_v63, 0.0 }
 0x1a6   :  { %v2109_v18 = vpop.f32.mrf.mxu0  ;;  %v2153_v7 = vadd.f32 %v2152_v12, %v2151_v11 }
 0x1a7   :  { %v2110_v25 = vadd.f32 %v2109_v18, %v2046_v28  ;;  %v2219_v3 = vsel %vm2144_vm2, %v2181_v37, 0.0  ;;  %v10604_v28 = vld [vmem:[#allocation7_spill] sm:$0xff]  ;;  %v10605_v18 = vld [vmem:[#allocation18_spill] sm:$0xff] }
 0x1a8   :  { %v2111_v56 = vpop.f32.mrf.mxu0  ;;  %v2220_v62 = vadd.f32 %v2219_v3, %v2218_v54  ;;  %v2304_v33 = vrot.slane %v10605_v18, %v10604_v28  ;;  %v6871_v18 = vld [vmem:[%s10549_s5 + $0x74] ss:$52 sps:$4 sm:$0xff]  }
 0x1a9   :  { %v2154_v53 = vsel %vm2144_vm2, %v2110_v25, 0.0  ;;  %v2184_v43 = vmul.f32 %v2110_v25, %v2110_v25  ;;  %3252 = vmatmul.mubr.bf16.gmra.mxu1 %v8585_v59  ;;  %v8604_v56 = vrot.slane %v8407_v50, %v10604_v28 }
 0x1aa   :  { %v2114_v57 = vpop.f32.mrf.mxu0  ;;  %3434 = vmatprep.mubr.bf16.mxu1 %v10603_v61  ;;  %v2155_v55 = vadd.f32 %v2154_v53, %v2153_v7 }
 0x1ab   :  { %v2221_v41 = vsel %vm2144_vm2, %v2184_v43, 0.0  ;;  %v2115_v60 = vadd.f32 %v2114_v57, %v2051_v14 }
 0x1ac   :  { %v2116_v39 = vpop.f32.mrf.mxu0  ;;  %v2222_v47 = vadd.f32 %v2221_v41, %v2220_v62 }
 0x1ad   :  { %v2156_v30 = vsel %vm2144_vm2, %v2115_v60, 0.0  ;;  %v2187_v27 = vmul.f32 %v2115_v60, %v2115_v60 }
 0x1ae   :  { %v2157_v58 = vadd.f32 %v2156_v30, %v2155_v55  ;;  %v2117_v22 = vpop.f32.mrf.mxu0 }
 0x1af   :  { %v2223_v52 = vsel %vm2144_vm2, %v2187_v27, 0.0  ;;  %v6836_v27 = vld [vmem:[%s10549_s5 + $0x2e8] ss:$52 sps:$4 sm:$0xff]  }
 0x1b0   :  { %v2158_v1 = vrot.slane %v2157_v58, 4  ;;  %v2224_v45 = vadd.f32 %v2223_v52, %v2222_v47  ;;  %v2118_v40 = vpop.f32.mrf.mxu0 }
 0x1b2   :  { %v2159_v42 = vadd.f32 %v2158_v1, %v2157_v58  ;;  %v2225_v23 = vrot.slane %v2224_v45, 4  ;;  %v6841_v1 = vld [vmem:[%s10549_s5 + $0x27c] ss:$52 sps:$4 sm:$0xff]  }
 0x1b4   :  { %v2160_v2 = vrot.slane %v2159_v42, 2  ;;  %v2226_v44 = vadd.f32 %v2225_v23, %v2224_v45  ;;  %v6844_v45 = vld [vmem:[%s10549_s5 + $0x284] ss:$52 sps:$4 sm:$0xff]  }
 0x1b5   :  { %v6839_v23 = vld [vmem:[%s10549_s5 + $0x278] ss:$52 sps:$4 sm:$0xff]  }
 0x1b6   :  { %v2161_v13 = vadd.f32 %v2160_v2, %v2159_v42  ;;  %v2227_v16 = vrot.slane %v2226_v44, 2  ;;  %v6842_v2 = vld [vmem:[%s10549_s5 + $0x280] ss:$52 sps:$4 sm:$0xff]  }
 0x1b8   :  { %v2162_v6 = vrot.slane %v2161_v13, 1  ;;  %v2228_v26 = vadd.f32 %v2227_v16, %v2226_v44  ;;  %v6847_v44 = vld [vmem:[%s10549_s5 + $0x214] ss:$52 sps:$4 sm:$0xff]   ;;  %v6845_v16 = vld [vmem:[%s10549_s5 + $0x210] ss:$52 sps:$4 sm:$0xff]  }
 0x1ba   :  { %v2163_v32 = vadd.f32 %v2162_v6, %v2161_v13  ;;  %v2229_v4 = vrot.slane %v2228_v26, 1  ;;  %v6850_v13 = vld [vmem:[%s10549_s5 + $0x21c] ss:$52 sps:$4 sm:$0xff]   ;;  %v6848_v6 = vld [vmem:[%s10549_s5 + $0x218] ss:$52 sps:$4 sm:$0xff]  }
 0x1bc   :  { %v2166_v49 = vmul.f32 0.020408163, %v2163_v32  ;;  %v2230_v11 = vadd.f32 %v2229_v4, %v2228_v26  ;;  %v6853_v26 = vld [vmem:[%s10549_s5 + $0x1ac] ss:$52 sps:$4 sm:$0xff]   ;;  %v6856_v32 = vld [vmem:[%s10549_s5 + $0x1b4] ss:$52 sps:$4 sm:$0xff]  }
 0x1bd   :  { %v6851_v4 = vld [vmem:[%s10549_s5 + $0x1a8] ss:$52 sps:$4 sm:$0xff]  }
 0x1be   :  { %v2233_v8 = vmul.f32 0.020408163, %v2230_v11  ;;  %v2236_v5 = vmul.f32 %v2166_v49, %v2166_v49  ;;  %v2245_v19 = vsub.f32 %v8504_v51, %v2166_v49  ;;  %v2248_v21 = vsub.f32 %v8523_v34, %v2166_v49 }
 0x1bf   :  { %v2251_v17 = vsub.f32 %v8546_v24, %v2166_v49  ;;  %v2254_v0 = vsub.f32 %v8561_v35, %v2166_v49  ;;  %v2263_v37 = vsub.f32 %v2115_v60, %v2166_v49  ;;  %v2257_v51 = vsub.f32 %v8579_v63, %v2166_v49 }
 0x1c0   :  { %v2239_v54 = vsub.f32 %v2233_v8, %v2236_v5  ;;  %v2260_v34 = vsub.f32 %v2110_v25, %v2166_v49  ;;  %v6833_v25 = vld [vmem:[%s10549_s5 + $0x2e0] ss:$52 sps:$4 sm:$0xff]   ;;  %v6854_v49 = vld [vmem:[%s10549_s5 + $0x1b0] ss:$52 sps:$4 sm:$0xff]  }
 0x1c1   :  { %v6859_v8 = vld [vmem:[%s10549_s5 + $0x144] ss:$52 sps:$4 sm:$0xff]   ;;  %v6862_v5 = vld [vmem:[%s10549_s5 + $0x14c] ss:$52 sps:$4 sm:$0xff]  }
 0x1c2   :  { %v2242_v9 = vmax.f32 %v2239_v54, 0.0  ;;  %v6868_v54 = vld [vmem:[%s10549_s5 + $0xe4] ss:$52 sps:$4 sm:$0xff]  }
 0x1c4   :  { %v2266_v38 = vadd.f32 1e-05, %v2242_v9  ;;  %v6863_v9 = vld [vmem:[%s10549_s5 + $0xd8] ss:$52 sps:$4 sm:$0xff]  }
 0x1c6   :  { %7110 = vrsqrt.f32 %v2266_v38  ;;  %v6866_v38 = vld [vmem:[%s10549_s5 + $0xe0] ss:$52 sps:$4 sm:$0xff]  }
 0x1d3   :  { %v7111_v12 = vpop.eup %7110 }
 0x1d4   :  { %v2290_v3 = vmul.f32 %v7111_v12, %v2263_v37  ;;  %v2272_v24 = vmul.f32 %v7111_v12, %v2245_v19  ;;  %v2275_v53 = vmul.f32 %v7111_v12, %v2248_v21  ;;  %v2278_v35 = vmul.f32 %v7111_v12, %v2251_v17  ;;  %v6857_v19 = vld [vmem:[%s10549_s5 + $0x140] ss:$52 sps:$4 sm:$0xff]   ;;  %v6860_v21 = vld [vmem:[%s10549_s5 + $0x148] ss:$52 sps:$4 sm:$0xff]  }
 0x1d5   :  { %v2281_v43 = vmul.f32 %v7111_v12, %v2254_v0  ;;  %v2284_v14 = vmul.f32 %v7111_v12, %v2257_v51  ;;  %v2287_v7 = vmul.f32 %v7111_v12, %v2260_v34  ;;  %v6865_v0 = vld [vmem:[%s10549_s5 + $0xdc] ss:$52 sps:$4 sm:$0xff]   ;;  %v6872_v12 = vld [vmem:[%s10549_s5 + $0x78] ss:$52 sps:$4 sm:$0xff]   ;;  %v6880_v34 = vld [vmem:[%s10549_s5 + $0x14] ss:$52 sps:$4 sm:$0xff]  }
 0x1d6   :  { %v2310_v57 = vmul.f32 %v2304_v33, %v2272_v24  ;;  %v2313_v41 = vmul.f32 %v2304_v33, %v2275_v53  ;;  %v2316_v60 = vmul.f32 %v2304_v33, %v2278_v35  ;;  %v2328_v11 = vmul.f32 %v2304_v33, %v2290_v3  ;;  %v6877_v51 = vld [vmem:[%s10549_s5 + $0xc] ss:$52 sps:$4 sm:$0xff]   ;;  %v6875_v3 = vld [vmem:[%s10549_s5 + $0x8] ss:$52 sps:$4 sm:$0xff]   ;;  %v6878_v24 = vld [vmem:[%s10549_s5 + $0x10] ss:$52 sps:$4 sm:$0xff]  }
 0x1d7   :  { %v2319_v62 = vmul.f32 %v2304_v33, %v2281_v43  ;;  %v2322_v55 = vmul.f32 %v2304_v33, %v2284_v14  ;;  %v2325_v39 = vmul.f32 %v2304_v33, %v2287_v7  ;;  %v6874_v33 = vld [vmem:[%s10549_s5 + $0x7c] ss:$52 sps:$4 sm:$0xff]   ;;  %v6883_v53 = vld [vmem:[%s10549_s5 + $0x624] ss:$52 sps:$4 sm:$0xff]   ;;  %v6886_v35 = vld [vmem:[%s10549_s5 + $0x62c] ss:$52 sps:$4 sm:$0xff]  }
 0x1d8   :  { %v2348_v30 = vadd.f32 %v8604_v56, %v2310_v57  ;;  %v2351_v50 = vadd.f32 %v8604_v56, %v2313_v41  ;;  %v2354_v63 = vadd.f32 %v8604_v56, %v2316_v60  ;;  %v2366_v17 = vadd.f32 %v8604_v56, %v2328_v11  ;;  %v6881_v43 = vld [vmem:[%s10549_s5 + $0x620] ss:$52 sps:$4 sm:$0xff]   ;;  %v6884_v14 = vld [vmem:[%s10549_s5 + $0x628] ss:$52 sps:$4 sm:$0xff]   ;;  %v6892_v57 = vld [vmem:[%s10549_s5 + $0x5c4] ss:$52 sps:$4 sm:$0xff]  }
 0x1d9   :  { %v2357_v47 = vadd.f32 %v8604_v56, %v2319_v62  ;;  %v2360_v58 = vadd.f32 %v8604_v56, %v2322_v55  ;;  %v2363_v22 = vadd.f32 %v8604_v56, %v2325_v39  ;;  %v6889_v7 = vld [vmem:[%s10549_s5 + $0x5bc] ss:$52 sps:$4 sm:$0xff]   ;;  %v6887_v41 = vld [vmem:[%s10549_s5 + $0x5b8] ss:$52 sps:$4 sm:$0xff]   ;;  %v6890_v60 = vld [vmem:[%s10549_s5 + $0x5c0] ss:$52 sps:$4 sm:$0xff]  }
 0x1da   :  { %v8619_v52 = vpack.c.bf16 %v2351_v50, %v2348_v30  ;;  %v2416_v37 = vmul.f32 %v8525_v10, %v2366_v17  ;;  %v6869_v10 = vld [vmem:[%s10549_s5 + $0x70] ss:$52 sps:$4 sm:$0xff]   ;;  %v6895_v62 = vld [vmem:[%s10549_s5 + $0x554] ss:$52 sps:$4 sm:$0xff]   ;;  %v6896_v30 = vld [vmem:[%s10549_s5 + $0x558] ss:$52 sps:$4 sm:$0xff]  }
 0x1db   :  { %v8627_v40 = vpack.c.bf16 %v2357_v47, %v2354_v63  ;;  %v8629_v42 = vpack.c.bf16 %v2363_v22, %v2360_v58  ;;  %v6898_v55 = vld [vmem:[%s10549_s5 + $0x55c] ss:$52 sps:$4 sm:$0xff]   ;;  %v6901_v50 = vld [vmem:[%s10549_s5 + $0x4ec] ss:$52 sps:$4 sm:$0xff]   ;;  %v6904_v63 = vld [vmem:[%s10549_s5 + $0x4f4] ss:$52 sps:$4 sm:$0xff]  }
 0x1dc   :  { %6229 = vmatmul.mubr.msk.bf16.vlgmr.msra.gmra.mxu0 %vm2144_vm2, %v8619_v52  ;;  %6233 = vmatmul.mubr.msk.bf16.vlgmr.msra.gmra.mxu1 %vm2144_vm2, %v8619_v52  ;;  %v8717_v56 = vpack.c.bf16 %v2416_v37, %v2416_v37  ;;  %v6893_v39 = vld [vmem:[%s10549_s5 + $0x550] ss:$52 sps:$4 sm:$0xff]   ;;  %v6910_v58 = vld [vmem:[%s10549_s5 + $0x48c] ss:$52 sps:$4 sm:$0xff]   ;;  %v6936_v37 = vld [vmem:[%s10549_s5 + $0x288] ss:$52 sps:$4 sm:$0xff]  }
 0x1dd   :  { %3332 = vmatpush1.bf16.msra.mxu0 %v6833_v25  ;;  %3474 = vmatpush1.bf16.msra.mxu1 %v6836_v27  ;;  %v6899_v25 = vld [vmem:[%s10549_s5 + $0x4e8] ss:$52 sps:$4 sm:$0xff]   ;;  %v6902_v27 = vld [vmem:[%s10549_s5 + $0x4f0] ss:$52 sps:$4 sm:$0xff]   ;;  %v6905_v22 = vld [vmem:[%s10549_s5 + $0x480] ss:$52 sps:$4 sm:$0xff]  }
 0x1de   :  { %3333 = vmatprep.subr.bf16.mxu0 %v6841_v1  ;;  %3475 = vmatprep.subr.bf16.mxu1 %v6844_v45  ;;  %v6907_v47 = vld [vmem:[%s10549_s5 + $0x484] ss:$52 sps:$4 sm:$0xff]   ;;  %v6908_v1 = vld [vmem:[%s10549_s5 + $0x488] ss:$52 sps:$4 sm:$0xff]   ;;  %v6942_v17 = vld [vmem:[%s10549_s5 + $0x6a0] ss:$52 sps:$4 sm:$0xff]  }
 0x1df   :  { %3302 = vmatprep.mubr.bf16.mxu0 %v10603_v61  ;;  %3444 = vmatprep.mubr.bf16.mxu1 %v10603_v61  ;;  %v6913_v45 = vld [vmem:[%s10549_s5 + $0x41c] ss:$52 sps:$4 sm:$0xff]  }
 0x1e0   :  { %v6926_v11 = vld [vmem:[%s10549_s5 + $0x350] ss:$52 sps:$4 sm:$0xff]  }
 0x1e1   :  { %3334 = vmatpush1.bf16.msra.mxu0 %v6839_v23  ;;  %3476 = vmatpush1.bf16.msra.mxu1 %v6842_v2  ;;  %v6916_v23 = vld [vmem:[%s10549_s5 + $0x424] ss:$52 sps:$4 sm:$0xff]  }
 0x1e2   :  { %3335 = vmatprep.subr.bf16.mxu0 %v6847_v44  ;;  %3477 = vmatprep.subr.bf16.mxu1 %v6850_v13  ;;  %v6911_v2 = vld [vmem:[%s10549_s5 + $0x418] ss:$52 sps:$4 sm:$0xff]   ;;  %v6914_v44 = vld [vmem:[%s10549_s5 + $0x420] ss:$52 sps:$4 sm:$0xff]  }
 0x1e3   :  { %v6919_v13 = vld [vmem:[%s10549_s5 + $0x3b4] ss:$52 sps:$4 sm:$0xff]  }
 0x1e4   :  { %6230 = vmatmul.mubr.msk.bf16.gmra.mxu0 %vm2144_vm2, %v8627_v40  ;;  %6234 = vmatmul.mubr.msk.bf16.gmra.mxu1 %vm2144_vm2, %v8627_v40 }
 0x1e5   :  { %3336 = vmatpush1.bf16.msra.mxu0 %v6845_v16  ;;  %3478 = vmatpush1.bf16.msra.mxu1 %v6848_v6  ;;  %v6922_v16 = vld [vmem:[%s10549_s5 + $0x3bc] ss:$52 sps:$4 sm:$0xff]  }
 0x1e6   :  { %3337 = vmatprep.subr.bf16.mxu0 %v6853_v26  ;;  %3479 = vmatprep.subr.bf16.mxu1 %v6856_v32  ;;  %v6917_v6 = vld [vmem:[%s10549_s5 + $0x3b0] ss:$52 sps:$4 sm:$0xff]   ;;  %v6920_v26 = vld [vmem:[%s10549_s5 + $0x3b8] ss:$52 sps:$4 sm:$0xff]  }
 0x1e7   :  { %3312 = vmatprep.mubr.bf16.mxu0 %v10603_v61  ;;  %3454 = vmatprep.mubr.bf16.mxu1 %v10603_v61  ;;  %v6925_v32 = vld [vmem:[%s10549_s5 + $0x34c] ss:$52 sps:$4 sm:$0xff]  }
 0x1e9   :  { %3338 = vmatpush1.bf16.msra.mxu0 %v6851_v4  ;;  %3480 = vmatpush1.bf16.msra.mxu1 %v6854_v49  ;;  %v6928_v4 = vld [vmem:[%s10549_s5 + $0x354] ss:$52 sps:$4 sm:$0xff]  }
 0x1ea   :  { %3339 = vmatprep.subr.bf16.mxu0 %v6859_v8  ;;  %3481 = vmatprep.subr.bf16.mxu1 %v6862_v5  ;;  %v6923_v49 = vld [vmem:[%s10549_s5 + $0x348] ss:$52 sps:$4 sm:$0xff]   ;;  %v6932_v5 = vld [vmem:[%s10549_s5 + $0x698] ss:$52 sps:$4 sm:$0xff]  }
 0x1eb   :  { %v6931_v8 = vld [vmem:[%s10549_s5 + $0x694] ss:$52 sps:$4 sm:$0xff]  }
 0x1ec   :  { %6231 = vmatmul.mubr.msk.bf16.gmra.mxu0 %vm2144_vm2, %v8629_v42  ;;  %6235 = vmatmul.mubr.msk.bf16.gmra.mxu1 %vm2144_vm2, %v8629_v42 }
 0x1ed   :  { %3340 = vmatpush1.bf16.msra.mxu0 %v6857_v19  ;;  %3482 = vmatpush1.bf16.msra.mxu1 %v6860_v21  ;;  %v6929_v19 = vld [vmem:[%s10549_s5 + $0x690] ss:$52 sps:$4 sm:$0xff]  }
 0x1ee   :  { %3341 = vmatprep.subr.bf16.mxu0 %v6865_v0  ;;  %3483 = vmatprep.subr.bf16.mxu1 %v6868_v54  ;;  %v6933_v21 = vld [vmem:[%s10549_s5 + $0x630] ss:$52 sps:$4 sm:$0xff]   ;;  %v6935_v54 = vld [vmem:[%s10549_s5 + $0x5c8] ss:$52 sps:$4 sm:$0xff]  }
 0x1ef   :  { %3322 = vmatprep.mubr.bf16.mxu0 %v10603_v61  ;;  %3464 = vmatprep.mubr.bf16.mxu1 %v10603_v61  ;;  %v6934_v0 = vld [vmem:[%s10549_s5 + $0x2f0] ss:$52 sps:$4 sm:$0xff]  }
 0x1f1   :  { %3342 = vmatpush1.bf16.msra.mxu0 %v6863_v9  ;;  %3484 = vmatpush1.bf16.msra.mxu1 %v6866_v38  ;;  %v6940_v9 = vld [vmem:[%s10549_s5 + $0x69c] ss:$52 sps:$4 sm:$0xff]   ;;  %v6947_v38 = vld [vmem:[%s10549_s5 + $0x300] ss:$52 sps:$4 sm:$0xff]  }
 0x1f2   :  { %3343 = vmatprep.subr.bf16.mxu0 %v6871_v18  ;;  %3485 = vmatprep.subr.bf16.mxu1 %v6874_v33  ;;  %v6937_v18 = vld [vmem:[%s10549_s5 + $0x560] ss:$52 sps:$4 sm:$0xff]  }
 0x1f3   :  { %v6938_v33 = vld [vmem:[%s10549_s5 + $0x220] ss:$52 sps:$4 sm:$0xff]  }
 0x1f4   :  { %6232 = vmatmul.mubr.msk.bf16.gmra.mxu0 %vm2144_vm2, %v8717_v56  ;;  %6236 = vmatmul.mubr.msk.bf16.gmra.mxu1 %vm2144_vm2, %v8717_v56 }
 0x1f5   :  { %3344 = vmatpush1.bf16.msra.mxu0 %v6869_v10  ;;  %3486 = vmatpush1.bf16.msra.mxu1 %v6872_v12  ;;  %v6939_v10 = vld [vmem:[%s10549_s5 + $0x4f8] ss:$52 sps:$4 sm:$0xff]  }
 0x1f6   :  { %3363 = vmatprep.mubr.bf16.mxu0 %v8473_v20  ;;  %3505 = vmatprep.mubr.bf16.mxu1 %v8473_v20  ;;  %v6943_v12 = vld [vmem:[%s10549_s5 + $0x1b8] ss:$52 sps:$4 sm:$0xff]  }
 0x1f7   :  { %3345 = vmatprep.subr.bf16.mxu0 %v6877_v51  ;;  %3487 = vmatprep.subr.bf16.mxu1 %v6880_v34  ;;  %v6944_v51 = vld [vmem:[%s10549_s5 + $0x490] ss:$52 sps:$4 sm:$0xff]  }
 0x1f8   :  { %v6945_v34 = vld [vmem:[%s10549_s5 + $0x2fc] ss:$52 sps:$4 sm:$0xff]  }
 0x1f9   :  { %3346 = vmatpush1.bf16.msra.mxu0 %v6875_v3  ;;  %3488 = vmatpush1.bf16.msra.mxu1 %v6878_v24  ;;  %v6948_v3 = vld [vmem:[%s10549_s5 + $0x150] ss:$52 sps:$4 sm:$0xff]   ;;  %v6949_v24 = vld [vmem:[%s10549_s5 + $0x428] ss:$52 sps:$4 sm:$0xff]  }
 0x1fa   :  { %3347 = vmatprep.subr.bf16.mxu0 %v6883_v53  ;;  %3489 = vmatprep.subr.bf16.mxu1 %v6886_v35  ;;  %v6952_v53 = vld [vmem:[%s10549_s5 + $0x298] ss:$52 sps:$4 sm:$0xff]   ;;  %v6950_v35 = vld [vmem:[%s10549_s5 + $0x294] ss:$52 sps:$4 sm:$0xff]  }
 0x1fd   :  { %3348 = vmatpush2.bf16.msra.mxu0 %v6881_v43  ;;  %3490 = vmatpush2.bf16.msra.mxu1 %v6884_v14  ;;  %v6953_v43 = vld [vmem:[%s10549_s5 + $0xe8] ss:$52 sps:$4 sm:$0xff]   ;;  %v6954_v14 = vld [vmem:[%s10549_s5 + $0x3c0] ss:$52 sps:$4 sm:$0xff]  }
 0x1fe   :  { %3349 = vmatprep.subr.bf16.mxu0 %v6889_v7  ;;  %3491 = vmatprep.subr.bf16.mxu1 %v6892_v57  ;;  %v6957_v7 = vld [vmem:[%s10549_s5 + $0x230] ss:$52 sps:$4 sm:$0xff]  }
 0x201   :  { %3350 = vmatpush2.bf16.msra.mxu0 %v6887_v41  ;;  %3492 = vmatpush2.bf16.msra.mxu1 %v6890_v60  ;;  %v6955_v41 = vld [vmem:[%s10549_s5 + $0x22c] ss:$52 sps:$4 sm:$0xff]  }
 0x202   :  { %3351 = vmatprep.subr.bf16.mxu0 %v6895_v62  ;;  %3493 = vmatprep.subr.bf16.mxu1 %v6898_v55  ;;  %v6958_v60 = vld [vmem:[%s10549_s5 + $0x80] ss:$52 sps:$4 sm:$0xff]   ;;  %v6959_v62 = vld [vmem:[%s10549_s5 + $0x358] ss:$52 sps:$4 sm:$0xff]  }
 0x205   :  { %3352 = vmatpush2.bf16.msra.mxu0 %v6893_v39  ;;  %3494 = vmatpush2.bf16.msra.mxu1 %v6896_v30  ;;  %v6962_v39 = vld [vmem:[%s10549_s5 + $0x1c8] ss:$52 sps:$4 sm:$0xff]  }
 0x206   :  { %3353 = vmatprep.subr.bf16.mxu0 %v6901_v50  ;;  %3495 = vmatprep.subr.bf16.mxu1 %v6904_v63  ;;  %v6960_v50 = vld [vmem:[%s10549_s5 + $0x1c4] ss:$52 sps:$4 sm:$0xff]  }
 0x207   :  { %v6963_v63 = vld [vmem:[%s10549_s5 + $0x18] ss:$52 sps:$4 sm:$0xff]  }
 0x209   :  { %3354 = vmatpush2.bf16.msra.mxu0 %v6899_v25  ;;  %3496 = vmatpush2.bf16.msra.mxu1 %v6902_v27  ;;  %v6966_v25 = vld [vmem:[%s10549_s5 + $0x2f8] ss:$52 sps:$4 sm:$0xff]   ;;  %v6969_v27 = vld [vmem:[%s10549_s5 + $0x160] ss:$52 sps:$4 sm:$0xff]  }
 0x20a   :  { %3355 = vmatprep.subr.bf16.mxu0 %v6907_v47  ;;  %3497 = vmatprep.subr.bf16.mxu1 %v6910_v58 }
 0x20d   :  { %3356 = vmatpush2.bf16.msra.mxu0 %v6905_v22  ;;  %3498 = vmatpush2.bf16.msra.mxu1 %v6908_v1  ;;  %v6964_v22 = vld [vmem:[%s10549_s5 + $0x2f4] ss:$52 sps:$4 sm:$0xff]   ;;  %v6967_v1 = vld [vmem:[%s10549_s5 + $0x15c] ss:$52 sps:$4 sm:$0xff]  }
 0x20e   :  { %3357 = vmatprep.subr.bf16.mxu0 %v6913_v45  ;;  %3499 = vmatprep.subr.bf16.mxu1 %v6916_v23  ;;  %v6972_v45 = vld [vmem:[%s10549_s5 + $0x290] ss:$52 sps:$4 sm:$0xff]  }
 0x211   :  { %3358 = vmatpush2.bf16.msra.mxu0 %v6911_v2  ;;  %3500 = vmatpush2.bf16.msra.mxu1 %v6914_v44  ;;  %v6975_v2 = vld [vmem:[%s10549_s5 + $0xf8] ss:$52 sps:$4 sm:$0xff]  }
 0x212   :  { %3359 = vmatprep.subr.bf16.mxu0 %v6919_v13  ;;  %3501 = vmatprep.subr.bf16.mxu1 %v6922_v16  ;;  %v6970_v13 = vld [vmem:[%s10549_s5 + $0x28c] ss:$52 sps:$4 sm:$0xff]   ;;  %v6973_v16 = vld [vmem:[%s10549_s5 + $0xf4] ss:$52 sps:$4 sm:$0xff]  }
 0x215   :  { %3360 = vmatpush2.bf16.msra.mxu0 %v6917_v6  ;;  %3502 = vmatpush2.bf16.msra.mxu1 %v6920_v26  ;;  %v6978_v6 = vld [vmem:[%s10549_s5 + $0x228] ss:$52 sps:$4 sm:$0xff]   ;;  %v6981_v26 = vld [vmem:[%s10549_s5 + $0x90] ss:$52 sps:$4 sm:$0xff]  }
 0x216   :  { %3361 = vmatprep.subr.bf16.mxu0 %v6925_v32  ;;  %3503 = vmatprep.subr.bf16.mxu1 %v6928_v4 }
 0x219   :  { %3362 = vmatpush2.bf16.msra.mxu0 %v6923_v49  ;;  %3504 = vmatpush2.bf16.msra.mxu1 %v6926_v11  ;;  %v6976_v49 = vld [vmem:[%s10549_s5 + $0x224] ss:$52 sps:$4 sm:$0xff]   ;;  %v6979_v11 = vld [vmem:[%s10549_s5 + $0x8c] ss:$52 sps:$4 sm:$0xff]  }
 0x21a   :  { %3558 = vmatprep.subr.bf16.mxu0 %v6931_v8  ;;  %6524 = vmatprep.subr.bf16.mxu1 %v6932_v5 }
 0x21c   :  { %3364 = vmatmul.mubr.bf16.vlgmr.msra.gmra.mxu0 %v8456_v15  ;;  %3506 = vmatmul.mubr.bf16.vlgmr.msra.gmra.mxu1 %v8456_v15 }
 0x21d   :  { %3373 = vmatprep.mubr.bf16.mxu0 %v8491_v31  ;;  %3515 = vmatprep.mubr.bf16.mxu1 %v8491_v31 }
 0x21e   :  { %3559 = vmatpush1.bf16.msra.mxu0 %v6929_v19  ;;  %6525 = vmatpush3.bf16.msra.mxu1 %v6932_v5  ;;  %v6984_v5 = vld [vmem:[%s10549_s5 + $0x1c0] ss:$52 sps:$4 sm:$0xff]   ;;  %v6987_v19 = vld [vmem:[%s10549_s5 + $0x28] ss:$52 sps:$4 sm:$0xff]  }
 0x21f   :  { %6479 = vmatprep.subr.bf16.mxu0 %v6933_v21  ;;  %5025 = vmatprep.subr.bf16.mxu1 %v6942_v17  ;;  %v6982_v17 = vld [vmem:[%s10549_s5 + $0x1bc] ss:$52 sps:$4 sm:$0xff]  }
 0x224   :  { %3374 = vmatmul.mubr.bf16.gmra.mxu0 %v8495_v46  ;;  %3516 = vmatmul.mubr.bf16.gmra.mxu1 %v8495_v46 }
 0x225   :  { %3383 = vmatprep.mubr.bf16.mxu0 %v8514_v48  ;;  %3525 = vmatprep.mubr.bf16.mxu1 %v8514_v48 }
 0x22c   :  { %3384 = vmatmul.mubr.bf16.gmra.mxu0 %v8511_v29  ;;  %3526 = vmatmul.mubr.bf16.gmra.mxu1 %v8511_v29 }
 0x22d   :  { %3393 = vmatprep.mubr.bf16.mxu0 %v8563_v36  ;;  %3535 = vmatprep.mubr.bf16.mxu1 %v8563_v36 }
 0x234   :  { %3394 = vmatmul.mubr.bf16.gmra.mxu0 %v8585_v59  ;;  %3536 = vmatmul.mubr.bf16.gmra.mxu1 %v8585_v59 }
 0x235   :  { %6526 = vmatprep.mubr.msk.bf16.mxu1 %vm2144_vm2, %v8619_v52  ;;  %3576 = vmatprep.mubr.bf16.mxu0 %v10603_v61 }
 0x23c   :  { %6237 = vmatmul.mubr.msk.bf16.vlgmr.msra.gmra.mxu0 %vm2144_vm2, %v8619_v52  ;;  %6527 = vmatmul.mubr.msk.bf16.vlgmr.msra.gmra.mxu1 %vm2144_vm2, %v8627_v40 }
 0x23d   :  { %6480 = vmatpush3.bf16.msra.mxu0 %v6934_v0  ;;  %6530 = vmatprep.mubr.msk.bf16.mxu1 %vm2144_vm2, %v8629_v42  ;;  %v6985_v0 = vld [vmem:[%s10549_s5 + $0x24] ss:$52 sps:$4 sm:$0xff]  }
 0x23e   :  { %6481 = vmatprep.subr.bf16.mxu0 %v6935_v54  ;;  %3586 = vmatprep.mubr.bf16.mxu0 %v10603_v61  ;;  %v6990_v54 = vld [vmem:[%s10549_s5 + $0x158] ss:$52 sps:$4 sm:$0xff]  }
 0x23f   :  { %5026 = vmatpush1.bf16.msra.mxu1 %v6940_v9  ;;  %v6993_v9 = vld [vmem:[%s10549_s5 + $0x640] ss:$52 sps:$4 sm:$0xff]  }
 0x240   :  { %5082 = vmatprep.subr.bf16.mxu1 %v6947_v38 }
 0x241   :  { %6482 = vmatpush3.bf16.msra.mxu0 %v6936_v37 }
 0x242   :  { %6483 = vmatprep.subr.bf16.mxu0 %v6937_v18  ;;  %v6988_v18 = vld [vmem:[%s10549_s5 + $0x154] ss:$52 sps:$4 sm:$0xff]  }
 0x244   :  { %6238 = vmatmul.mubr.msk.bf16.gmra.mxu0 %vm2144_vm2, %v8627_v40  ;;  %6531 = vmatmul.mubr.msk.bf16.gmra.mxu1 %vm2144_vm2, %v8717_v56 }
 0x245   :  { %6484 = vmatpush3.bf16.msra.mxu0 %v6938_v33  ;;  %3596 = vmatprep.mubr.bf16.mxu0 %v10603_v61  ;;  %v6991_v33 = vld [vmem:[%s10549_s5 + $0x63c] ss:$52 sps:$4 sm:$0xff]  }
 0x246   :  { %6485 = vmatprep.subr.bf16.mxu0 %v6939_v10  ;;  %5043 = vmatprep.mubr.bf16.mxu1 %v10603_v61  ;;  %v6996_v10 = vld [vmem:[%s10549_s5 + $0xf0] ss:$52 sps:$4 sm:$0xff]  }
 0x249   :  { %6486 = vmatpush3.bf16.msra.mxu0 %v6943_v12 }
 0x24a   :  { %6487 = vmatprep.subr.bf16.mxu0 %v6944_v51  ;;  %v6999_v51 = vld [vmem:[%s10549_s5 + $0x5d8] ss:$52 sps:$4 sm:$0xff]  }
 0x24c   :  { %6239 = vmatmul.mubr.msk.bf16.gmra.mxu0 %vm2144_vm2, %v8629_v42  ;;  %6347 = vmatmul.mubr.msk.bf16.vlgmr.msra.gmra.mxu1 %vm2144_vm2, %v8619_v52 }
 0x24d   :  { %6488 = vmatpush3.bf16.msra.mxu0 %v6948_v3  ;;  %5083 = vmatpush1.bf16.msra.mxu1 %v6945_v34  ;;  %v6994_v3 = vld [vmem:[%s10549_s5 + $0xec] ss:$52 sps:$4 sm:$0xff]  }
 0x24e   :  { %6489 = vmatprep.subr.bf16.mxu0 %v6949_v24  ;;  %5084 = vmatprep.subr.bf16.mxu1 %v6952_v53  ;;  %v6997_v24 = vld [vmem:[%s10549_s5 + $0x5d4] ss:$52 sps:$4 sm:$0xff]  }
 0x24f   :  { %3606 = vmatprep.mubr.bf16.mxu0 %v10603_v61  ;;  %5053 = vmatprep.mubr.bf16.mxu1 %v10603_v61  ;;  %v7002_v53 = vld [vmem:[%s10549_s5 + $0x88] ss:$52 sps:$4 sm:$0xff]  }
 0x251   :  { %6490 = vmatpush3.bf16.msra.mxu0 %v6953_v43  ;;  %5085 = vmatpush1.bf16.msra.mxu1 %v6950_v35  ;;  %v8938_v57 = vpop.f32.mrf.mxu1  ;;  %v7005_v35 = vld [vmem:[%s10549_s5 + $0x570] ss:$52 sps:$4 sm:$0xff]  }
 0x252   :  { %6491 = vmatprep.subr.bf16.mxu0 %v6954_v14  ;;  %5086 = vmatprep.subr.bf16.mxu1 %v6957_v7  ;;  %v7000_v14 = vld [vmem:[%s10549_s5 + $0x84] ss:$52 sps:$4 sm:$0xff]   ;;  %v7003_v7 = vld [vmem:[%s10549_s5 + $0x56c] ss:$52 sps:$4 sm:$0xff]  }
 0x253   :  { %v8949_v55 = vpop.f32.mrf.mxu1 }
 0x254   :  { %6240 = vmatmul.mubr.msk.bf16.gmra.mxu0 %vm2144_vm2, %v8717_v56  ;;  %6348 = vmatmul.mubr.msk.bf16.gmra.mxu1 %vm2144_vm2, %v8627_v40 }
 0x255   :  { %6492 = vmatpush3.bf16.msra.mxu0 %v6958_v60  ;;  %5087 = vmatpush1.bf16.msra.mxu1 %v6955_v41  ;;  %v8958_v30 = vpop.f32.mrf.mxu1  ;;  %v7008_v41 = vld [vmem:[%s10549_s5 + $0x20] ss:$52 sps:$4 sm:$0xff]   ;;  %v7011_v60 = vld [vmem:[%s10549_s5 + $0x508] ss:$52 sps:$4 sm:$0xff]  }
 0x256   :  { %3647 = vmatprep.mubr.bf16.mxu0 %v8473_v20  ;;  %6493 = vmatprep.subr.bf16.mxu0 %v6959_v62  ;;  %v7006_v62 = vld [vmem:[%s10549_s5 + $0x1c] ss:$52 sps:$4 sm:$0xff]  }
 0x257   :  { %v8973_v47 = vpop.f32.mrf.mxu1  ;;  %5088 = vmatprep.subr.bf16.mxu1 %v6962_v39  ;;  %5063 = vmatprep.mubr.bf16.mxu1 %v10603_v61  ;;  %v7009_v39 = vld [vmem:[%s10549_s5 + $0x504] ss:$52 sps:$4 sm:$0xff]  }
 0x259   :  { %6494 = vmatpush3.bf16.msra.mxu0 %v6963_v63  ;;  %5089 = vmatpush1.bf16.msra.mxu1 %v6960_v50  ;;  %v8976_v58 = vpop.f32.mrf.mxu1  ;;  %v7014_v50 = vld [vmem:[%s10549_s5 + $0x638] ss:$52 sps:$4 sm:$0xff]   ;;  %v7017_v63 = vld [vmem:[%s10549_s5 + $0x4a0] ss:$52 sps:$4 sm:$0xff]  }
 0x25a   :  { %4940 = vmatprep.subr.bf16.mxu0 %v6966_v25  ;;  %5090 = vmatprep.subr.bf16.mxu1 %v6969_v27  ;;  %v7012_v25 = vld [vmem:[%s10549_s5 + $0x634] ss:$52 sps:$4 sm:$0xff]   ;;  %v7015_v27 = vld [vmem:[%s10549_s5 + $0x49c] ss:$52 sps:$4 sm:$0xff]  }
 0x25b   :  { %v8987_v23 = vpop.f32.mrf.mxu1 }
 0x25c   :  { %3648 = vmatmul.mubr.bf16.vlgmr.msra.gmra.mxu0 %v8456_v15  ;;  %6349 = vmatmul.mubr.msk.bf16.gmra.mxu1 %vm2144_vm2, %v8629_v42 }
 0x25d   :  { %4941 = vmatpush1.bf16.msra.mxu0 %v6964_v22  ;;  %5091 = vmatpush1.bf16.msra.mxu1 %v6967_v1  ;;  %v8995_v44 = vpop.f32.mrf.mxu1  ;;  %v7020_v22 = vld [vmem:[%s10549_s5 + $0x5d0] ss:$52 sps:$4 sm:$0xff]   ;;  %v7023_v1 = vld [vmem:[%s10549_s5 + $0x438] ss:$52 sps:$4 sm:$0xff]  }
 0x25e   :  { %3655 = vmatprep.mubr.bf16.mxu0 %v8491_v31  ;;  %4942 = vmatprep.subr.bf16.mxu0 %v6972_v45  ;;  %v7018_v45 = vld [vmem:[%s10549_s5 + $0x5cc] ss:$52 sps:$4 sm:$0xff]  }
 0x25f   :  { %v9010_v32 = vpop.f32.mrf.mxu1  ;;  %5092 = vmatprep.subr.bf16.mxu1 %v6975_v2  ;;  %5073 = vmatprep.mubr.bf16.mxu1 %v10603_v61  ;;  %v7021_v2 = vld [vmem:[%s10549_s5 + $0x434] ss:$52 sps:$4 sm:$0xff]  }
 0x261   :  { %4943 = vmatpush1.bf16.msra.mxu0 %v6970_v13  ;;  %5093 = vmatpush1.bf16.msra.mxu1 %v6973_v16  ;;  %v9013_v4 = vpop.f32.mrf.mxu1  ;;  %v7026_v13 = vld [vmem:[%s10549_s5 + $0x568] ss:$52 sps:$4 sm:$0xff]   ;;  %v7029_v16 = vld [vmem:[%s10549_s5 + $0x3d0] ss:$52 sps:$4 sm:$0xff]  }
 0x262   :  { %4944 = vmatprep.subr.bf16.mxu0 %v6978_v6  ;;  %5094 = vmatprep.subr.bf16.mxu1 %v6981_v26  ;;  %v7024_v6 = vld [vmem:[%s10549_s5 + $0x564] ss:$52 sps:$4 sm:$0xff]   ;;  %v7027_v26 = vld [vmem:[%s10549_s5 + $0x3cc] ss:$52 sps:$4 sm:$0xff]  }
 0x263   :  { %v9021_v8 = vpop.f32.mrf.mxu1 }
 0x264   :  { %3656 = vmatmul.mubr.bf16.gmra.mxu0 %v8495_v46  ;;  %6350 = vmatmul.mubr.msk.bf16.gmra.mxu1 %vm2144_vm2, %v8717_v56 }
 0x265   :  { %4945 = vmatpush1.bf16.msra.mxu0 %v6976_v49  ;;  %5095 = vmatpush1.bf16.msra.mxu1 %v6979_v11  ;;  %v9032_v21 = vpop.f32.mrf.mxu1  ;;  %v7032_v49 = vld [vmem:[%s10549_s5 + $0x500] ss:$52 sps:$4 sm:$0xff]   ;;  %v7035_v11 = vld [vmem:[%s10549_s5 + $0x368] ss:$52 sps:$4 sm:$0xff]  }
 0x266   :  { %3663 = vmatprep.mubr.bf16.mxu0 %v8514_v48  ;;  %5114 = vmatprep.mubr.bf16.mxu1 %v8473_v20 }
 0x267   :  { %v9048_v38 = vpop.f32.mrf.mxu1  ;;  %4946 = vmatprep.subr.bf16.mxu0 %v6984_v5  ;;  %5096 = vmatprep.subr.bf16.mxu1 %v6987_v19  ;;  %v7030_v5 = vld [vmem:[%s10549_s5 + $0x4fc] ss:$52 sps:$4 sm:$0xff]   ;;  %v7033_v19 = vld [vmem:[%s10549_s5 + $0x364] ss:$52 sps:$4 sm:$0xff]  }
 0x269   :  { %4947 = vmatpush1.bf16.msra.mxu0 %v6982_v17  ;;  %5097 = vmatpush1.bf16.msra.mxu1 %v6985_v0  ;;  %v9050_v37 = vpop.f32.mrf.mxu1  ;;  %v7038_v17 = vld [vmem:[%s10549_s5 + $0x498] ss:$52 sps:$4 sm:$0xff]   ;;  %v7041_v0 = vld [vmem:[%s10549_s5 + $0x308] ss:$52 sps:$4 sm:$0xff]  }
 0x26a   :  { %4948 = vmatprep.subr.bf16.mxu0 %v6990_v54  ;;  %5098 = vmatprep.subr.bf16.mxu1 %v6993_v9  ;;  %v7036_v54 = vld [vmem:[%s10549_s5 + $0x494] ss:$52 sps:$4 sm:$0xff]   ;;  %v7039_v9 = vld [vmem:[%s10549_s5 + $0x304] ss:$52 sps:$4 sm:$0xff]  }
 0x26b   :  { %v9061_v12 = vpop.f32.mrf.mxu1 }
 0x26c   :  { %3664 = vmatmul.mubr.bf16.gmra.mxu0 %v8511_v29 }
 0x26d   :  { %4949 = vmatpush1.bf16.msra.mxu0 %v6988_v18  ;;  %5099 = vmatpush2.bf16.msra.mxu1 %v6991_v33  ;;  %v3257_v34 = vpop.f32.mrf.mxu1  ;;  %v7044_v18 = vld [vmem:[%s10549_s5 + $0x430] ss:$52 sps:$4 sm:$0xff]   ;;  %v7047_v33 = vld [vmem:[%s10549_s5 + $0x2a0] ss:$52 sps:$4 sm:$0xff]  }
 0x26e   :  { %3671 = vmatprep.mubr.bf16.mxu0 %v8563_v36  ;;  %4950 = vmatprep.subr.bf16.mxu0 %v6996_v10  ;;  %v7042_v10 = vld [vmem:[%s10549_s5 + $0x42c] ss:$52 sps:$4 sm:$0xff]   ;;  %v7050_v34 = vld [vmem:[%s10549_s5 + $0x3c8] ss:$52 sps:$4 sm:$0xff]  }
 0x26f   :  { %v3258_v43 = vpop.f32.mrf.mxu1  ;;  %5100 = vmatprep.subr.bf16.mxu1 %v6999_v51  ;;  %v7045_v51 = vld [vmem:[%s10549_s5 + $0x29c] ss:$52 sps:$4 sm:$0xff]  }
 0x270   :  { %v7059_v43 = vld [vmem:[%s10549_s5 + $0x1d0] ss:$52 sps:$4 sm:$0xff]  }
 0x271   :  { %4951 = vmatpush1.bf16.msra.mxu0 %v6994_v3  ;;  %5101 = vmatpush2.bf16.msra.mxu1 %v6997_v24  ;;  %v7053_v3 = vld [vmem:[%s10549_s5 + $0x238] ss:$52 sps:$4 sm:$0xff]  }
 0x272   :  { %4952 = vmatprep.subr.bf16.mxu0 %v7002_v53  ;;  %5102 = vmatprep.subr.bf16.mxu1 %v7005_v35  ;;  %v7048_v24 = vld [vmem:[%s10549_s5 + $0x3c4] ss:$52 sps:$4 sm:$0xff]   ;;  %v7051_v53 = vld [vmem:[%s10549_s5 + $0x234] ss:$52 sps:$4 sm:$0xff]  }
 0x273   :  { %v7056_v35 = vld [vmem:[%s10549_s5 + $0x360] ss:$52 sps:$4 sm:$0xff]  }
 0x274   :  { %3672 = vmatmul.mubr.bf16.gmra.mxu0 %v8585_v59 }
 0x275   :  { %4953 = vmatpush1.bf16.msra.mxu0 %v7000_v14  ;;  %5103 = vmatpush2.bf16.msra.mxu1 %v7003_v7  ;;  %v7054_v14 = vld [vmem:[%s10549_s5 + $0x35c] ss:$52 sps:$4 sm:$0xff]   ;;  %v7057_v7 = vld [vmem:[%s10549_s5 + $0x1cc] ss:$52 sps:$4 sm:$0xff]  }
 0x276   :  { %4972 = vmatprep.mubr.bf16.mxu0 %v8473_v20  ;;  %4954 = vmatprep.subr.bf16.mxu0 %v7008_v41  ;;  %v7062_v41 = vld [vmem:[%s10549_s5 + $0x6a8] ss:$52 sps:$4 sm:$0xff]  }
 0x277   :  { %5104 = vmatprep.subr.bf16.mxu1 %v7011_v60  ;;  %v7065_v60 = vld [vmem:[%s10549_s5 + $0x168] ss:$52 sps:$4 sm:$0xff]  }
 0x279   :  { %4955 = vmatpush1.bf16.msra.mxu0 %v7006_v62  ;;  %5105 = vmatpush2.bf16.msra.mxu1 %v7009_v39  ;;  %v7060_v62 = vld [vmem:[%s10549_s5 + $0x6a4] ss:$52 sps:$4 sm:$0xff]  }
 0x27a   :  { %4956 = vmatprep.subr.bf16.mxu0 %v7014_v50  ;;  %5106 = vmatprep.subr.bf16.mxu1 %v7017_v63  ;;  %v7063_v39 = vld [vmem:[%s10549_s5 + $0x164] ss:$52 sps:$4 sm:$0xff]   ;;  %v7068_v50 = vld [vmem:[%s10549_s5 + $0x100] ss:$52 sps:$4 sm:$0xff]  }
 0x27b   :  { %v7092_v63 = vld [vmem:[%s10549_s5 + $0x6b0] ss:$52 sps:$4 sm:$0xff]  }
 0x27d   :  { %4957 = vmatpush2.bf16.msra.mxu0 %v7012_v25  ;;  %5107 = vmatpush2.bf16.msra.mxu1 %v7015_v27 }
 0x27e   :  { %4958 = vmatprep.subr.bf16.mxu0 %v7020_v22  ;;  %5108 = vmatprep.subr.bf16.mxu1 %v7023_v1 }
 0x281   :  { %4959 = vmatpush2.bf16.msra.mxu0 %v7018_v45  ;;  %5109 = vmatpush2.bf16.msra.mxu1 %v7021_v2  ;;  %v7066_v45 = vld [vmem:[%s10549_s5 + $0xfc] ss:$52 sps:$4 sm:$0xff]   ;;  %v7071_v2 = vld [vmem:[%s10549_s5 + $0x98] ss:$52 sps:$4 sm:$0xff]  }
 0x282   :  { %4960 = vmatprep.subr.bf16.mxu0 %v7026_v13  ;;  %5110 = vmatprep.subr.bf16.mxu1 %v7029_v16 }
 0x285   :  { %4961 = vmatpush2.bf16.msra.mxu0 %v7024_v6  ;;  %5111 = vmatpush2.bf16.msra.mxu1 %v7027_v26 }
 0x286   :  { %4962 = vmatprep.subr.bf16.mxu0 %v7032_v49  ;;  %5112 = vmatprep.subr.bf16.mxu1 %v7035_v11  ;;  %v7069_v49 = vld [vmem:[%s10549_s5 + $0x94] ss:$52 sps:$4 sm:$0xff]   ;;  %v7074_v11 = vld [vmem:[%s10549_s5 + $0x30] ss:$52 sps:$4 sm:$0xff]  }
 0x289   :  { %4963 = vmatpush2.bf16.msra.mxu0 %v7030_v5  ;;  %5113 = vmatpush2.bf16.msra.mxu1 %v7033_v19 }
 0x28a   :  { %4964 = vmatprep.subr.bf16.mxu0 %v7038_v17  ;;  %5224 = vmatprep.subr.bf16.mxu1 %v7041_v0 }
 0x28c   :  { %5115 = vmatmul.mubr.bf16.vlgmr.msra.gmra.mxu1 %v8456_v15 }
 0x28d   :  { %4965 = vmatpush2.bf16.msra.mxu0 %v7036_v54  ;;  %5124 = vmatprep.mubr.bf16.mxu1 %v8491_v31 }
 0x28e   :  { %5225 = vmatpush1.bf16.msra.mxu1 %v7039_v9  ;;  %4966 = vmatprep.subr.bf16.mxu0 %v7044_v18  ;;  %v7072_v9 = vld [vmem:[%s10549_s5 + $0x2c] ss:$52 sps:$4 sm:$0xff]   ;;  %v7077_v18 = vld [vmem:[%s10549_s5 + $0x648] ss:$52 sps:$4 sm:$0xff]  }
 0x28f   :  { %5226 = vmatprep.subr.bf16.mxu1 %v7047_v33 }
 0x291   :  { %4967 = vmatpush2.bf16.msra.mxu0 %v7042_v10 }
 0x292   :  { %5227 = vmatpush1.bf16.msra.mxu1 %v7045_v51  ;;  %4968 = vmatprep.subr.bf16.mxu0 %v7050_v34 }
 0x293   :  { %5228 = vmatprep.subr.bf16.mxu1 %v7053_v3 }
 0x294   :  { %5125 = vmatmul.mubr.bf16.gmra.mxu1 %v8495_v46 }
 0x295   :  { %4969 = vmatpush2.bf16.msra.mxu0 %v7048_v24  ;;  %5134 = vmatprep.mubr.bf16.mxu1 %v8514_v48 }
 0x296   :  { %5229 = vmatpush1.bf16.msra.mxu1 %v7051_v53  ;;  %4970 = vmatprep.subr.bf16.mxu0 %v7056_v35 }
 0x297   :  { %5230 = vmatprep.subr.bf16.mxu1 %v7059_v43 }
 0x299   :  { %4971 = vmatpush2.bf16.msra.mxu0 %v7054_v14 }
 0x29a   :  { %5231 = vmatpush1.bf16.msra.mxu1 %v7057_v7  ;;  %5167 = vmatprep.subr.bf16.mxu0 %v7062_v41 }
 0x29b   :  { %5232 = vmatprep.subr.bf16.mxu1 %v7065_v60 }
 0x29c   :  { %4973 = vmatmul.mubr.bf16.vlgmr.msra.gmra.mxu0 %v8456_v15  ;;  %5135 = vmatmul.mubr.bf16.gmra.mxu1 %v8511_v29  ;;  %v3294_v25 = vpop.f32.mrf.mxu0  ;;  %v9220_v27 = vpop.f32.mrf.mxu1 }
 0x29d   :  { %4982 = vmatprep.mubr.bf16.mxu0 %v8491_v31  ;;  %5144 = vmatprep.mubr.bf16.mxu1 %v8563_v36  ;;  %v9260_v33 = vadd.f32 %v3294_v25, %v8938_v57 }
 0x29e   :  { %5168 = vmatpush1.bf16.msra.mxu0 %v7060_v62  ;;  %5233 = vmatpush1.bf16.msra.mxu1 %v7063_v39  ;;  %v3296_v22 = vpop.f32.mrf.mxu0  ;;  %v9224_v1 = vpop.f32.mrf.mxu1 }
 0x29f   :  { %5234 = vmatprep.subr.bf16.mxu1 %v7068_v50  ;;  %5309 = vmatprep.subr.bf16.mxu0 %v7092_v63  ;;  %v9271_v34 = vadd.f32 %v3296_v22, %v8949_v55  ;;  %v7080_v55 = vld [vmem:[%s10549_s5 + $0x5e0] ss:$52 sps:$4 sm:$0xff]   ;;  %v7078_v22 = vld [vmem:[%s10549_s5 + $0x5dc] ss:$52 sps:$4 sm:$0xff]  }
 0x2a0   :  { %v3298_v13 = vpop.f32.mrf.mxu0  ;;  %v9232_v16 = vpop.f32.mrf.mxu1 }
 0x2a1   :  { %v9249_v17 = vadd.f32 %v3298_v13, %v8958_v30  ;;  %v3835_v62 = vmul.f32 %v9271_v34, %v9271_v34  ;;  %v7083_v13 = vld [vmem:[%s10549_s5 + $0x578] ss:$52 sps:$4 sm:$0xff]  }
 0x2a2   :  { %5235 = vmatpush1.bf16.msra.mxu1 %v7066_v45  ;;  %v3300_v6 = vpop.f32.mrf.mxu0  ;;  %v9234_v26 = vpop.f32.mrf.mxu1 }
 0x2a3   :  { %5236 = vmatprep.subr.bf16.mxu1 %v7071_v2  ;;  %v3841_v3 = vmul.f32 %v9249_v17, %v9249_v17  ;;  %v3743_v41 = vadd.f32 %v9249_v17, %v9260_v33 }
 0x2a4   :  { %4983 = vmatmul.mubr.bf16.gmra.mxu0 %v8495_v46  ;;  %5145 = vmatmul.mubr.bf16.gmra.mxu1 %v8585_v59  ;;  %v3304_v5 = vpop.f32.mrf.mxu0  ;;  %v9244_v19 = vpop.f32.mrf.mxu1 }
 0x2a5   :  { %4992 = vmatprep.mubr.bf16.mxu0 %v8514_v48  ;;  %5256 = vmatprep.mubr.bf16.mxu1 %v8473_v20  ;;  %v9263_v20 = vadd.f32 %v3300_v6, %v8973_v47  ;;  %v9266_v30 = vadd.f32 %v3304_v5, %v8976_v58  ;;  %v7075_v58 = vld [vmem:[%s10549_s5 + $0x644] ss:$52 sps:$4 sm:$0xff]  }
 0x2a6   :  { %5237 = vmatpush1.bf16.msra.mxu1 %v7069_v49  ;;  %v3306_v0 = vpop.f32.mrf.mxu0  ;;  %v9251_v54 = vpop.f32.mrf.mxu1 }
 0x2a7   :  { %5238 = vmatprep.subr.bf16.mxu1 %v7074_v11  ;;  %v9276_v24 = vadd.f32 %v3306_v0, %v8987_v23  ;;  %v3834_v23 = vmul.f32 %v9260_v33, %v9260_v33  ;;  %v3842_v35 = vmul.f32 %v9263_v20, %v9263_v20  ;;  %v3744_v45 = vadd.f32 %v3743_v41, %v9266_v30 }
 0x2a8   :  { %v3308_v10 = vpop.f32.mrf.mxu0  ;;  %v9268_v51 = vpop.f32.mrf.mxu1 }
 0x2a9   :  { %v9279_v57 = vadd.f32 %v3308_v10, %v8995_v44  ;;  %v3848_v44 = vmul.f32 %v9266_v30, %v9266_v30  ;;  %v3883_v39 = vadd.f32 %v3841_v3, %v3834_v23  ;;  %v3895_v6 = vadd.f32 %v3842_v35, %v3835_v62  ;;  %v7081_v35 = vld [vmem:[%s10549_s5 + $0x574] ss:$52 sps:$4 sm:$0xff]   ;;  %v7086_v62 = vld [vmem:[%s10549_s5 + $0x510] ss:$52 sps:$4 sm:$0xff]  }
 0x2aa   :  { %5239 = vmatpush1.bf16.msra.mxu1 %v7072_v9  ;;  %v3310_v47 = vpop.f32.mrf.mxu0  ;;  %v9281_v53 = vpop.f32.mrf.mxu1 }
 0x2ab   :  { %5240 = vmatprep.subr.bf16.mxu1 %v7077_v18  ;;  %v9296_v43 = vadd.f32 %v3310_v47, %v9010_v32  ;;  %v3849_v32 = vmul.f32 %v9276_v24, %v9276_v24  ;;  %v3855_v50 = vmul.f32 %v9279_v57, %v9279_v57  ;;  %v3884_v49 = vadd.f32 %v3883_v39, %v3848_v44 }
 0x2ac   :  { %4993 = vmatmul.mubr.bf16.gmra.mxu0 %v8511_v29  ;;  %v3314_v14 = vpop.f32.mrf.mxu0  ;;  %v9299_v7 = vpop.f32.mrf.mxu1 }
 0x2ad   :  { %5002 = vmatprep.mubr.bf16.mxu0 %v8563_v36  ;;  %v9305_v60 = vadd.f32 %v3314_v14, %v9013_v4  ;;  %v3755_v4 = vadd.f32 %v9263_v20, %v9271_v34  ;;  %v3856_v11 = vmul.f32 %v9296_v43, %v9296_v43  ;;  %v3896_v3 = vadd.f32 %v3895_v6, %v3849_v32 }
 0x2ae   :  { %5241 = vmatpush2.bf16.msra.mxu1 %v7075_v58  ;;  %v3316_v63 = vpop.f32.mrf.mxu0  ;;  %v9313_v25 = vpop.f32.mrf.mxu1  ;;  %v3885_v47 = vadd.f32 %v3884_v49, %v3855_v50 }
 0x2af   :  { %v9322_v2 = vadd.f32 %v3316_v63, %v9021_v8  ;;  %5242 = vmatprep.subr.bf16.mxu1 %v7080_v55  ;;  %v3862_v5 = vmul.f32 %v9305_v60, %v9305_v60  ;;  %v3756_v18 = vadd.f32 %v3755_v4, %v9276_v24  ;;  %v3745_v8 = vadd.f32 %v3744_v45, %v9279_v57 }
 0x2b0   :  { %v3318_v0 = vpop.f32.mrf.mxu0  ;;  %v9331_v9 = vpop.f32.mrf.mxu1  ;;  %v3897_v39 = vadd.f32 %v3896_v3, %v3856_v11  ;;  %v7089_v3 = vld [vmem:[%s10549_s5 + $0x4a8] ss:$52 sps:$4 sm:$0xff]  }
 0x2b1   :  { %v9336_v10 = vadd.f32 %v3318_v0, %v9032_v21  ;;  %v3863_v58 = vmul.f32 %v9322_v2, %v9322_v2  ;;  %v3757_v44 = vadd.f32 %v3756_v18, %v9296_v43  ;;  %v3746_v14 = vadd.f32 %v3745_v8, %v9305_v60 }
 0x2b2   :  { %5243 = vmatpush2.bf16.msra.mxu1 %v7078_v22  ;;  %v3320_v55 = vpop.f32.mrf.mxu0  ;;  %v9340_v23 = vpop.f32.mrf.mxu1  ;;  %v3886_v32 = vadd.f32 %v3885_v47, %v3862_v5  ;;  %v7084_v5 = vld [vmem:[%s10549_s5 + $0x50c] ss:$52 sps:$4 sm:$0xff]  }
 0x2b3   :  { %v3869_v21 = vmul.f32 %v9336_v10, %v9336_v10  ;;  %v9350_v41 = vadd.f32 %v3320_v55, %v9048_v38  ;;  %5244 = vmatprep.subr.bf16.mxu1 %v7083_v13  ;;  %v3758_v22 = vadd.f32 %v3757_v44, %v9322_v2  ;;  %v3747_v4 = vadd.f32 %v3746_v14, %v9336_v10 }
 0x2b4   :  { %5003 = vmatmul.mubr.bf16.gmra.mxu0 %v8585_v59  ;;  %v3324_v50 = vpop.f32.mrf.mxu0  ;;  %v9356_v63 = vpop.f32.mrf.mxu1  ;;  %v3898_v13 = vadd.f32 %v3897_v39, %v3863_v58 }
 0x2b5   :  { %v3870_v38 = vmul.f32 %v9350_v41, %v9350_v41  ;;  %v9363_v45 = vadd.f32 %v3324_v50, %v9050_v37  ;;  %5185 = vmatprep.mubr.bf16.mxu0 %v10603_v61  ;;  %v3887_v6 = vadd.f32 %v3886_v32, %v3869_v21  ;;  %v3759_v0 = vadd.f32 %v3758_v22, %v9350_v41  ;;  %v7087_v32 = vld [vmem:[%s10549_s5 + $0x4a4] ss:$52 sps:$4 sm:$0xff]  }
 0x2b6   :  { %5245 = vmatpush2.bf16.msra.mxu1 %v7081_v35  ;;  %v3326_v49 = vpop.f32.mrf.mxu0  ;;  %v9366_v11 = vpop.f32.mrf.mxu1 }
 0x2b7   :  { %v3748_v18 = vadd.f32 %v3747_v4, %v9363_v45  ;;  %v3876_v37 = vmul.f32 %v9363_v45, %v9363_v45  ;;  %v9376_v8 = vadd.f32 %v3326_v49, %v9061_v12  ;;  %5246 = vmatprep.subr.bf16.mxu1 %v7086_v62  ;;  %v3899_v47 = vadd.f32 %v3898_v13, %v3870_v38  ;;  %v7090_v12 = vld [vmem:[%s10549_s5 + $0x6ac] ss:$52 sps:$4 sm:$0xff]  }
 0x2b8   :  { %v3328_v58 = vpop.f32.mrf.mxu0  ;;  %v3470_v55 = vpop.f32.mrf.mxu1  ;;  %v7095_v13 = vld [vmem:[%s10549_s5 + $0x440] ss:$52 sps:$4 sm:$0xff]  }
 0x2b9   :  { %v3749_v35 = vrot.slane %v3748_v18, 4  ;;  %v3888_v44 = vadd.f32 %v3887_v6, %v3876_v37  ;;  %v3760_v14 = vadd.f32 %v3759_v0, %v9376_v8  ;;  %v3877_v21 = vmul.f32 %v9376_v8, %v9376_v8  ;;  %v7098_v55 = vld [vmem:[%s10549_s5 + $0x3d8] ss:$52 sps:$4 sm:$0xff]  }
 0x2ba   :  { %5247 = vmatpush2.bf16.msra.mxu1 %v7084_v5  ;;  %v3329_v62 = vpop.f32.mrf.mxu0  ;;  %v3471_v39 = vpop.f32.mrf.mxu1 }
 0x2bb   :  { %v3750_v50 = vadd.f32 %v3749_v35, %v3748_v18  ;;  %v3889_v22 = vrot.slane %v3888_v44, 4  ;;  %v3761_v4 = vrot.slane %v3760_v14, 4  ;;  %v3900_v38 = vadd.f32 %v3899_v47, %v3877_v21  ;;  %5248 = vmatprep.subr.bf16.mxu1 %v7089_v3  ;;  %v7093_v18 = vld [vmem:[%s10549_s5 + $0x43c] ss:$52 sps:$4 sm:$0xff]  }
 0x2bc   :  { %6351 = vmatmul.mubr.msk.bf16.vlgmr.msra.gmra.mxu0 %vm2144_vm2, %v8619_v52 }
 0x2bd   :  { %v3751_v6 = vrot.slane %v3750_v50, 2  ;;  %v3890_v49 = vadd.f32 %v3889_v22, %v3888_v44  ;;  %v3762_v5 = vadd.f32 %v3761_v4, %v3760_v14  ;;  %v3901_v0 = vrot.slane %v3900_v38, 4  ;;  %5310 = vmatpush1.bf16.msra.mxu0 %v7090_v12  ;;  %5195 = vmatprep.mubr.bf16.mxu0 %v10603_v61  ;;  %v7096_v12 = vld [vmem:[%s10549_s5 + $0x3d4] ss:$52 sps:$4 sm:$0xff]   ;;  %v7101_v22 = vld [vmem:[%s10549_s5 + $0x370] ss:$52 sps:$4 sm:$0xff]  }
 0x2be   :  { %5249 = vmatpush2.bf16.msra.mxu1 %v7087_v32 }
 0x2bf   :  { %v3752_v37 = vadd.f32 %v3751_v6, %v3750_v50  ;;  %v3891_v3 = vrot.slane %v3890_v49, 2  ;;  %v3763_v47 = vrot.slane %v3762_v5, 2  ;;  %v3902_v58 = vadd.f32 %v3901_v0, %v3900_v38  ;;  %5250 = vmatprep.subr.bf16.mxu1 %v7095_v13 }
 0x2c1   :  { %v3753_v35 = vrot.slane %v3752_v37, 1  ;;  %v3892_v44 = vadd.f32 %v3891_v3, %v3890_v49  ;;  %v3764_v14 = vadd.f32 %v3763_v47, %v3762_v5  ;;  %v3903_v21 = vrot.slane %v3902_v58, 2  ;;  %v7099_v49 = vld [vmem:[%s10549_s5 + $0x36c] ss:$52 sps:$4 sm:$0xff]  }
 0x2c2   :  { %5251 = vmatpush2.bf16.msra.mxu1 %v7093_v18 }
 0x2c3   :  { %v3754_v62 = vadd.f32 %v3753_v35, %v3752_v37  ;;  %v3893_v39 = vrot.slane %v3892_v44, 1  ;;  %v3765_v32 = vrot.slane %v3764_v14, 1  ;;  %v3904_v50 = vadd.f32 %v3903_v21, %v3902_v58  ;;  %5252 = vmatprep.subr.bf16.mxu1 %v7098_v55 }
 0x2c4   :  { %6352 = vmatmul.mubr.msk.bf16.gmra.mxu0 %vm2144_vm2, %v8627_v40 }
 0x2c5   :  { %v3827_v4 = vmul.f32 0.020408163, %v3754_v62  ;;  %v3894_v38 = vadd.f32 %v3893_v39, %v3892_v44  ;;  %v3766_v13 = vadd.f32 %v3765_v32, %v3764_v14  ;;  %v3905_v6 = vrot.slane %v3904_v50, 1  ;;  %5205 = vmatprep.mubr.bf16.mxu0 %v10603_v61  ;;  %v10607_v39 = vld [vmem:[#allocation6_spill] sm:$0xff] }
 0x2c6   :  { %5253 = vmatpush2.bf16.msra.mxu1 %v7096_v12  ;;  %v9430_v12 = vld [vmem:[%s10550_s6] sm:$0xff] }
 0x2c7   :  { %v3967_v5 = vmul.f32 0.020408163, %v3894_v38  ;;  %v3974_v0 = vmul.f32 %v3827_v4, %v3827_v4  ;;  %5254 = vmatprep.subr.bf16.mxu1 %v7101_v22  ;;  %v9414_v37 = vmul.f32 0.020408163, %v3766_v13  ;;  %v3906_v3 = vadd.f32 %v3905_v6, %v3904_v50 }
 0x2c8   :  { %v9444_v32 = vrot.slane %v9430_v12, %v10607_v39  ;;  %v3995_v22 = vsub.f32 %v9260_v33, %v3827_v4  ;;  %v4002_v38 = vsub.f32 %v9249_v17, %v3827_v4  ;;  %v4016_v13 = vsub.f32 %v9279_v57, %v3827_v4 }
 0x2c9   :  { %v3981_v18 = vsub.f32 %v3967_v5, %v3974_v0  ;;  %v3968_v58 = vmul.f32 0.020408163, %v3906_v3  ;;  %v3975_v55 = vmul.f32 %v9414_v37, %v9414_v37  ;;  %v4023_v6 = vsub.f32 %v9305_v60, %v3827_v4 }
 0x2ca   :  { %5255 = vmatpush2.bf16.msra.mxu1 %v7099_v49  ;;  %v4030_v49 = vsub.f32 %v9336_v10, %v3827_v4  ;;  %v4037_v5 = vsub.f32 %v9363_v45, %v3827_v4  ;;  %v3996_v0 = vsub.f32 %v9271_v34, %v9414_v37  ;;  %v4003_v3 = vsub.f32 %v9263_v20, %v9414_v37 }
 0x2cb   :  { %v3988_v47 = vmax.f32 %v3981_v18, 0.0  ;;  %v3982_v44 = vsub.f32 %v3968_v58, %v3975_v55  ;;  %v4010_v17 = vsub.f32 %v9276_v24, %v9414_v37  ;;  %v4017_v33 = vsub.f32 %v9296_v43, %v9414_v37 }
 0x2cc   :  { %6353 = vmatmul.mubr.msk.bf16.gmra.mxu0 %vm2144_vm2, %v8629_v42  ;;  %v4031_v43 = vsub.f32 %v9350_v41, %v9414_v37 }
 0x2cd   :  { %v4044_v35 = vadd.f32 1e-05, %v3988_v47  ;;  %5257 = vmatmul.mubr.bf16.vlgmr.msra.gmra.mxu1 %v8456_v15  ;;  %5215 = vmatprep.mubr.bf16.mxu0 %v10603_v61  ;;  %v3989_v14 = vmax.f32 %v3982_v44, 0.0  ;;  %v9435_v15 = vld [vmem:[%s10551_s7] sm:$0xff] }
 0x2ce   :  { %5266 = vmatprep.mubr.bf16.mxu1 %v8491_v31  ;;  %v10606_v31 = vld [vmem:[#allocation5_spill] sm:$0xff]  ;;  %v9448_v50 = vrot.slane %v9435_v15, %v10607_v39 }
 0x2cf   :  { %7112 = vrsqrt.f32 %v4044_v35  ;;  %v4045_v21 = vadd.f32 1e-05, %v3989_v14  ;;  %v4112_v62 = vrot.slane %v9430_v12, %v10606_v31 }
 0x2d1   :  { %7114 = vrsqrt.f32 %v4045_v21 }
 0x2d4   :  { %6354 = vmatmul.mubr.msk.bf16.gmra.mxu0 %vm2144_vm2, %v8717_v56 }
 0x2d5   :  { %5267 = vmatmul.mubr.bf16.gmra.mxu1 %v8495_v46  ;;  %5327 = vmatprep.mubr.bf16.mxu0 %v10603_v61  ;;  %v4198_v46 = vrot.slane %v9435_v15, %v10606_v31 }
 0x2d6   :  { %5276 = vmatprep.mubr.bf16.mxu1 %v8514_v48  ;;  %v4009_v48 = vsub.f32 %v9266_v30, %v3827_v4  ;;  %v4024_v30 = vsub.f32 %v9322_v2, %v9414_v37 }
 0x2dc   :  { %v7113_v18 = vpop.eup %7112  ;;  %6355 = vmatmul.mubr.msk.bf16.vlgmr.msra.gmra.mxu0 %vm2144_vm2, %v8619_v52  ;;  %v3365_v57 = vpop.f32.mrf.mxu0 }
 0x2dd   :  { %v9469_v60 = vpop.f32.mrf.mxu1  ;;  %v4058_v34 = vmul.f32 %v7113_v18, %v3995_v22  ;;  %v4065_v10 = vmul.f32 %v7113_v18, %v4002_v38  ;;  %v4072_v45 = vmul.f32 %v7113_v18, %v4009_v48  ;;  %v4079_v4 = vmul.f32 %v7113_v18, %v4016_v13  ;;  %5277 = vmatmul.mubr.bf16.gmra.mxu1 %v8511_v29 }
 0x2de   :  { %v4086_v20 = vmul.f32 %v7113_v18, %v4023_v6  ;;  %v4093_v24 = vmul.f32 %v7113_v18, %v4030_v49  ;;  %v4100_v47 = vmul.f32 %v7113_v18, %v4037_v5  ;;  %5286 = vmatprep.mubr.bf16.mxu1 %v8563_v36  ;;  %v3367_v2 = vpop.f32.mrf.mxu0  ;;  %5337 = vmatprep.mubr.bf16.mxu0 %v10603_v61  ;;  %v7115_v14 = vpop.eup %7114 }
 0x2df   :  { %v9475_v58 = vpop.f32.mrf.mxu1  ;;  %v4144_v52 = vmul.f32 %v4112_v62, %v4058_v34  ;;  %v4151_v55 = vmul.f32 %v4112_v62, %v4065_v10  ;;  %v4158_v35 = vmul.f32 %v4112_v62, %v4072_v45  ;;  %v4165_v44 = vmul.f32 %v4112_v62, %v4079_v4 }
 0x2e0   :  { %v4172_v21 = vmul.f32 %v4112_v62, %v4086_v20  ;;  %v4179_v29 = vmul.f32 %v4112_v62, %v4093_v24  ;;  %v4186_v22 = vmul.f32 %v4112_v62, %v4100_v47  ;;  %v4038_v38 = vsub.f32 %v9376_v8, %v9414_v37  ;;  %v3369_v48 = vpop.f32.mrf.mxu0 }
 0x2e1   :  { %v9480_v41 = vpop.f32.mrf.mxu1  ;;  %v4230_v36 = vadd.f32 %v4198_v46, %v4144_v52  ;;  %v4237_v13 = vadd.f32 %v4198_v46, %v4151_v55  ;;  %v4244_v6 = vadd.f32 %v4198_v46, %v4158_v35  ;;  %v4251_v49 = vadd.f32 %v4198_v46, %v4165_v44 }
 0x2e2   :  { %v4258_v5 = vadd.f32 %v4198_v46, %v4172_v21  ;;  %v4265_v18 = vadd.f32 %v4198_v46, %v4179_v29  ;;  %v4272_v34 = vadd.f32 %v4198_v46, %v4186_v22  ;;  %v4059_v10 = vmul.f32 %v7115_v14, %v3996_v0  ;;  %v3371_v45 = vpop.f32.mrf.mxu0 }
 0x2e3   :  { %v9482_v4 = vpop.f32.mrf.mxu1  ;;  %4279 = vst [vmem:[#allocation2] sm:$0xff] %v4230_v36  ;;  %4286 = vst [vmem:[#allocation2 + $0x68] sm:$0xff] %v4237_v13  ;;  %v4066_v62 = vmul.f32 %v7115_v14, %v4003_v3  ;;  %v4073_v8 = vmul.f32 %v7115_v14, %v4010_v17  ;;  %v4080_v37 = vmul.f32 %v7115_v14, %v4017_v33 }
 0x2e4   :  { %4293 = vst [vmem:[#allocation2 + $0xd0] sm:$0xff] %v4244_v6  ;;  %4300 = vst [vmem:[#allocation2 + $0x138] sm:$0xff] %v4251_v49  ;;  %v4087_v20 = vmul.f32 %v7115_v14, %v4024_v30  ;;  %v4094_v24 = vmul.f32 %v7115_v14, %v4031_v43  ;;  %v4101_v47 = vmul.f32 %v7115_v14, %v4038_v38  ;;  %6356 = vmatmul.mubr.msk.bf16.gmra.mxu0 %vm2144_vm2, %v8627_v40  ;;  %v3375_v0 = vpop.f32.mrf.mxu0 }
 0x2e5   :  { %4307 = vst [vmem:[#allocation2 + $0x1a0] sm:$0xff] %v4258_v5  ;;  %4314 = vst [vmem:[#allocation2 + $0x208] sm:$0xff] %v4265_v18  ;;  %v4145_v52 = vmul.f32 %v9444_v32, %v4059_v10  ;;  %v9486_v46 = vadd.f32 %v9220_v27, %v3365_v57  ;;  %v9490_v55 = vpop.f32.mrf.mxu1  ;;  %v4152_v3 = vmul.f32 %v9444_v32, %v4066_v62  ;;  %5287 = vmatmul.mubr.bf16.gmra.mxu1 %v8585_v59 }
 0x2e6   :  { %4321 = vst [vmem:[#allocation2 + $0x270] sm:$0xff] %v4272_v34  ;;  %v4159_v17 = vmul.f32 %v9444_v32, %v4073_v8  ;;  %v4166_v33 = vmul.f32 %v9444_v32, %v4080_v37  ;;  %v4173_v30 = vmul.f32 %v9444_v32, %v4087_v20  ;;  %v4180_v43 = vmul.f32 %v9444_v32, %v4094_v24  ;;  %v3377_v35 = vpop.f32.mrf.mxu0 }
 0x2e7   :  { %v4187_v27 = vmul.f32 %v9444_v32, %v4101_v47  ;;  %v4231_v57 = vadd.f32 %v9448_v50, %v4145_v52  ;;  %v9501_v40 = vadd.f32 %v9224_v1, %v3367_v2  ;;  %v9503_v44 = vpop.f32.mrf.mxu1  ;;  %5347 = vmatprep.mubr.bf16.mxu0 %v10603_v61  ;;  %v4238_v14 = vadd.f32 %v9448_v50, %v4152_v3 }
 0x2e8   :  { %v4245_v21 = vadd.f32 %v9448_v50, %v4159_v17  ;;  %v4252_v59 = vadd.f32 %v9448_v50, %v4166_v33  ;;  %v4259_v29 = vadd.f32 %v9448_v50, %v4173_v30  ;;  %v4266_v32 = vadd.f32 %v9448_v50, %v4180_v43  ;;  %v3379_v38 = vpop.f32.mrf.mxu0 }
 0x2e9   :  { %v4273_v22 = vadd.f32 %v9448_v50, %v4187_v27  ;;  %4280 = vst [vmem:[#allocation2 + $0x8] sm:$0xff] %v4231_v57  ;;  %v9513_v1 = vadd.f32 %v9232_v16, %v3369_v48  ;;  %v9516_v2 = vadd.f32 %v9234_v26, %v3371_v45  ;;  %v9518_v36 = vpop.f32.mrf.mxu1  ;;  %4287 = vst [vmem:[#allocation2 + $0x70] sm:$0xff] %v4238_v14 }
 0x2ea   :  { %4294 = vst [vmem:[#allocation2 + $0xd8] sm:$0xff] %v4245_v21  ;;  %4301 = vst [vmem:[#allocation2 + $0x140] sm:$0xff] %v4252_v59  ;;  %v3836_v13 = vmul.f32 %v9486_v46, %v9486_v46  ;;  %v9523_v6 = vadd.f32 %v9244_v19, %v3375_v0  ;;  %v9526_v50 = vadd.f32 %v9251_v54, %v3377_v35  ;;  %v3381_v5 = vpop.f32.mrf.mxu0 }
 0x2eb   :  { %4308 = vst [vmem:[#allocation2 + $0x1a8] sm:$0xff] %v4259_v29  ;;  %v9529_v16 = vadd.f32 %v9268_v51, %v3379_v38  ;;  %4315 = vst [vmem:[#allocation2 + $0x210] sm:$0xff] %v4266_v32  ;;  %v3837_v26 = vmul.f32 %v9501_v40, %v9501_v40  ;;  %v3767_v48 = vadd.f32 %v9513_v1, %v9486_v46  ;;  %v9539_v54 = vpop.f32.mrf.mxu1 }
 0x2ec   :  { %4322 = vst [vmem:[#allocation2 + $0x278] sm:$0xff] %v4273_v22  ;;  %v3843_v49 = vmul.f32 %v9513_v1, %v9513_v1  ;;  %v3844_v19 = vmul.f32 %v9516_v2, %v9516_v2  ;;  %v3779_v51 = vadd.f32 %v9516_v2, %v9501_v40  ;;  %v3850_v18 = vmul.f32 %v9523_v6, %v9523_v6  ;;  %v3385_v37 = vpop.f32.mrf.mxu0 }
 0x2ed   :  { %v3851_v34 = vmul.f32 %v9526_v50, %v9526_v50  ;;  %v9548_v10 = vadd.f32 %v9281_v53, %v3381_v5  ;;  %v3768_v62 = vadd.f32 %v3767_v48, %v9523_v6  ;;  %v3857_v8 = vmul.f32 %v9529_v16, %v9529_v16  ;;  %6357 = vmatmul.mubr.msk.bf16.gmra.mxu0 %vm2144_vm2, %v8629_v42  ;;  %v9555_v20 = vpop.f32.mrf.mxu1 }
 0x2ee   :  { %v3907_v45 = vadd.f32 %v3843_v49, %v3836_v13  ;;  %v3919_v24 = vadd.f32 %v3844_v19, %v3837_v26  ;;  %v3780_v47 = vadd.f32 %v3779_v51, %v9526_v50  ;;  %v9561_v53 = vadd.f32 %v9299_v7, %v3385_v37  ;;  %5357 = vmatprep.mubr.bf16.mxu0 %v10603_v61  ;;  %v3387_v17 = vpop.f32.mrf.mxu0 }
 0x2ef   :  { %v3858_v52 = vmul.f32 %v9548_v10, %v9548_v10  ;;  %v3769_v3 = vadd.f32 %v3768_v62, %v9529_v16  ;;  %v9565_v33 = vpop.f32.mrf.mxu1  ;;  %v9571_v27 = vadd.f32 %v9313_v25, %v3387_v17 }
 0x2f0   :  { %v3908_v0 = vadd.f32 %v3907_v45, %v3850_v18  ;;  %v3920_v42 = vadd.f32 %v3919_v24, %v3851_v34  ;;  %v3781_v30 = vadd.f32 %v3780_v47, %v9548_v10  ;;  %v3864_v43 = vmul.f32 %v9561_v53, %v9561_v53  ;;  %v3389_v35 = vpop.f32.mrf.mxu0 }
 0x2f1   :  { %v3770_v7 = vadd.f32 %v3769_v3, %v9561_v53  ;;  %v9574_v61 = vpop.f32.mrf.mxu1  ;;  %v3865_v59 = vmul.f32 %v9571_v27, %v9571_v27  ;;  %v9580_v29 = vadd.f32 %v9331_v9, %v3389_v35 }
 0x2f2   :  { %v3909_v57 = vadd.f32 %v3908_v0, %v3857_v8  ;;  %v3921_v14 = vadd.f32 %v3920_v42, %v3858_v52  ;;  %v3782_v21 = vadd.f32 %v3781_v30, %v9571_v27  ;;  %v3391_v22 = vpop.f32.mrf.mxu0 }
 0x2f3   :  { %v9582_v38 = vpop.f32.mrf.mxu1  ;;  %v3771_v13 = vadd.f32 %v3770_v7, %v9580_v29  ;;  %v3871_v26 = vmul.f32 %v9580_v29, %v9580_v29  ;;  %v9588_v48 = vadd.f32 %v9340_v23, %v3391_v22 }
 0x2f4   :  { %v3910_v32 = vadd.f32 %v3909_v57, %v3864_v43  ;;  %v3922_v25 = vadd.f32 %v3921_v14, %v3865_v59  ;;  %v3395_v49 = vpop.f32.mrf.mxu0 }
 0x2f5   :  { %6358 = vmatmul.mubr.msk.bf16.gmra.mxu0 %vm2144_vm2, %v8717_v56  ;;  %v9592_v19 = vpop.f32.mrf.mxu1  ;;  %v3783_v5 = vadd.f32 %v3782_v21, %v9588_v48  ;;  %v3872_v51 = vmul.f32 %v9588_v48, %v9588_v48  ;;  %v9598_v18 = vadd.f32 %v9356_v63, %v3395_v49 }
 0x2f6   :  { %v3911_v9 = vadd.f32 %v3910_v32, %v3871_v26  ;;  %v3397_v34 = vpop.f32.mrf.mxu0 }
 0x2f7   :  { %v9600_v45 = vpop.f32.mrf.mxu1  ;;  %v3923_v23 = vadd.f32 %v3922_v25, %v3872_v51  ;;  %v3772_v62 = vadd.f32 %v3771_v13, %v9598_v18  ;;  %v3878_v56 = vmul.f32 %v9598_v18, %v9598_v18  ;;  %v9606_v8 = vadd.f32 %v9366_v11, %v3397_v34 }
 0x2f8   :  { %v3399_v37 = vpop.f32.mrf.mxu0 }
 0x2f9   :  { %v3541_v24 = vpop.f32.mrf.mxu1  ;;  %v3773_v47 = vrot.slane %v3772_v62, 4  ;;  %v3912_v52 = vadd.f32 %v3911_v9, %v3878_v56  ;;  %v3784_v0 = vadd.f32 %v3783_v5, %v9606_v8  ;;  %v3879_v63 = vmul.f32 %v9606_v8, %v9606_v8 }
 0x2fa   :  { %v3400_v3 = vpop.f32.mrf.mxu0 }
 0x2fb   :  { %v3542_v17 = vpop.f32.mrf.mxu1  ;;  %v3774_v42 = vadd.f32 %v3773_v47, %v3772_v62  ;;  %v3913_v30 = vrot.slane %v3912_v52, 4  ;;  %v3785_v43 = vrot.slane %v3784_v0, 4  ;;  %v3924_v57 = vadd.f32 %v3923_v23, %v3879_v63 }
 0x2fc   :  { %v3578_v7 = vpop.f32.mrf.mxu0 }
 0x2fd   :  { %v9611_v35 = vpop.f32.mrf.mxu1  ;;  %v3775_v11 = vrot.slane %v3774_v42, 2  ;;  %v3914_v14 = vadd.f32 %v3913_v30, %v3912_v52  ;;  %v3786_v21 = vadd.f32 %v3785_v43, %v3784_v0  ;;  %v3925_v59 = vrot.slane %v3924_v57, 4 }
 0x2fe   :  { %v3580_v32 = vpop.f32.mrf.mxu0  ;;  %v9618_v56 = vadd.f32 %v3578_v7, %v9469_v60 }
 0x2ff   :  { %v9613_v22 = vpop.f32.mrf.mxu1  ;;  %v3776_v25 = vadd.f32 %v3775_v11, %v3774_v42  ;;  %v3915_v13 = vrot.slane %v3914_v14, 2  ;;  %v3787_v26 = vrot.slane %v3786_v21, 2  ;;  %v3926_v49 = vadd.f32 %v3925_v59, %v3924_v57 }
 0x300   :  { %v3582_v9 = vpop.f32.mrf.mxu0  ;;  %v3838_v60 = vmul.f32 %v9618_v56, %v9618_v56 }
 0x301   :  { %v9615_v5 = vpop.f32.mrf.mxu1  ;;  %v3777_v51 = vrot.slane %v3776_v25, 1  ;;  %v3916_v34 = vadd.f32 %v3915_v13, %v3914_v14  ;;  %v3788_v23 = vadd.f32 %v3787_v26, %v3786_v21  ;;  %v3927_v62 = vrot.slane %v3926_v49, 2 }
 0x302   :  { %v9621_v37 = vadd.f32 %v3582_v9, %v9480_v41  ;;  %v3584_v24 = vpop.f32.mrf.mxu0  ;;  %v9632_v41 = vadd.f32 %v3580_v32, %v9475_v58 }
 0x303   :  { %v9623_v47 = vpop.f32.mrf.mxu1  ;;  %v3778_v52 = vadd.f32 %v3777_v51, %v3776_v25  ;;  %v3917_v0 = vrot.slane %v3916_v34, 1  ;;  %v3789_v63 = vrot.slane %v3788_v23, 1  ;;  %v3928_v3 = vadd.f32 %v3927_v62, %v3926_v49 }
 0x304   :  { %v3588_v17 = vpop.f32.mrf.mxu0  ;;  %v3845_v13 = vmul.f32 %v9621_v37, %v9621_v37 }
 0x305   :  { %v9625_v42 = vpop.f32.mrf.mxu1  ;;  %v9627_v30 = vmul.f32 0.020408163, %v3778_v52  ;;  %v3918_v43 = vadd.f32 %v3917_v0, %v3916_v34  ;;  %v3790_v57 = vadd.f32 %v3789_v63, %v3788_v23  ;;  %v3929_v11 = vrot.slane %v3928_v3, 1 }
 0x306   :  { %v3590_v7 = vpop.f32.mrf.mxu0  ;;  %v9649_v49 = vadd.f32 %v3588_v17, %v9490_v55  ;;  %v3839_v0 = vmul.f32 %v9632_v41, %v9632_v41  ;;  %v3791_v63 = vadd.f32 %v9621_v37, %v9618_v56 }
 0x307   :  { %v9634_v14 = vpop.f32.mrf.mxu1  ;;  %v3969_v21 = vmul.f32 0.020408163, %v3918_v43  ;;  %v3976_v59 = vmul.f32 %v9627_v30, %v9627_v30  ;;  %v9653_v62 = vmul.f32 0.020408163, %v3790_v57  ;;  %v3930_v52 = vadd.f32 %v3929_v11, %v3928_v3 }
 0x308   :  { %v3592_v9 = vpop.f32.mrf.mxu0  ;;  %v9660_v43 = vadd.f32 %v3584_v24, %v9482_v4  ;;  %v3931_v57 = vadd.f32 %v3845_v13, %v3838_v60  ;;  %v3852_v23 = vmul.f32 %v9649_v49, %v9649_v49  ;;  %v9673_v4 = vadd.f32 %v3590_v7, %v9503_v44 }
 0x309   :  { %v6533_v51 = vpop.f32.mrf.mxu1  ;;  %v3983_v34 = vsub.f32 %v3969_v21, %v3976_v59  ;;  %v3970_v21 = vmul.f32 0.020408163, %v3930_v52  ;;  %v3977_v59 = vmul.f32 %v9653_v62, %v9653_v62  ;;  %v3792_v44 = vadd.f32 %v3791_v63, %v9649_v49 }
 0x30a   :  { %v3594_v55 = vpop.f32.mrf.mxu0  ;;  %v3803_v11 = vadd.f32 %v9660_v43, %v9632_v41  ;;  %v3846_v3 = vmul.f32 %v9660_v43, %v9660_v43  ;;  %v9687_v7 = vadd.f32 %v3592_v9, %v9518_v36  ;;  %v3853_v26 = vmul.f32 %v9673_v4, %v9673_v4 }
 0x30b   :  { %v9662_v17 = vpop.f32.mrf.mxu1  ;;  %v3990_v51 = vmax.f32 %v3983_v34, 0.0  ;;  %v3984_v52 = vsub.f32 %v3970_v21, %v3977_v59  ;;  %v9692_v59 = vadd.f32 %v3594_v55, %v9539_v54  ;;  %v3932_v54 = vadd.f32 %v3931_v57, %v3852_v23 }
 0x30c   :  { %v3598_v24 = vpop.f32.mrf.mxu0  ;;  %v3804_v60 = vadd.f32 %v3803_v11, %v9673_v4  ;;  %v3859_v36 = vmul.f32 %v9687_v7, %v9687_v7  ;;  %v3793_v55 = vadd.f32 %v3792_v44, %v9687_v7  ;;  %v3943_v11 = vadd.f32 %v3846_v3, %v3839_v0 }
 0x30d   :  { %v9675_v32 = vpop.f32.mrf.mxu1  ;;  %v4046_v34 = vadd.f32 1e-05, %v3990_v51  ;;  %v3991_v21 = vmax.f32 %v3984_v52, 0.0  ;;  %10610 = vst [vmem:[#allocation19_spill] sm:$0xff] %v9692_v59  ;;  %v9695_v13 = vadd.f32 %v3598_v24, %v9555_v20  ;;  %v3860_v25 = vmul.f32 %v9692_v59, %v9692_v59 }
 0x30e   :  { %10608 = vst [vmem:[#allocation14_spill] sm:$0xff] %v9675_v32  ;;  %v3600_v58 = vpop.f32.mrf.mxu0  ;;  %v3805_v24 = vadd.f32 %v3804_v60, %v9692_v59  ;;  %v3944_v44 = vadd.f32 %v3943_v11, %v3853_v26 }
 0x30f   :  { %v9689_v51 = vpop.f32.mrf.mxu1  ;;  %7116 = vrsqrt.f32 %v4046_v34  ;;  %v9703_v9 = vadd.f32 %v3600_v58, %v9565_v33  ;;  %v4047_v52 = vadd.f32 1e-05, %v3991_v21  ;;  %v3866_v20 = vmul.f32 %v9695_v13, %v9695_v13 }
 0x310   :  { %10609 = vst [vmem:[#allocation15_spill] sm:$0xff] %v9689_v51  ;;  %v3602_v63 = vpop.f32.mrf.mxu0  ;;  %v3933_v21 = vadd.f32 %v3932_v54, %v3859_v36  ;;  %v3794_v23 = vadd.f32 %v3793_v55, %v9695_v13 }
 0x311   :  { %10611 = vst [vmem:[#allocation12_spill] sm:$0xff] %v9703_v9  ;;  %v9705_v34 = vpop.f32.mrf.mxu1  ;;  %v9714_v39 = vadd.f32 %v3602_v63, %v9574_v61  ;;  %7118 = vrsqrt.f32 %v4047_v52  ;;  %v3806_v0 = vadd.f32 %v3805_v24, %v9703_v9  ;;  %v3867_v3 = vmul.f32 %v9703_v9, %v9703_v9 }
 0x312   :  { %10612 = vst [vmem:[#allocation13_spill] sm:$0xff] %v9705_v34  ;;  %v3604_v33 = vpop.f32.mrf.mxu0  ;;  %v3934_v31 = vadd.f32 %v3933_v21, %v3866_v20 }
 0x313   :  { %v9716_v58 = vpop.f32.mrf.mxu1  ;;  %v9720_v57 = vadd.f32 %v3604_v33, %v9582_v38  ;;  %v3873_v61 = vmul.f32 %v9714_v39, %v9714_v39  ;;  %v3795_v36 = vadd.f32 %v3794_v23, %v9714_v39  ;;  %v3945_v38 = vadd.f32 %v3944_v44, %v3860_v25 }
 0x314   :  { %10613 = vst [vmem:[#allocation16_spill] sm:$0xff] %v9716_v58  ;;  %v3608_v60 = vpop.f32.mrf.mxu0  ;;  %v4206_v25 = vrot.slane %v9435_v15, %v10604_v28 }
 0x315   :  { %10614 = vst [vmem:[#allocation17_spill] sm:$0xff] %v9720_v57  ;;  %v9727_v63 = vpop.f32.mrf.mxu1  ;;  %v9731_v52 = vadd.f32 %v3608_v60, %v9592_v19  ;;  %v3807_v26 = vadd.f32 %v3806_v0, %v9720_v57  ;;  %v3874_v54 = vmul.f32 %v9720_v57, %v9720_v57  ;;  %v3935_v24 = vadd.f32 %v3934_v31, %v3873_v61 }
 0x316   :  { %10615 = vst [vmem:[#allocation18_spill] sm:$0xff] %v9727_v63  ;;  %v3610_v55 = vpop.f32.mrf.mxu0  ;;  %v4120_v19 = vrot.slane %v9430_v12, %v10604_v28  ;;  %v3946_v23 = vadd.f32 %v3945_v38, %v3867_v3  ;;  %v4012_v63 = vsub.f32 %v9526_v50, %v9653_v62 }
 0x317   :  { %v9736_v11 = vpop.f32.mrf.mxu1  ;;  %v3796_v33 = vadd.f32 %v3795_v36, %v9731_v52  ;;  %v3880_v20 = vmul.f32 %v9731_v52, %v9731_v52  ;;  %v9742_v21 = vadd.f32 %v3610_v55, %v9600_v45  ;;  %v4004_v36 = vsub.f32 %v9513_v1, %v9627_v30  ;;  %v10619_v55 = vld [vmem:[#allocation8_spill] sm:$0xff] }
 0x318   :  { %10616 = vst [vmem:[#allocation20_spill] sm:$0xff] %v9736_v11  ;;  %v3612_v44 = vpop.f32.mrf.mxu0  ;;  %v9761_v11 = vrot.slane %v9430_v12, %v10619_v55  ;;  %v9765_v3 = vrot.slane %v9435_v15, %v10619_v55  ;;  %v3947_v38 = vadd.f32 %v3946_v23, %v3874_v54  ;;  %v4005_v1 = vsub.f32 %v9516_v2, %v9653_v62 }
 0x319   :  { %10617 = vst [vmem:[#allocation21_spill] sm:$0xff] %v9742_v21  ;;  %v9748_v0 = vpop.f32.mrf.mxu1  ;;  %v3797_v60 = vrot.slane %v3796_v33, 4  ;;  %v9750_v31 = vadd.f32 %v3935_v24, %v3880_v20  ;;  %v9753_v61 = vadd.f32 %v3807_v26, %v9742_v21  ;;  %v3881_v45 = vmul.f32 %v9742_v21, %v9742_v21 }
 0x31a   :  { %10618 = vst [vmem:[#allocation22_spill] sm:$0xff] %v9748_v0  ;;  %v3613_v24 = vpop.f32.mrf.mxu0  ;;  %v4011_v26 = vsub.f32 %v9523_v6, %v9627_v30  ;;  %v3998_v44 = vsub.f32 %v9501_v40, %v9653_v62  ;;  %v10622_v40 = vsub.f32 %v9486_v46, %v9627_v30  ;;  %v10624_v55 = vsub.f32 %v9561_v53, %v9627_v30 }
 0x31b   :  { %v9767_v20 = vpop.f32.mrf.mxu1  ;;  %v3798_v28 = vadd.f32 %v3797_v60, %v3796_v33  ;;  %v9779_v23 = vadd.f32 %v3947_v38, %v3881_v45  ;;  %v10623_v60 = vsub.f32 %v9529_v16, %v9627_v30  ;;  %v10625_v45 = vsub.f32 %v9580_v29, %v9627_v30 }
 0x31c   :  { %10620 = vst [vmem:[#allocation23_spill] sm:$0xff] %v9767_v20  ;;  %v7117_v0 = vpop.eup %7116  ;;  %v9781_v24 = vpop.f32.mrf.mxu0 }
 0x31d   :  { %v9783_v6 = vpop.f32.mrf.mxu1  ;;  %v4060_v20 = vmul.f32 %v7117_v0, %v10622_v40  ;;  %v4067_v2 = vmul.f32 %v7117_v0, %v4004_v36  ;;  %v4074_v33 = vmul.f32 %v7117_v0, %v4011_v26  ;;  %v4081_v50 = vmul.f32 %v7117_v0, %v10623_v60 }
 0x31e   :  { %10621 = vst [vmem:[#allocation24_spill] sm:$0xff] %v9783_v6  ;;  %v4088_v54 = vmul.f32 %v7117_v0, %v10624_v55  ;;  %v4095_v38 = vmul.f32 %v7117_v0, %v10625_v45  ;;  %v10626_v6 = vsub.f32 %v9598_v18, %v9627_v30  ;;  %v3799_v46 = vrot.slane %v3798_v28, 2  ;;  %v9800_v40 = vpop.f32.mrf.mxu0  ;;  %v7119_v32 = vpop.eup %7118 }
 0x31f   :  { %v9802_v36 = vpop.f32.mrf.mxu1  ;;  %v4146_v26 = vmul.f32 %v4120_v19, %v4060_v20  ;;  %v4153_v16 = vmul.f32 %v4120_v19, %v4067_v2  ;;  %v4160_v60 = vmul.f32 %v4120_v19, %v4074_v33  ;;  %v4167_v51 = vmul.f32 %v4120_v19, %v4081_v50 }
 0x320   :  { %v4102_v58 = vmul.f32 %v7117_v0, %v10626_v6  ;;  %10627 = vst [vmem:[#allocation25_spill] sm:$0xff] %v9802_v36  ;;  %v4174_v53 = vmul.f32 %v4120_v19, %v4088_v54  ;;  %v4181_v55 = vmul.f32 %v4120_v19, %v4095_v38  ;;  %v3800_v21 = vadd.f32 %v3799_v46, %v3798_v28  ;;  %v6498_v29 = vpop.f32.mrf.mxu0 }
 0x321   :  { %v9804_v45 = vpop.f32.mrf.mxu1  ;;  %v4232_v57 = vadd.f32 %v4206_v25, %v4146_v26  ;;  %v4239_v18 = vadd.f32 %v4206_v25, %v4153_v16  ;;  %v4246_v30 = vadd.f32 %v4206_v25, %v4160_v60  ;;  %v4253_v0 = vadd.f32 %v4206_v25, %v4167_v51 }
 0x322   :  { %v4188_v34 = vmul.f32 %v4120_v19, %v4102_v58  ;;  %v4260_v6 = vadd.f32 %v4206_v25, %v4174_v53  ;;  %v4267_v9 = vadd.f32 %v4206_v25, %v4181_v55  ;;  %v4061_v36 = vmul.f32 %v7119_v32, %v3998_v44  ;;  %v6499_v20 = vpop.f32.mrf.mxu0 }
 0x323   :  { %v9806_v2 = vpop.f32.mrf.mxu1  ;;  %4281 = vst [vmem:[#allocation2 + $0x10] sm:$0xff] %v4232_v57  ;;  %4288 = vst [vmem:[#allocation2 + $0x78] sm:$0xff] %v4239_v18  ;;  %v4068_v58 = vmul.f32 %v7119_v32, %v4005_v1  ;;  %v4075_v28 = vmul.f32 %v7119_v32, %v4012_v63  ;;  %v10628_v19 = vsub.f32 %v9548_v10, %v9653_v62  ;;  %v3801_v1 = vrot.slane %v3800_v21, 1 }
 0x324   :  { %v4274_v59 = vadd.f32 %v4206_v25, %v4188_v34  ;;  %4295 = vst [vmem:[#allocation2 + $0xe0] sm:$0xff] %v4246_v30  ;;  %4302 = vst [vmem:[#allocation2 + $0x148] sm:$0xff] %v4253_v0  ;;  %v10629_v51 = vsub.f32 %v9571_v27, %v9653_v62  ;;  %v10630_v34 = vsub.f32 %v9588_v48, %v9653_v62  ;;  %v6501_v10 = vpop.f32.mrf.mxu0 }
 0x325   :  { %v4082_v54 = vmul.f32 %v7119_v32, %v10628_v19  ;;  %4309 = vst [vmem:[#allocation2 + $0x1b0] sm:$0xff] %v4260_v6  ;;  %4316 = vst [vmem:[#allocation2 + $0x218] sm:$0xff] %v4267_v9  ;;  %v10631_v25 = vsub.f32 %v9606_v8, %v9653_v62  ;;  %v4147_v63 = vmul.f32 %v9761_v11, %v4061_v36  ;;  %v9821_v50 = vpop.f32.mrf.mxu1  ;;  %v3949_v19 = vrot.slane %v9779_v23, 4 }
 0x326   :  { %v4089_v33 = vmul.f32 %v7119_v32, %v10629_v51  ;;  %4323 = vst [vmem:[#allocation2 + $0x280] sm:$0xff] %v4274_v59  ;;  %v4096_v57 = vmul.f32 %v7119_v32, %v10630_v34  ;;  %v4154_v27 = vmul.f32 %v9761_v11, %v4068_v58  ;;  %v4161_v38 = vmul.f32 %v9761_v11, %v4075_v28 }
 0x327   :  { %v4103_v44 = vmul.f32 %v7119_v32, %v10631_v25  ;;  %v4168_v59 = vmul.f32 %v9761_v11, %v4082_v54  ;;  %v4233_v8 = vadd.f32 %v9765_v3, %v4147_v63  ;;  %v6502_v32 = vpop.f32.mrf.mxu0  ;;  %v9830_v62 = vpop.f32.mrf.mxu1  ;;  %v3802_v18 = vadd.f32 %v3801_v1, %v3800_v21 }
 0x328   :  { %v4175_v9 = vmul.f32 %v9761_v11, %v4089_v33  ;;  %v4182_v48 = vmul.f32 %v9761_v11, %v4096_v57  ;;  %v4240_v36 = vadd.f32 %v9765_v3, %v4154_v27  ;;  %v4247_v26 = vadd.f32 %v9765_v3, %v4161_v38 }
 0x329   :  { %v4189_v46 = vmul.f32 %v9761_v11, %v4103_v44  ;;  %v4254_v16 = vadd.f32 %v9765_v3, %v4168_v59  ;;  %4282 = vst [vmem:[#allocation2 + $0x18] sm:$0xff] %v4233_v8  ;;  %v10632_v11 = vrot.slane %v9750_v31, 4  ;;  %v6504_v0 = vpop.f32.mrf.mxu0  ;;  %v5079_v6 = vpop.f32.mrf.mxu1  ;;  %v10633_v58 = vrot.slane %v9753_v61, 4 }
 0x32a   :  { %v4261_v60 = vadd.f32 %v9765_v3, %v4175_v9  ;;  %v4268_v53 = vadd.f32 %v9765_v3, %v4182_v48  ;;  %4289 = vst [vmem:[#allocation2 + $0x80] sm:$0xff] %v4240_v36  ;;  %4296 = vst [vmem:[#allocation2 + $0xe8] sm:$0xff] %v4247_v26  ;;  %v6500_v54 = vadd.f32 %v6499_v20, %v6498_v29  ;;  %v9847_v33 = vmul.f32 0.020408163, %v3802_v18 }
 0x32b   :  { %v4275_v55 = vadd.f32 %v9765_v3, %v4189_v46  ;;  %v3938_v30 = vadd.f32 %v10632_v11, %v9750_v31  ;;  %4303 = vst [vmem:[#allocation2 + $0x150] sm:$0xff] %v4254_v16  ;;  %v3810_v28 = vadd.f32 %v10633_v58, %v9753_v61  ;;  %v6497_v3 = vadd.f32 %v9800_v40, %v9781_v24  ;;  %v6505_v31 = vpop.f32.mrf.mxu0  ;;  %v5080_v51 = vpop.f32.mrf.mxu1 }
 0x32c   :  { %4310 = vst [vmem:[#allocation2 + $0x1b8] sm:$0xff] %v4261_v60  ;;  %4317 = vst [vmem:[#allocation2 + $0x220] sm:$0xff] %v4268_v53  ;;  %v3950_v25 = vadd.f32 %v3949_v19, %v9779_v23  ;;  %v9851_v61 = vadd.f32 %v6500_v54, %v9623_v47  ;;  %v6503_v63 = vadd.f32 %v6502_v32, %v6501_v10 }
 0x32d   :  { %4324 = vst [vmem:[#allocation2 + $0x288] sm:$0xff] %v4275_v55  ;;  %v3939_v21 = vrot.slane %v3938_v30, 2  ;;  %v3811_v57 = vrot.slane %v3810_v28, 2  ;;  %v6507_v44 = vpop.f32.mrf.mxu0  ;;  %v6506_v29 = vadd.f32 %v6505_v31, %v6504_v0  ;;  %v9854_v38 = vadd.f32 %v6497_v3, %v9613_v22 }
 0x32e   :  { %v3951_v27 = vrot.slane %v3950_v25, 2  ;;  %v9857_v40 = vadd.f32 %v9611_v35, %v6503_v63  ;;  %v3978_v23 = vmul.f32 %v9847_v33, %v9847_v33  ;;  %v3847_v10 = vmul.f32 %v9851_v61, %v9851_v61 }
 0x32f   :  { %v3940_v34 = vadd.f32 %v3939_v21, %v3938_v30  ;;  %v3812_v1 = vadd.f32 %v3811_v57, %v3810_v28  ;;  %v6508_v24 = vpop.f32.mrf.mxu0  ;;  %v9864_v46 = vadd.f32 %v9615_v5, %v6506_v29  ;;  %v3840_v35 = vmul.f32 %v9854_v38, %v9854_v38 }
 0x330   :  { %v3952_v48 = vadd.f32 %v3951_v27, %v3950_v25  ;;  %v6509_v8 = vadd.f32 %v6508_v24, %v6507_v44  ;;  %v3815_v16 = vadd.f32 %v9851_v61, %v9854_v38  ;;  %v3854_v60 = vmul.f32 %v9857_v40, %v9857_v40 }
 0x331   :  { %v3941_v20 = vrot.slane %v3940_v34, 1  ;;  %v3813_v9 = vrot.slane %v3812_v1, 1  ;;  %v6510_v47 = vpop.f32.mrf.mxu0  ;;  %v3955_v0 = vadd.f32 %v3847_v10, %v3840_v35  ;;  %v3861_v58 = vmul.f32 %v9864_v46, %v9864_v46 }
 0x332   :  { %v3953_v36 = vrot.slane %v3952_v48, 1  ;;  %v9873_v53 = vadd.f32 %v6509_v8, %v9634_v14  ;;  %v3816_v6 = vadd.f32 %v3815_v16, %v9857_v40 }
 0x333   :  { %v3942_v59 = vadd.f32 %v3941_v20, %v3940_v34  ;;  %v3814_v32 = vadd.f32 %v3813_v9, %v3812_v1  ;;  %v6511_v26 = vpop.f32.mrf.mxu0  ;;  %v3956_v3 = vadd.f32 %v3955_v0, %v3854_v60  ;;  %v4013_v0 = vsub.f32 %v9649_v49, %v9847_v33 }
 0x334   :  { %v6512_v55 = vadd.f32 %v6511_v26, %v6510_v47  ;;  %v3954_v11 = vadd.f32 %v3953_v36, %v3952_v48  ;;  %v3817_v31 = vadd.f32 %v3816_v6, %v9864_v46  ;;  %v3868_v51 = vmul.f32 %v9873_v53, %v9873_v53  ;;  %v10634_v36 = vld [vmem:[#allocation10_spill] sm:$0xff] }
 0x335   :  { %v3971_v22 = vmul.f32 0.020408163, %v3942_v59  ;;  %v9875_v18 = vmul.f32 0.020408163, %v3814_v32  ;;  %v6513_v30 = vpop.f32.mrf.mxu0  ;;  %v3957_v44 = vadd.f32 %v3956_v3, %v3861_v58  ;;  %v4128_v35 = vrot.slane %v9430_v12, %v10634_v36 }
 0x336   :  { %v9881_v28 = vadd.f32 %v6512_v55, %v9662_v17  ;;  %v3972_v54 = vmul.f32 0.020408163, %v3954_v11  ;;  %v3818_v63 = vadd.f32 %v3817_v31, %v9873_v53  ;;  %v4214_v26 = vrot.slane %v9435_v15, %v10634_v36 }
 0x337   :  { %v3985_v5 = vsub.f32 %v3971_v22, %v3978_v23  ;;  %v3979_v14 = vmul.f32 %v9875_v18, %v9875_v18  ;;  %v6514_v21 = vpop.f32.mrf.mxu0  ;;  %v3958_v27 = vadd.f32 %v3957_v44, %v3868_v51  ;;  %v3999_v55 = vsub.f32 %v9618_v56, %v9847_v33 }
 0x338   :  { %v3875_v17 = vmul.f32 %v9881_v28, %v9881_v28  ;;  %v6515_v29 = vadd.f32 %v6514_v21, %v6513_v30  ;;  %v3819_v24 = vadd.f32 %v3818_v63, %v9881_v28  ;;  %v4020_v6 = vsub.f32 %v9687_v7, %v9847_v33 }
 0x339   :  { %v3992_v19 = vmax.f32 %v3985_v5, 0.0  ;;  %v3986_v57 = vsub.f32 %v3972_v54, %v3979_v14  ;;  %v6516_v25 = vpop.f32.mrf.mxu0  ;;  %v4006_v5 = vsub.f32 %v9621_v37, %v9847_v33  ;;  %v4041_v56 = vsub.f32 %v9731_v52, %v9847_v33  ;;  %v10636_v54 = vld [vmem:[#allocation19_spill] sm:$0xff]  ;;  %v10637_v14 = vld [vmem:[#allocation12_spill] sm:$0xff]  ;;  %v10638_v52 = vld [vmem:[#allocation17_spill] sm:$0xff] }
 0x33a   :  { %v9893_v59 = vadd.f32 %v9625_v42, %v6515_v29  ;;  %v3959_v9 = vadd.f32 %v3958_v27, %v3875_v17  ;;  %v10635_v42 = vld [vmem:[#allocation11_spill] sm:$0xff]  ;;  %v4000_v37 = vsub.f32 %v9632_v41, %v9875_v18  ;;  %v4007_v49 = vsub.f32 %v9660_v43, %v9875_v18  ;;  %v10639_v41 = vld [vmem:[#allocation21_spill] sm:$0xff] }
 0x33b   :  { %v4048_v34 = vadd.f32 1e-05, %v3992_v19  ;;  %v3993_v20 = vmax.f32 %v3986_v57, 0.0  ;;  %v6517_v1 = vpop.f32.mrf.mxu0  ;;  %v9904_v16 = vrot.slane %v9430_v12, %v10635_v42  ;;  %v9908_v60 = vrot.slane %v9435_v15, %v10635_v42 }
 0x33c   :  { %v3820_v48 = vadd.f32 %v3819_v24, %v9893_v59  ;;  %v3882_v47 = vmul.f32 %v9893_v59, %v9893_v59  ;;  %v4027_v12 = vsub.f32 %v9695_v13, %v9847_v33  ;;  %v4034_v15 = vsub.f32 %v9714_v39, %v9847_v33 }
 0x33d   :  { %7120 = vrsqrt.f32 %v4048_v34  ;;  %v4049_v23 = vadd.f32 1e-05, %v3993_v20  ;;  %v4014_v7 = vsub.f32 %v9673_v4, %v9875_v18  ;;  %v4021_v13 = vsub.f32 %v10636_v54, %v9875_v18 }
 0x33e   :  { %v3821_v10 = vrot.slane %v3820_v48, 4  ;;  %v3960_v8 = vadd.f32 %v3959_v9, %v3882_v47  ;;  %v4028_v39 = vsub.f32 %v10637_v14, %v9875_v18  ;;  %v4035_v33 = vsub.f32 %v10638_v52, %v9875_v18 }
 0x33f   :  { %7122 = vrsqrt.f32 %v4049_v23  ;;  %v4042_v3 = vsub.f32 %v10639_v41, %v9875_v18 }
 0x340   :  { %v3822_v22 = vadd.f32 %v3821_v10, %v3820_v48  ;;  %v3961_v32 = vrot.slane %v3960_v8, 4 }
 0x342   :  { %v3823_v11 = vrot.slane %v3822_v22, 2  ;;  %v3962_v30 = vadd.f32 %v3961_v32, %v3960_v8 }
 0x344   :  { %v3824_v58 = vadd.f32 %v3823_v11, %v3822_v22  ;;  %v3963_v19 = vrot.slane %v3962_v30, 2 }
 0x346   :  { %v3825_v31 = vrot.slane %v3824_v58, 1  ;;  %v3964_v51 = vadd.f32 %v3963_v19, %v3962_v30 }
 0x348   :  { %v3826_v17 = vadd.f32 %v3825_v31, %v3824_v58  ;;  %v3965_v54 = vrot.slane %v3964_v51, 1 }
 0x34a   :  { %v7121_v21 = vpop.eup %7120  ;;  %v9938_v47 = vmul.f32 0.020408163, %v3826_v17  ;;  %v3966_v52 = vadd.f32 %v3965_v54, %v3964_v51 }
 0x34b   :  { %v4062_v34 = vmul.f32 %v7121_v21, %v3999_v55  ;;  %v4069_v43 = vmul.f32 %v7121_v21, %v4006_v5  ;;  %v4076_v57 = vmul.f32 %v7121_v21, %v4013_v0  ;;  %v4083_v25 = vmul.f32 %v7121_v21, %v4020_v6 }
 0x34c   :  { %v4090_v4 = vmul.f32 %v7121_v21, %v4027_v12  ;;  %v4097_v44 = vmul.f32 %v7121_v21, %v4034_v15  ;;  %v4104_v63 = vmul.f32 %v7121_v21, %v4041_v56  ;;  %v7123_v24 = vpop.eup %7122  ;;  %v9940_v32 = vpop.f32.mrf.mxu1 }
 0x34d   :  { %v4148_v29 = vmul.f32 %v4128_v35, %v4062_v34  ;;  %v4155_v20 = vmul.f32 %v4128_v35, %v4069_v43  ;;  %v4162_v1 = vmul.f32 %v4128_v35, %v4076_v57  ;;  %v4169_v27 = vmul.f32 %v4128_v35, %v4083_v25 }
 0x34e   :  { %v4176_v23 = vmul.f32 %v4128_v35, %v4090_v4  ;;  %v4183_v9 = vmul.f32 %v4128_v35, %v4097_v44  ;;  %v4190_v48 = vmul.f32 %v4128_v35, %v4104_v63  ;;  %v4063_v30 = vmul.f32 %v7123_v24, %v4000_v37  ;;  %v9942_v15 = vpop.f32.mrf.mxu1 }
 0x34f   :  { %v4234_v18 = vadd.f32 %v4214_v26, %v4148_v29  ;;  %v4241_v10 = vadd.f32 %v4214_v26, %v4155_v20  ;;  %v4248_v8 = vadd.f32 %v4214_v26, %v4162_v1  ;;  %v4255_v22 = vadd.f32 %v4214_v26, %v4169_v27 }
 0x350   :  { %v4262_v55 = vadd.f32 %v4214_v26, %v4176_v23  ;;  %v4269_v5 = vadd.f32 %v4214_v26, %v4183_v9  ;;  %v4276_v11 = vadd.f32 %v4214_v26, %v4190_v48  ;;  %v4070_v0 = vmul.f32 %v7123_v24, %v4007_v49  ;;  %v10640_v48 = vld [vmem:[#allocation13_spill] sm:$0xff] }
 0x351   :  { %4283 = vst [vmem:[#allocation2 + $0x20] sm:$0xff] %v4234_v18  ;;  %4290 = vst [vmem:[#allocation2 + $0x88] sm:$0xff] %v4241_v10  ;;  %v4077_v6 = vmul.f32 %v7123_v24, %v4014_v7  ;;  %v4084_v12 = vmul.f32 %v7123_v24, %v4021_v13  ;;  %v4091_v35 = vmul.f32 %v7123_v24, %v4028_v39  ;;  %v9949_v7 = vpop.f32.mrf.mxu1  ;;  %v3973_v25 = vmul.f32 0.020408163, %v3966_v52  ;;  %v10641_v10 = vld [vmem:[#allocation14_spill] sm:$0xff] }
 0x352   :  { %4297 = vst [vmem:[#allocation2 + $0xf0] sm:$0xff] %v4248_v8  ;;  %4304 = vst [vmem:[#allocation2 + $0x158] sm:$0xff] %v4255_v22  ;;  %v4098_v56 = vmul.f32 %v7123_v24, %v4035_v33  ;;  %v4105_v58 = vmul.f32 %v7123_v24, %v4042_v3  ;;  %v4149_v19 = vmul.f32 %v9904_v16, %v4063_v30  ;;  %v10642_v22 = vld [vmem:[#allocation15_spill] sm:$0xff]  ;;  %v10643_v30 = vld [vmem:[#allocation16_spill] sm:$0xff] }
 0x353   :  { %4311 = vst [vmem:[#allocation2 + $0x1c0] sm:$0xff] %v4262_v55  ;;  %4318 = vst [vmem:[#allocation2 + $0x228] sm:$0xff] %v4269_v5  ;;  %v4156_v26 = vmul.f32 %v9904_v16, %v4070_v0  ;;  %v4163_v37 = vmul.f32 %v9904_v16, %v4077_v6  ;;  %v4170_v14 = vmul.f32 %v9904_v16, %v4084_v12  ;;  %v9958_v34 = vpop.f32.mrf.mxu1  ;;  %v7138_v6 = vld [vmem:[%s10550_s6] sm:$0xff]  ;;  %v10644_v12 = vld [vmem:[#allocation9_spill] sm:$0xff] }
 0x354   :  { %4325 = vst [vmem:[#allocation2 + $0x290] sm:$0xff] %v4276_v11  ;;  %v4177_v49 = vmul.f32 %v9904_v16, %v4091_v35  ;;  %v4184_v13 = vmul.f32 %v9904_v16, %v4098_v56  ;;  %v4191_v39 = vmul.f32 %v9904_v16, %v4105_v58  ;;  %v4235_v21 = vadd.f32 %v9908_v60, %v4149_v19  ;;  %v7139_v56 = vld [vmem:[%s10551_s7] sm:$0xff] }
 0x355   :  { %v4242_v33 = vadd.f32 %v9908_v60, %v4156_v26  ;;  %v4249_v41 = vadd.f32 %v9908_v60, %v4163_v37  ;;  %v4256_v3 = vadd.f32 %v9908_v60, %v4170_v14  ;;  %v3980_v16 = vmul.f32 %v9938_v47, %v9938_v47  ;;  %v9964_v51 = vpop.f32.mrf.mxu1 }
 0x356   :  { %v4263_v31 = vadd.f32 %v9908_v60, %v4177_v49  ;;  %v4270_v43 = vadd.f32 %v9908_v60, %v4184_v13  ;;  %v4277_v57 = vadd.f32 %v9908_v60, %v4191_v39  ;;  %4284 = vst [vmem:[#allocation2 + $0x28] sm:$0xff] %v4235_v21  ;;  %v4136_v35 = vrot.slane %v7138_v6, %v10644_v12  ;;  %v10645_v13 = vld [vmem:[#allocation18_spill] sm:$0xff] }
 0x357   :  { %4291 = vst [vmem:[#allocation2 + $0x90] sm:$0xff] %v4242_v33  ;;  %4298 = vst [vmem:[#allocation2 + $0xf8] sm:$0xff] %v4249_v41  ;;  %v3987_v4 = vsub.f32 %v3973_v25, %v3980_v16  ;;  %v9966_v44 = vpop.f32.mrf.mxu1  ;;  %v4222_v58 = vrot.slane %v7139_v56, %v10644_v12  ;;  %v4001_v37 = vsub.f32 %v9854_v38, %v9938_v47 }
 0x358   :  { %4305 = vst [vmem:[#allocation2 + $0x160] sm:$0xff] %v4256_v3  ;;  %4312 = vst [vmem:[#allocation2 + $0x1c8] sm:$0xff] %v4263_v31  ;;  %v4008_v14 = vsub.f32 %v9851_v61, %v9938_v47  ;;  %v4015_v21 = vsub.f32 %v9857_v40, %v9938_v47  ;;  %v4022_v3 = vsub.f32 %v9864_v46, %v9938_v47 }
 0x359   :  { %4319 = vst [vmem:[#allocation2 + $0x230] sm:$0xff] %v4270_v43  ;;  %4326 = vst [vmem:[#allocation2 + $0x298] sm:$0xff] %v4277_v57  ;;  %v3994_v63 = vmax.f32 %v3987_v4, 0.0  ;;  %v9968_v17 = vpop.f32.mrf.mxu1  ;;  %v4029_v31 = vsub.f32 %v9873_v53, %v9938_v47  ;;  %v4036_v40 = vsub.f32 %v9881_v28, %v9938_v47  ;;  %v4043_v43 = vsub.f32 %v9893_v59, %v9938_v47 }
 0x35b   :  { %v4050_v60 = vadd.f32 1e-05, %v3994_v63  ;;  %v9970_v29 = vpop.f32.mrf.mxu1 }
 0x35c   :  { %v4974_v20 = vpop.f32.mrf.mxu0 }
 0x35d   :  { %7124 = vrsqrt.f32 %v4050_v60  ;;  %v9972_v1 = vpop.f32.mrf.mxu1  ;;  %v9982_v8 = vadd.f32 %v10641_v10, %v4974_v20 }
 0x35e   :  { %v4976_v27 = vpop.f32.mrf.mxu0 }
 0x35f   :  { %v9974_v24 = vpop.f32.mrf.mxu1  ;;  %v9985_v55 = vadd.f32 %v10642_v22, %v4976_v27  ;;  %v5444_v52 = vmul.f32 %v9982_v8, %v9982_v8  ;;  %v10646_v22 = vld [vmem:[#allocation20_spill] sm:$0xff] }
 0x360   :  { %v4978_v23 = vpop.f32.mrf.mxu0 }
 0x361   :  { %v9976_v9 = vpop.f32.mrf.mxu1  ;;  %v9979_v18 = vadd.f32 %v10640_v48, %v4978_v23  ;;  %v5445_v33 = vmul.f32 %v9985_v55, %v9985_v55 }
 0x362   :  { %v4980_v5 = vpop.f32.mrf.mxu0 }
 0x363   :  { %v9987_v11 = vpop.f32.mrf.mxu1  ;;  %v9990_v0 = vadd.f32 %v10643_v30, %v4980_v5  ;;  %v5450_v19 = vmul.f32 %v9979_v18, %v9979_v18  ;;  %v5366_v38 = vadd.f32 %v9979_v18, %v9982_v8 }
 0x364   :  { %v4984_v54 = vpop.f32.mrf.mxu0 }
 0x365   :  { %v10002_v26 = vpop.f32.mrf.mxu1  ;;  %v5451_v49 = vmul.f32 %v9990_v0, %v9990_v0  ;;  %v10011_v39 = vadd.f32 %v10645_v13, %v4984_v54  ;;  %v5486_v25 = vadd.f32 %v5450_v19, %v5444_v52  ;;  %v5378_v16 = vadd.f32 %v9990_v0, %v9985_v55 }
 0x366   :  { %v4986_v41 = vpop.f32.mrf.mxu0 }
 0x367   :  { %v10021_v61 = vpop.f32.mrf.mxu1  ;;  %v5498_v4 = vadd.f32 %v5451_v49, %v5445_v33  ;;  %v5367_v63 = vadd.f32 %v5366_v38, %v10011_v39  ;;  %v10035_v5 = vadd.f32 %v10646_v22, %v4986_v41 }
 0x368   :  { %v4988_v60 = vpop.f32.mrf.mxu0 }
 0x369   :  { %v5150_v20 = vpop.f32.mrf.mxu1 }
 0x36a   :  { %v7125_v57 = vpop.eup %7124  ;;  %v4990_v59 = vpop.f32.mrf.mxu0 }
 0x36b   :  { %v4064_v46 = vmul.f32 %v7125_v57, %v4001_v37  ;;  %v4071_v27 = vmul.f32 %v7125_v57, %v4008_v14  ;;  %v4078_v23 = vmul.f32 %v7125_v57, %v4015_v21  ;;  %v4085_v53 = vmul.f32 %v7125_v57, %v4022_v3  ;;  %v5151_v47 = vpop.f32.mrf.mxu1 }
 0x36c   :  { %v4092_v48 = vmul.f32 %v7125_v57, %v4029_v31  ;;  %v4099_v10 = vmul.f32 %v7125_v57, %v4036_v40  ;;  %v4106_v28 = vmul.f32 %v7125_v57, %v4043_v43  ;;  %v5456_v37 = vmul.f32 %v10011_v39, %v10011_v39  ;;  %v4994_v14 = vpop.f32.mrf.mxu0  ;;  %v10648_v57 = vld [vmem:[#allocation23_spill] sm:$0xff] }
 0x36d   :  { %v4150_v30 = vmul.f32 %v4136_v35, %v4064_v46  ;;  %v4157_v6 = vmul.f32 %v4136_v35, %v4071_v27  ;;  %v4164_v12 = vmul.f32 %v4136_v35, %v4078_v23  ;;  %v4171_v56 = vmul.f32 %v4136_v35, %v4085_v53  ;;  %v10649_v46 = vld [vmem:[#allocation24_spill] sm:$0xff]  ;;  %v10650_v23 = vld [vmem:[#allocation25_spill] sm:$0xff] }
 0x36e   :  { %v4178_v19 = vmul.f32 %v4136_v35, %v4092_v48  ;;  %v4185_v54 = vmul.f32 %v4136_v35, %v4099_v10  ;;  %v4192_v49 = vmul.f32 %v4136_v35, %v4106_v28  ;;  %v5457_v31 = vmul.f32 %v10035_v5, %v10035_v5  ;;  %v4996_v40 = vpop.f32.mrf.mxu0  ;;  %v10647_v35 = vld [vmem:[#allocation22_spill] sm:$0xff] }
 0x36f   :  { %v4236_v13 = vadd.f32 %v4222_v58, %v4150_v30  ;;  %v4243_v21 = vadd.f32 %v4222_v58, %v4157_v6  ;;  %v4250_v52 = vadd.f32 %v4222_v58, %v4164_v12  ;;  %v4257_v33 = vadd.f32 %v4222_v58, %v4171_v56 }
 0x370   :  { %v4264_v38 = vadd.f32 %v4222_v58, %v4178_v19  ;;  %v4271_v41 = vadd.f32 %v4222_v58, %v4185_v54  ;;  %v4278_v3 = vadd.f32 %v4222_v58, %v4192_v49  ;;  %v10042_v43 = vadd.f32 %v10647_v35, %v4988_v60  ;;  %v4998_v10 = vpop.f32.mrf.mxu0 }
 0x371   :  { %4285 = vst [vmem:[#allocation2 + $0x30] sm:$0xff] %v4236_v13  ;;  %4292 = vst [vmem:[#allocation2 + $0x98] sm:$0xff] %v4243_v21  ;;  %v10045_v20 = vadd.f32 %v10648_v57, %v4990_v59  ;;  %v10048_v27 = vadd.f32 %v10649_v46, %v4994_v14  ;;  %v10051_v53 = vadd.f32 %v10650_v23, %v4996_v40 }
 0x372   :  { %4299 = vst [vmem:[#allocation2 + $0x100] sm:$0xff] %v4250_v52  ;;  %4306 = vst [vmem:[#allocation2 + $0x168] sm:$0xff] %v4257_v33  ;;  %v5487_v58 = vadd.f32 %v5486_v25, %v5456_v37  ;;  %v5379_v48 = vadd.f32 %v5378_v16, %v10035_v5  ;;  %v5499_v28 = vadd.f32 %v5498_v4, %v5457_v31  ;;  %v5000_v4 = vpop.f32.mrf.mxu0 }
 0x373   :  { %4313 = vst [vmem:[#allocation2 + $0x1d0] sm:$0xff] %v4264_v38  ;;  %4320 = vst [vmem:[#allocation2 + $0x238] sm:$0xff] %v4271_v41  ;;  %v5368_v60 = vadd.f32 %v5367_v63, %v10042_v43  ;;  %v5462_v22 = vmul.f32 %v10042_v43, %v10042_v43  ;;  %v5463_v59 = vmul.f32 %v10045_v20, %v10045_v20 }
 0x374   :  { %4327 = vst [vmem:[#allocation2 + $0x2a0] sm:$0xff] %v4278_v3  ;;  %v5380_v47 = vadd.f32 %v5379_v48, %v10045_v20  ;;  %v5468_v30 = vmul.f32 %v10048_v27, %v10048_v27  ;;  %v5469_v25 = vmul.f32 %v10051_v53, %v10051_v53  ;;  %v10065_v16 = vadd.f32 %v9804_v45, %v4998_v10  ;;  %v5004_v49 = vpop.f32.mrf.mxu0 }
 0x375   :  { %v5488_v6 = vadd.f32 %v5487_v58, %v5462_v22  ;;  %v5369_v63 = vadd.f32 %v5368_v60, %v10048_v27  ;;  %v5500_v12 = vadd.f32 %v5499_v28, %v5463_v59  ;;  %v10072_v54 = vadd.f32 %v9806_v2, %v5000_v4 }
 0x376   :  { %v5381_v56 = vadd.f32 %v5380_v47, %v10051_v53  ;;  %v5474_v19 = vmul.f32 %v10065_v16, %v10065_v16  ;;  %v10076_v45 = vadd.f32 %v9821_v50, %v5004_v49  ;;  %v5006_v33 = vpop.f32.mrf.mxu0 }
 0x377   :  { %v5489_v37 = vadd.f32 %v5488_v6, %v5468_v30  ;;  %v5370_v14 = vadd.f32 %v5369_v63, %v10065_v16  ;;  %v5501_v13 = vadd.f32 %v5500_v12, %v5469_v25  ;;  %v5475_v52 = vmul.f32 %v10072_v54, %v10072_v54 }
 0x378   :  { %v5382_v21 = vadd.f32 %v5381_v56, %v10072_v54  ;;  %v5480_v2 = vmul.f32 %v10076_v45, %v10076_v45  ;;  %v10085_v3 = vadd.f32 %v9830_v62, %v5006_v33  ;;  %v5008_v40 = vpop.f32.mrf.mxu0 }
 0x379   :  { %v5490_v38 = vadd.f32 %v5489_v37, %v5474_v19  ;;  %v5371_v41 = vadd.f32 %v5370_v14, %v10076_v45  ;;  %v5502_v31 = vadd.f32 %v5501_v13, %v5475_v52 }
 0x37a   :  { %v5383_v57 = vadd.f32 %v5382_v21, %v10085_v3  ;;  %v5481_v46 = vmul.f32 %v10085_v3, %v10085_v3  ;;  %v5009_v23 = vpop.f32.mrf.mxu0 }
 0x37b   :  { %v5372_v50 = vrot.slane %v5371_v41, 4  ;;  %v5491_v35 = vadd.f32 %v5490_v38, %v5480_v2 }
 0x37c   :  { %v5384_v10 = vrot.slane %v5383_v57, 4  ;;  %v5503_v28 = vadd.f32 %v5502_v31, %v5481_v46  ;;  %v5187_v60 = vpop.f32.mrf.mxu0 }
 0x37d   :  { %v5373_v58 = vadd.f32 %v5372_v50, %v5371_v41  ;;  %v5492_v48 = vrot.slane %v5491_v35, 4  ;;  %v10091_v30 = vadd.f32 %v5187_v60, %v9940_v32 }
 0x37e   :  { %v5385_v47 = vadd.f32 %v5384_v10, %v5383_v57  ;;  %v5504_v62 = vrot.slane %v5503_v28, 4  ;;  %v5189_v25 = vpop.f32.mrf.mxu0 }
 0x37f   :  { %v5374_v22 = vrot.slane %v5373_v58, 2  ;;  %v5493_v59 = vadd.f32 %v5492_v48, %v5491_v35  ;;  %v5446_v13 = vmul.f32 %v10091_v30, %v10091_v30  ;;  %v10099_v2 = vadd.f32 %v5189_v25, %v9942_v15 }
 0x380   :  { %v5386_v63 = vrot.slane %v5385_v47, 2  ;;  %v5505_v12 = vadd.f32 %v5504_v62, %v5503_v28  ;;  %v5191_v56 = vpop.f32.mrf.mxu0 }
 0x381   :  { %v5375_v4 = vadd.f32 %v5374_v22, %v5373_v58  ;;  %v5494_v6 = vrot.slane %v5493_v59, 2  ;;  %v10096_v21 = vadd.f32 %v5191_v56, %v9949_v7  ;;  %v5447_v22 = vmul.f32 %v10099_v2, %v10099_v2 }
 0x382   :  { %v5387_v37 = vadd.f32 %v5386_v63, %v5385_v47  ;;  %v5506_v14 = vrot.slane %v5505_v12, 2  ;;  %v5193_v52 = vpop.f32.mrf.mxu0 }
 0x383   :  { %v5376_v19 = vrot.slane %v5375_v4, 1  ;;  %v5495_v49 = vadd.f32 %v5494_v6, %v5493_v59  ;;  %v5390_v31 = vadd.f32 %v10096_v21, %v10091_v30  ;;  %v5452_v40 = vmul.f32 %v10096_v21, %v10096_v21 }
 0x384   :  { %v5388_v38 = vrot.slane %v5387_v37, 1  ;;  %v5507_v41 = vadd.f32 %v5506_v14, %v5505_v12  ;;  %v10106_v50 = vadd.f32 %v5193_v52, %v9958_v34  ;;  %v5197_v35 = vpop.f32.mrf.mxu0 }
 0x385   :  { %v5377_v33 = vadd.f32 %v5376_v19, %v5375_v4  ;;  %v5496_v32 = vrot.slane %v5495_v49, 1  ;;  %v5510_v58 = vadd.f32 %v5452_v40, %v5446_v13  ;;  %v10115_v10 = vadd.f32 %v5197_v35, %v9964_v51  ;;  %v10126_v4 = vld [vmem:[%s10550_s6 + $0x7] sm:$0x3f]  ;;  %s7164_s6 = smov [#allocation2]  }
 0x386   :  { %v5389_v46 = vadd.f32 %v5388_v38, %v5387_v37  ;;  %v5508_v23 = vrot.slane %v5507_v41, 1  ;;  %v5402_v15 = vadd.f32 %v10106_v50, %v10099_v2  ;;  %v5453_v48 = vmul.f32 %v10106_v50, %v10106_v50  ;;  %v5199_v28 = vpop.f32.mrf.mxu0  ;;  %v10131_v51 = vld [vmem:[%s10551_s7 + $0x7] sm:$0x3f]  ;;  %s5873_s7 = sshll.u32 %s7164_s6, 4  ;;  %s5874_s7 = int_to_ptr.vmem [resolvable:$true] %s5873_s7 }
 0x387   :  { %v10108_v7 = vmul.f32 0.020408163, %v5377_v33  ;;  %v5497_v57 = vadd.f32 %v5496_v32, %v5495_v49  ;;  %v5391_v63 = vadd.f32 %v5390_v31, %v10115_v10  ;;  %v5458_v12 = vmul.f32 %v10115_v10, %v10115_v10  ;;  %v10651_v33 = vld [vmem:[#allocation5_spill] sm:$0xff]  ;;  %s7140_s12 = scalar_lea.vmem %s5874_s7, 11648  ;;  %p7145_p1 = scmp.lt.s32.totalorder %s5874_s7, %s5874_s7 }
 0x388   :  { %v5201_v59 = vpop.f32.mrf.mxu0  ;;  %v10121_v62 = vmul.f32 0.020408163, %v5389_v46  ;;  %v5509_v25 = vadd.f32 %v5508_v23, %v5507_v41  ;;  %v5522_v6 = vadd.f32 %v5453_v48, %v5447_v22  ;;  %v10137_v56 = vadd.f32 %v5199_v28, %v9966_v44  ;;  %p7141_p0 = scmp.ne.s32.totalorder %s5874_s7, %s7140_s12  ;;  %p7146_p2 = scmp.lt.s32.totalorder %s7140_s12, %s7140_s12 }
 0x389   :  { %v5558_v60 = vmul.f32 0.020408163, %v5497_v57  ;;  %v5564_v34 = vmul.f32 %v10108_v7, %v10108_v7  ;;  %v10143_v32 = vrot.slane %v10126_v4, %v10651_v33  ;;  %v10147_v38 = vrot.slane %v10131_v51, %v10651_v33 }
 0x38a   :  { %v5203_v19 = vpop.f32.mrf.mxu0  ;;  %v5559_v37 = vmul.f32 0.020408163, %v5509_v25  ;;  %v5565_v14 = vmul.f32 %v10121_v62, %v10121_v62  ;;  %v5511_v44 = vadd.f32 %v5510_v58, %v5458_v12  ;;  %v5403_v40 = vadd.f32 %v5402_v15, %v10137_v56  ;;  %p7147_p3 = por %p7146_p2, %p7145_p1 }
 0x38b   :  { %v5570_v47 = vsub.f32 %v5558_v60, %v5564_v34  ;;  %v5459_v35 = vmul.f32 %v10137_v56, %v10137_v56  ;;  %v10155_v57 = vadd.f32 %v5201_v59, %v9968_v17  ;;  %v10158_v48 = vadd.f32 %v5203_v19, %v9970_v29 }
 0x38c   :  { %v5207_v13 = vpop.f32.mrf.mxu0  ;;  %v5571_v41 = vsub.f32 %v5559_v37, %v5565_v14  ;;  %p7148_p4 = pnand %p7147_p3, %p7141_p0 }
 0x38d   :  { %v5576_v49 = vmax.f32 %v5570_v47, 0.0  ;;  %v10149_v31 = vpop.f32.mrf.mxu1  ;;  %v10161_v28 = vadd.f32 %v5207_v13, %v9972_v1  ;;  %v5523_v58 = vadd.f32 %v5522_v6, %v5459_v35  ;;  %v5392_v15 = vadd.f32 %v5391_v63, %v10155_v57 }
 0x38e   :  { %v5209_v46 = vpop.f32.mrf.mxu0  ;;  %v5577_v23 = vmax.f32 %v5571_v41, 0.0  ;;  %v5464_v34 = vmul.f32 %v10155_v57, %v10155_v57  ;;  %v5404_v47 = vadd.f32 %v5403_v40, %v10158_v48  ;;  %v5465_v29 = vmul.f32 %v10158_v48, %v10158_v48 }
 0x38f   :  { %v5624_v52 = vadd.f32 1e-05, %v5576_v49  ;;  %v10163_v60 = vpop.f32.mrf.mxu1  ;;  %v10169_v17 = vadd.f32 %v5209_v46, %v9974_v24  ;;  %v5470_v1 = vmul.f32 %v10161_v28, %v10161_v28  ;;  %v5393_v63 = vadd.f32 %v5392_v15, %v10161_v28 }
 0x390   :  { %v5211_v22 = vpop.f32.mrf.mxu0  ;;  %v5625_v59 = vadd.f32 1e-05, %v5577_v23  ;;  %v5512_v6 = vadd.f32 %v5511_v44, %v5464_v34  ;;  %v5524_v49 = vadd.f32 %v5523_v58, %v5465_v29  ;;  %v5582_v15 = vsub.f32 %v9982_v8, %v10108_v7 }
 0x391   :  { %7126 = vrsqrt.f32 %v5624_v52  ;;  %v10176_v25 = vpop.f32.mrf.mxu1  ;;  %v5471_v12 = vmul.f32 %v10169_v17, %v10169_v17  ;;  %v10182_v24 = vadd.f32 %v5211_v22, %v9976_v9  ;;  %v5405_v37 = vadd.f32 %v5404_v47, %v10169_v17  ;;  %v10652_v52 = vld [vmem:[#allocation6_spill] sm:$0xff] }
 0x392   :  { %v5213_v19 = vpop.f32.mrf.mxu0  ;;  %7128 = vrsqrt.f32 %v5625_v59  ;;  %v10192_v33 = vrot.slane %v10126_v4, %v10652_v52  ;;  %v5513_v41 = vadd.f32 %v5512_v6, %v5470_v1  ;;  %v5588_v34 = vsub.f32 %v9979_v18, %v10108_v7 }
 0x393   :  { %v10186_v14 = vadd.f32 %v5213_v19, %v9987_v11  ;;  %v10188_v13 = vpop.f32.mrf.mxu1  ;;  %v5394_v44 = vadd.f32 %v5393_v63, %v10182_v24  ;;  %v5476_v9 = vmul.f32 %v10182_v24, %v10182_v24  ;;  %v5525_v35 = vadd.f32 %v5524_v49, %v5471_v12 }
 0x394   :  { %v5217_v40 = vpop.f32.mrf.mxu0  ;;  %v10211_v22 = vrot.slane %v10131_v51, %v10652_v52  ;;  %v5594_v18 = vsub.f32 %v10011_v39, %v10108_v7  ;;  %v5600_v8 = vsub.f32 %v10042_v43, %v10108_v7  ;;  %v5606_v12 = vsub.f32 %v10048_v27, %v10108_v7 }
 0x395   :  { %v5406_v46 = vadd.f32 %v5405_v37, %v10186_v14  ;;  %v5477_v11 = vmul.f32 %v10186_v14, %v10186_v14  ;;  %v10201_v23 = vadd.f32 %v5217_v40, %v10002_v26  ;;  %v10203_v58 = vpop.f32.mrf.mxu1  ;;  %v5514_v59 = vadd.f32 %v5513_v41, %v5476_v9 }
 0x396   :  { %v5219_v47 = vpop.f32.mrf.mxu0  ;;  %v5612_v19 = vsub.f32 %v10065_v16, %v10108_v7  ;;  %v5618_v43 = vsub.f32 %v10076_v45, %v10108_v7  ;;  %v5583_v27 = vsub.f32 %v9985_v55, %v10121_v62  ;;  %v5589_v16 = vsub.f32 %v9990_v0, %v10121_v62 }
 0x397   :  { %v5526_v29 = vadd.f32 %v5525_v35, %v5477_v11  ;;  %v5395_v1 = vadd.f32 %v5394_v44, %v10201_v23  ;;  %v5482_v26 = vmul.f32 %v10201_v23, %v10201_v23  ;;  %v10217_v6 = vadd.f32 %v5219_v47, %v10021_v61  ;;  %v10219_v63 = vpop.f32.mrf.mxu1 }
 0x398   :  { %v5221_v49 = vpop.f32.mrf.mxu0  ;;  %v5595_v44 = vsub.f32 %v10035_v5, %v10121_v62  ;;  %v5601_v40 = vsub.f32 %v10045_v20, %v10121_v62  ;;  %v5607_v35 = vsub.f32 %v10051_v53, %v10121_v62  ;;  %v5619_v0 = vsub.f32 %v10085_v3, %v10121_v62 }
 0x399   :  { %v5396_v37 = vrot.slane %v5395_v1, 4  ;;  %v10229_v52 = vadd.f32 %v5514_v59, %v5482_v26  ;;  %v10232_v61 = vadd.f32 %v5406_v46, %v10217_v6  ;;  %v5483_v41 = vmul.f32 %v10217_v6, %v10217_v6  ;;  %v10236_v39 = vpop.f32.mrf.mxu1 }
 0x39a   :  { %v5222_v9 = vpop.f32.mrf.mxu0  ;;  %v5613_v46 = vsub.f32 %v10072_v54, %v10121_v62 }
 0x39b   :  { %v5397_v45 = vadd.f32 %v5396_v37, %v5395_v1  ;;  %v10252_v7 = vpop.f32.mrf.mxu1  ;;  %v5516_v11 = vrot.slane %v10229_v52, 4  ;;  %v10258_v59 = vadd.f32 %v5526_v29, %v5483_v41 }
 0x39c   :  { %v10260_v20 = vpop.f32.mrf.mxu0 }
 0x39d   :  { %v10262_v54 = vpop.f32.mrf.mxu1  ;;  %v5398_v42 = vrot.slane %v5397_v45, 2 }
 0x39e   :  { %v7127_v55 = vpop.eup %7126  ;;  %v10264_v36 = vpop.f32.mrf.mxu0 }
 0x39f   :  { %v5636_v47 = vmul.f32 %v7127_v55, %v5582_v15  ;;  %v5642_v53 = vmul.f32 %v7127_v55, %v5588_v34  ;;  %v5648_v26 = vmul.f32 %v7127_v55, %v5594_v18  ;;  %v5654_v49 = vmul.f32 %v7127_v55, %v5600_v8  ;;  %v10270_v15 = vpop.f32.mrf.mxu1  ;;  %v7129_v34 = vpop.eup %7128 }
 0x3a0   :  { %v5660_v1 = vmul.f32 %v7127_v55, %v5606_v12  ;;  %v5666_v37 = vmul.f32 %v7127_v55, %v5612_v19  ;;  %v5672_v9 = vmul.f32 %v7127_v55, %v5618_v43  ;;  %v5399_v19 = vadd.f32 %v5398_v42, %v5397_v45  ;;  %v10275_v43 = vpop.f32.mrf.mxu0 }
 0x3a1   :  { %v5710_v3 = vmul.f32 %v10143_v32, %v5636_v47  ;;  %v5716_v62 = vmul.f32 %v10143_v32, %v5642_v53  ;;  %v5722_v29 = vmul.f32 %v10143_v32, %v5648_v26  ;;  %v5728_v41 = vmul.f32 %v10143_v32, %v5654_v49  ;;  %v10281_v49 = vpop.f32.mrf.mxu1 }
 0x3a2   :  { %v5734_v18 = vmul.f32 %v10143_v32, %v5660_v1  ;;  %v5740_v8 = vmul.f32 %v10143_v32, %v5666_v37  ;;  %v5746_v12 = vmul.f32 %v10143_v32, %v5672_v9  ;;  %v5637_v32 = vmul.f32 %v7129_v34, %v5583_v27  ;;  %v10286_v42 = vpop.f32.mrf.mxu0 }
 0x3a3   :  { %v5784_v55 = vadd.f32 %v10147_v38, %v5710_v3  ;;  %v5790_v47 = vadd.f32 %v10147_v38, %v5716_v62  ;;  %v5796_v53 = vadd.f32 %v10147_v38, %v5722_v29  ;;  %v5802_v26 = vadd.f32 %v10147_v38, %v5728_v41  ;;  %v10288_v29 = vpop.f32.mrf.mxu1 }
 0x3a4   :  { %v5808_v5 = vadd.f32 %v10147_v38, %v5734_v18  ;;  %v5814_v1 = vadd.f32 %v10147_v38, %v5740_v8  ;;  %v5820_v37 = vadd.f32 %v10147_v38, %v5746_v12  ;;  %v5643_v45 = vmul.f32 %v7129_v34, %v5589_v16  ;;  %v5339_v8 = vpop.f32.mrf.mxu0 }
 0x3a5   :  { %5826 = vst [vmem:[#allocation2 + $0x38] sm:$0xff] %v5784_v55  ;;  %5832 = vst [vmem:[#allocation2 + $0xa0] sm:$0xff] %v5790_v47  ;;  %v5649_v9 = vmul.f32 %v7129_v34, %v5595_v44  ;;  %v5655_v3 = vmul.f32 %v7129_v34, %v5601_v40  ;;  %v5661_v62 = vmul.f32 %v7129_v34, %v5607_v35  ;;  %v5400_v27 = vrot.slane %v5399_v19, 1  ;;  %v10295_v40 = vpop.f32.mrf.mxu1 }
 0x3a6   :  { %5838 = vst [vmem:[#allocation2 + $0x108] sm:$0xff] %v5796_v53  ;;  %5844 = vst [vmem:[#allocation2 + $0x170] sm:$0xff] %v5802_v26  ;;  %v5667_v41 = vmul.f32 %v7129_v34, %v5613_v46  ;;  %v5673_v18 = vmul.f32 %v7129_v34, %v5619_v0  ;;  %v5711_v38 = vmul.f32 %v10192_v33, %v5637_v32  ;;  %v5341_v34 = vpop.f32.mrf.mxu0 }
 0x3a7   :  { %5850 = vst [vmem:[#allocation2 + $0x1d8] sm:$0xff] %v5808_v5  ;;  %5856 = vst [vmem:[#allocation2 + $0x240] sm:$0xff] %v5814_v1  ;;  %v5717_v12 = vmul.f32 %v10192_v33, %v5643_v45  ;;  %v5723_v55 = vmul.f32 %v10192_v33, %v5649_v9  ;;  %v5729_v16 = vmul.f32 %v10192_v33, %v5655_v3  ;;  %v10653_v3 = vrot.slane %v10232_v61, 4 }
 0x3a8   :  { %5862 = vst [vmem:[#allocation2 + $0x2a8] sm:$0xff] %v5820_v37  ;;  %v5735_v44 = vmul.f32 %v10192_v33, %v5661_v62  ;;  %v5741_v35 = vmul.f32 %v10192_v33, %v5667_v41  ;;  %v5747_v5 = vmul.f32 %v10192_v33, %v5673_v18  ;;  %v5785_v46 = vadd.f32 %v10211_v22, %v5711_v38  ;;  %v10304_v37 = vpop.f32.mrf.mxu1  ;;  %v5343_v9 = vpop.f32.mrf.mxu0 }
 0x3a9   :  { %v5401_v0 = vadd.f32 %v5400_v27, %v5399_v19  ;;  %v5791_v47 = vadd.f32 %v10211_v22, %v5717_v12  ;;  %v5797_v53 = vadd.f32 %v10211_v22, %v5723_v55  ;;  %v5803_v26 = vadd.f32 %v10211_v22, %v5729_v16 }
 0x3aa   :  { %v5809_v1 = vadd.f32 %v10211_v22, %v5735_v44  ;;  %v5815_v32 = vadd.f32 %v10211_v22, %v5741_v35  ;;  %v5821_v45 = vadd.f32 %v10211_v22, %v5747_v5  ;;  %5827 = vst [vmem:[#allocation2 + $0x40] sm:$0xff] %v5785_v46  ;;  %v5517_v19 = vadd.f32 %v5516_v11, %v10229_v52  ;;  %v5292_v18 = vpop.f32.mrf.mxu1  ;;  %v5345_v27 = vpop.f32.mrf.mxu0 }
 0x3ab   :  { %v10308_v33 = vmul.f32 0.020408163, %v5401_v0  ;;  %5833 = vst [vmem:[#allocation2 + $0xa8] sm:$0xff] %v5791_v47  ;;  %5839 = vst [vmem:[#allocation2 + $0x110] sm:$0xff] %v5797_v53  ;;  %v5409_v62 = vadd.f32 %v10653_v3, %v10232_v61  ;;  %v5528_v41 = vrot.slane %v10258_v59, 4  ;;  %v10319_v22 = vadd.f32 %v10260_v20, %v10149_v31 }
 0x3ac   :  { %5845 = vst [vmem:[#allocation2 + $0x178] sm:$0xff] %v5803_v26  ;;  %5851 = vst [vmem:[#allocation2 + $0x1e0] sm:$0xff] %v5809_v1  ;;  %v5518_v38 = vrot.slane %v5517_v19, 2  ;;  %v10331_v31 = vadd.f32 %v10264_v36, %v10163_v60  ;;  %v5293_v20 = vpop.f32.mrf.mxu1  ;;  %v10340_v0 = vadd.f32 %v10275_v43, %v10176_v25  ;;  %v10344_v36 = vadd.f32 %v10286_v42, %v10188_v13 }
 0x3ad   :  { %5857 = vst [vmem:[#allocation2 + $0x248] sm:$0xff] %v5815_v32  ;;  %5863 = vst [vmem:[#allocation2 + $0x2b0] sm:$0xff] %v5821_v45  ;;  %v5584_v52 = vsub.f32 %v10091_v30, %v10308_v33  ;;  %v5590_v11 = vsub.f32 %v10096_v21, %v10308_v33  ;;  %v5596_v61 = vsub.f32 %v10115_v10, %v10308_v33  ;;  %v5410_v16 = vrot.slane %v5409_v62, 2  ;;  %v5349_v35 = vpop.f32.mrf.mxu0 }
 0x3ae   :  { %v5602_v12 = vsub.f32 %v10155_v57, %v10308_v33  ;;  %v5519_v55 = vadd.f32 %v5518_v38, %v5517_v19  ;;  %v5529_v44 = vadd.f32 %v5528_v41, %v10258_v59  ;;  %v5566_v5 = vmul.f32 %v10308_v33, %v10308_v33 }
 0x3af   :  { %v5448_v46 = vmul.f32 %v10319_v22, %v10319_v22  ;;  %v5411_v47 = vadd.f32 %v5410_v16, %v5409_v62  ;;  %v10347_v59 = vadd.f32 %v5339_v8, %v10203_v58  ;;  %v5351_v26 = vpop.f32.mrf.mxu0  ;;  %v5449_v1 = vmul.f32 %v10331_v31, %v10331_v31 }
 0x3b0   :  { %v5520_v60 = vrot.slane %v5519_v55, 1  ;;  %v5530_v53 = vrot.slane %v5529_v44, 2  ;;  %v5414_v32 = vadd.f32 %v10340_v0, %v10319_v22  ;;  %v5454_v25 = vmul.f32 %v10340_v0, %v10340_v0 }
 0x3b1   :  { %v5455_v13 = vmul.f32 %v10344_v36, %v10344_v36  ;;  %v5412_v42 = vrot.slane %v5411_v47, 1  ;;  %v5460_v58 = vmul.f32 %v10347_v59, %v10347_v59  ;;  %v5353_v8 = vpop.f32.mrf.mxu0  ;;  %v5426_v3 = vadd.f32 %v10344_v36, %v10331_v31 }
 0x3b2   :  { %v5521_v43 = vadd.f32 %v5520_v60, %v5519_v55  ;;  %v5531_v45 = vadd.f32 %v5530_v53, %v5529_v44  ;;  %v5534_v19 = vadd.f32 %v5454_v25, %v5448_v46  ;;  %v10362_v41 = vadd.f32 %v5341_v34, %v10219_v63 }
 0x3b3   :  { %v5546_v62 = vadd.f32 %v5455_v13, %v5449_v1  ;;  %v5413_v38 = vadd.f32 %v5412_v42, %v5411_v47  ;;  %v10365_v16 = vadd.f32 %v5343_v9, %v10236_v39  ;;  %v5355_v55 = vpop.f32.mrf.mxu0  ;;  %v5415_v44 = vadd.f32 %v5414_v32, %v10347_v59 }
 0x3b4   :  { %v5560_v18 = vmul.f32 0.020408163, %v5521_v43  ;;  %v5532_v20 = vrot.slane %v5531_v45, 1  ;;  %v5535_v60 = vadd.f32 %v5534_v19, %v5460_v58  ;;  %v5461_v46 = vmul.f32 %v10362_v41, %v10362_v41 }
 0x3b5   :  { %v10371_v53 = vadd.f32 %v5345_v27, %v10252_v7  ;;  %v10373_v25 = vmul.f32 0.020408163, %v5413_v38  ;;  %v5427_v34 = vadd.f32 %v5426_v3, %v10362_v41  ;;  %v5359_v47 = vpop.f32.mrf.mxu0  ;;  %v5416_v39 = vadd.f32 %v5415_v44, %v10365_v16 }
 0x3b6   :  { %v5572_v1 = vsub.f32 %v5560_v18, %v5566_v5  ;;  %v5533_v63 = vadd.f32 %v5532_v20, %v5531_v45  ;;  %v5547_v13 = vadd.f32 %v5546_v62, %v5461_v46  ;;  %v5466_v9 = vmul.f32 %v10365_v16, %v10365_v16 }
 0x3b7   :  { %v5467_v32 = vmul.f32 %v10371_v53, %v10371_v53  ;;  %v5567_v7 = vmul.f32 %v10373_v25, %v10373_v25  ;;  %v5585_v27 = vsub.f32 %v10099_v2, %v10373_v25  ;;  %v5361_v5 = vpop.f32.mrf.mxu0  ;;  %v5591_v45 = vsub.f32 %v10106_v50, %v10373_v25 }
 0x3b8   :  { %v5578_v43 = vmax.f32 %v5572_v1, 0.0  ;;  %v5561_v42 = vmul.f32 0.020408163, %v5533_v63  ;;  %v5428_v20 = vadd.f32 %v5427_v34, %v10371_v53  ;;  %v5536_v46 = vadd.f32 %v5535_v60, %v5466_v9 }
 0x3b9   :  { %v5363_v44 = vpop.f32.mrf.mxu0  ;;  %v5548_v1 = vadd.f32 %v5547_v13, %v5467_v32  ;;  %v10397_v63 = vadd.f32 %v5349_v35, %v10262_v54  ;;  %v10400_v58 = vadd.f32 %v5351_v26, %v10270_v15  ;;  %v10403_v3 = vadd.f32 %v5353_v8, %v10281_v49 }
 0x3ba   :  { %v5626_v62 = vadd.f32 1e-05, %v5578_v43  ;;  %v5573_v18 = vsub.f32 %v5561_v42, %v5567_v7  ;;  %v10406_v43 = vadd.f32 %v5355_v55, %v10288_v29  ;;  %v10419_v29 = vadd.f32 %v5359_v47, %v10295_v40 }
 0x3bb   :  { %v5364_v42 = vpop.f32.mrf.mxu0  ;;  %v5417_v34 = vadd.f32 %v5416_v39, %v10397_v63  ;;  %v5472_v60 = vmul.f32 %v10397_v63, %v10397_v63  ;;  %v5429_v54 = vadd.f32 %v5428_v20, %v10400_v58  ;;  %v5473_v15 = vmul.f32 %v10400_v58, %v10400_v58 }
 0x3bc   :  { %7130 = vrsqrt.f32 %v5626_v62  ;;  %v5579_v19 = vmax.f32 %v5573_v18, 0.0  ;;  %v5478_v26 = vmul.f32 %v10403_v3, %v10403_v3  ;;  %v5479_v49 = vmul.f32 %v10406_v43, %v10406_v43 }
 0x3bd   :  { %v5537_v8 = vadd.f32 %v5536_v46, %v5472_v60  ;;  %v5549_v55 = vadd.f32 %v5548_v1, %v5473_v15  ;;  %v5418_v13 = vadd.f32 %v5417_v34, %v10403_v3  ;;  %v5430_v39 = vadd.f32 %v5429_v54, %v10406_v43  ;;  %v10654_v34 = vld [vmem:[#allocation7_spill] sm:$0xff]  ;;  %v10655_v15 = vld [vmem:[#allocation8_spill] sm:$0xff] }
 0x3be   :  { %v5627_v35 = vadd.f32 1e-05, %v5579_v19  ;;  %v5484_v9 = vmul.f32 %v10419_v29, %v10419_v29  ;;  %v10426_v32 = vadd.f32 %v5361_v5, %v10304_v37  ;;  %v5691_v60 = vrot.slane %v10126_v4, %v10654_v34 }
 0x3bf   :  { %v5538_v7 = vadd.f32 %v5537_v8, %v5478_v26  ;;  %v5419_v19 = vadd.f32 %v5418_v13, %v10419_v29  ;;  %v5550_v62 = vadd.f32 %v5549_v55, %v5479_v49  ;;  %v5765_v37 = vrot.slane %v10131_v51, %v10654_v34 }
 0x3c0   :  { %7132 = vrsqrt.f32 %v5627_v35  ;;  %v5431_v40 = vadd.f32 %v5430_v39, %v10426_v32  ;;  %v5485_v47 = vmul.f32 %v10426_v32, %v10426_v32  ;;  %v5695_v35 = vrot.slane %v10126_v4, %v10655_v15 }
 0x3c1   :  { %v5420_v18 = vrot.slane %v5419_v19, 4  ;;  %v5539_v20 = vadd.f32 %v5538_v7, %v5484_v9  ;;  %v10442_v26 = vrot.slane %v10131_v51, %v10655_v15  ;;  %v5608_v55 = vsub.f32 %v10161_v28, %v10308_v33 }
 0x3c2   :  { %v5432_v44 = vrot.slane %v5431_v40, 4  ;;  %v5551_v46 = vadd.f32 %v5550_v62, %v5485_v47  ;;  %v5614_v13 = vsub.f32 %v10182_v24, %v10308_v33  ;;  %v5620_v39 = vsub.f32 %v10201_v23, %v10308_v33 }
 0x3c3   :  { %v5421_v1 = vadd.f32 %v5420_v18, %v5419_v19  ;;  %v5540_v42 = vrot.slane %v5539_v20, 4  ;;  %v5621_v9 = vsub.f32 %v10217_v6, %v10373_v25  ;;  %v10658_v2 = vsub.f32 %v10169_v17, %v10373_v25 }
 0x3c4   :  { %v10436_v5 = vadd.f32 %v5432_v44, %v5431_v40  ;;  %v5552_v54 = vrot.slane %v5551_v46, 4 }
 0x3c5   :  { %v5422_v49 = vrot.slane %v5421_v1, 2  ;;  %v5541_v8 = vadd.f32 %v5540_v42, %v5539_v20 }
 0x3c6   :  { %v10453_v47 = vadd.f32 %v5552_v54, %v5551_v46 }
 0x3c7   :  { %v5423_v19 = vadd.f32 %v5422_v49, %v5421_v1  ;;  %v5542_v62 = vrot.slane %v5541_v8, 2 }
 0x3c9   :  { %v7131_v7 = vpop.eup %7130  ;;  %v5424_v46 = vrot.slane %v5423_v19, 1 }
 0x3ca   :  { %v5638_v28 = vmul.f32 %v7131_v7, %v5584_v52  ;;  %v5644_v24 = vmul.f32 %v7131_v7, %v5590_v11  ;;  %v5650_v23 = vmul.f32 %v7131_v7, %v5596_v61  ;;  %v5656_v6 = vmul.f32 %v7131_v7, %v5602_v12 }
 0x3cb   :  { %v5662_v18 = vmul.f32 %v7131_v7, %v5608_v55  ;;  %v5668_v20 = vmul.f32 %v7131_v7, %v5614_v13  ;;  %v5674_v44 = vmul.f32 %v7131_v7, %v5620_v39  ;;  %v5425_v15 = vadd.f32 %v5424_v46, %v5423_v19 }
 0x3cc   :  { %v5712_v1 = vmul.f32 %v5691_v60, %v5638_v28  ;;  %v5718_v42 = vmul.f32 %v5691_v60, %v5644_v24  ;;  %v5724_v30 = vmul.f32 %v5691_v60, %v5650_v23  ;;  %v5730_v52 = vmul.f32 %v5691_v60, %v5656_v6 }
 0x3cd   :  { %v7133_v34 = vpop.eup %7132  ;;  %v5736_v54 = vmul.f32 %v5691_v60, %v5662_v18  ;;  %v5742_v21 = vmul.f32 %v5691_v60, %v5668_v20  ;;  %v5748_v11 = vmul.f32 %v5691_v60, %v5674_v44  ;;  %v10656_v55 = vsub.f32 %v10137_v56, %v10373_v25 }
 0x3ce   :  { %v5786_v49 = vadd.f32 %v5765_v37, %v5712_v1  ;;  %v5792_v10 = vadd.f32 %v5765_v37, %v5718_v42  ;;  %v5798_v61 = vadd.f32 %v5765_v37, %v5724_v30  ;;  %v5804_v40 = vadd.f32 %v5765_v37, %v5730_v52 }
 0x3cf   :  { %v5810_v38 = vadd.f32 %v5765_v37, %v5736_v54  ;;  %v5816_v57 = vadd.f32 %v5765_v37, %v5742_v21  ;;  %v5822_v33 = vadd.f32 %v5765_v37, %v5748_v11  ;;  %v5639_v12 = vmul.f32 %v7133_v34, %v5585_v27 }
 0x3d0   :  { %5828 = vst [vmem:[#allocation2 + $0x48] sm:$0xff] %v5786_v49  ;;  %5834 = vst [vmem:[#allocation2 + $0xb0] sm:$0xff] %v5792_v10  ;;  %v5645_v60 = vmul.f32 %v7133_v34, %v5591_v45  ;;  %v5651_v13 = vmul.f32 %v7133_v34, %v10656_v55  ;;  %v10657_v39 = vsub.f32 %v10158_v48, %v10373_v25  ;;  %v5554_v42 = vrot.slane %v10453_v47, 2 }
 0x3d1   :  { %5840 = vst [vmem:[#allocation2 + $0x118] sm:$0xff] %v5798_v61  ;;  %5846 = vst [vmem:[#allocation2 + $0x180] sm:$0xff] %v5804_v40  ;;  %v5663_v27 = vmul.f32 %v7133_v34, %v10658_v2  ;;  %v10659_v7 = vsub.f32 %v10186_v14, %v10373_v25  ;;  %v5675_v45 = vmul.f32 %v7133_v34, %v5621_v9  ;;  %v10485_v40 = vmul.f32 0.020408163, %v5425_v15 }
 0x3d2   :  { %v5657_v37 = vmul.f32 %v7133_v34, %v10657_v39  ;;  %5852 = vst [vmem:[#allocation2 + $0x1e8] sm:$0xff] %v5810_v38  ;;  %5858 = vst [vmem:[#allocation2 + $0x250] sm:$0xff] %v5816_v57  ;;  %v5713_v19 = vmul.f32 %v5695_v35, %v5639_v12  ;;  %v5719_v56 = vmul.f32 %v5695_v35, %v5645_v60  ;;  %v10661_v60 = vld [vmem:[#allocation10_spill] sm:$0xff] }
 0x3d3   :  { %5864 = vst [vmem:[#allocation2 + $0x2b8] sm:$0xff] %v5822_v33  ;;  %v5669_v50 = vmul.f32 %v7133_v34, %v10659_v7  ;;  %v5725_v28 = vmul.f32 %v5695_v35, %v5651_v13  ;;  %v5737_v48 = vmul.f32 %v5695_v35, %v5663_v27  ;;  %v5749_v6 = vmul.f32 %v5695_v35, %v5675_v45  ;;  %v10662_v13 = vld [vmem:[#allocation11_spill] sm:$0xff] }
 0x3d4   :  { %v5731_v24 = vmul.f32 %v5695_v35, %v5657_v37  ;;  %v5787_v17 = vadd.f32 %v10442_v26, %v5713_v19  ;;  %v5543_v18 = vadd.f32 %v5542_v62, %v5541_v8  ;;  %v5793_v38 = vadd.f32 %v10442_v26, %v5719_v56 }
 0x3d5   :  { %v5743_v23 = vmul.f32 %v5695_v35, %v5669_v50  ;;  %v5799_v20 = vadd.f32 %v10442_v26, %v5725_v28  ;;  %v5811_v25 = vadd.f32 %v10442_v26, %v5737_v48  ;;  %v5823_v44 = vadd.f32 %v10442_v26, %v5749_v6 }
 0x3d6   :  { %v5805_v14 = vadd.f32 %v10442_v26, %v5731_v24  ;;  %5829 = vst [vmem:[#allocation2 + $0x50] sm:$0xff] %v5787_v17  ;;  %v5544_v46 = vrot.slane %v5543_v18, 1  ;;  %5835 = vst [vmem:[#allocation2 + $0xb8] sm:$0xff] %v5793_v38  ;;  %v5568_v8 = vmul.f32 %v10485_v40, %v10485_v40  ;;  %v10660_v62 = vrot.slane %v10436_v5, 2 }
 0x3d7   :  { %v5817_v9 = vadd.f32 %v10442_v26, %v5743_v23  ;;  %5841 = vst [vmem:[#allocation2 + $0x120] sm:$0xff] %v5799_v20  ;;  %5853 = vst [vmem:[#allocation2 + $0x1f0] sm:$0xff] %v5811_v25  ;;  %v5555_v52 = vadd.f32 %v5554_v42, %v10453_v47  ;;  %v5699_v47 = vrot.slane %v10126_v4, %v10661_v60 }
 0x3d8   :  { %5847 = vst [vmem:[#allocation2 + $0x188] sm:$0xff] %v5805_v14  ;;  %5865 = vst [vmem:[#allocation2 + $0x2c0] sm:$0xff] %v5823_v44  ;;  %v5545_v35 = vadd.f32 %v5544_v46, %v5543_v18  ;;  %v5435_v1 = vadd.f32 %v10660_v62, %v10436_v5  ;;  %v5773_v55 = vrot.slane %v10131_v51, %v10661_v60 }
 0x3d9   :  { %5859 = vst [vmem:[#allocation2 + $0x258] sm:$0xff] %v5817_v9  ;;  %v5556_v21 = vrot.slane %v5555_v52, 1  ;;  %v5703_v39 = vrot.slane %v10126_v4, %v10662_v13  ;;  %v5586_v37 = vsub.f32 %v10319_v22, %v10485_v40  ;;  %v5592_v2 = vsub.f32 %v10340_v0, %v10485_v40 }
 0x3da   :  { %v5562_v30 = vmul.f32 0.020408163, %v5545_v35  ;;  %v5436_v26 = vrot.slane %v5435_v1, 1  ;;  %v5598_v27 = vsub.f32 %v10347_v59, %v10485_v40  ;;  %v5604_v7 = vsub.f32 %v10365_v16, %v10485_v40 }
 0x3db   :  { %v5557_v49 = vadd.f32 %v5556_v21, %v5555_v52  ;;  %v5610_v45 = vsub.f32 %v10397_v63, %v10485_v40  ;;  %v5616_v19 = vsub.f32 %v10403_v3, %v10485_v40  ;;  %v5622_v4 = vsub.f32 %v10419_v29, %v10485_v40 }
 0x3dc   :  { %v5574_v34 = vsub.f32 %v5562_v30, %v5568_v8  ;;  %v5437_v54 = vadd.f32 %v5436_v26, %v5435_v1  ;;  %v5777_v1 = vrot.slane %v10131_v51, %v10662_v13 }
 0x3dd   :  { %v5563_v61 = vmul.f32 0.020408163, %v5557_v49 }
 0x3de   :  { %v5580_v11 = vmax.f32 %v5574_v34, 0.0  ;;  %v10501_v15 = vmul.f32 0.020408163, %v5437_v54 }
 0x3e0   :  { %v5628_v10 = vadd.f32 1e-05, %v5580_v11  ;;  %v5569_v57 = vmul.f32 %v10501_v15, %v10501_v15  ;;  %v5587_v22 = vsub.f32 %v10331_v31, %v10501_v15  ;;  %v5593_v23 = vsub.f32 %v10344_v36, %v10501_v15 }
 0x3e1   :  { %v5599_v31 = vsub.f32 %v10362_v41, %v10501_v15  ;;  %v5605_v36 = vsub.f32 %v10371_v53, %v10501_v15  ;;  %v5611_v8 = vsub.f32 %v10400_v58, %v10501_v15  ;;  %v5617_v41 = vsub.f32 %v10406_v43, %v10501_v15 }
 0x3e2   :  { %7134 = vrsqrt.f32 %v5628_v10  ;;  %v5575_v5 = vsub.f32 %v5563_v61, %v5569_v57  ;;  %v5623_v62 = vsub.f32 %v10426_v32, %v10501_v15 }
 0x3e4   :  { %v5581_v33 = vmax.f32 %v5575_v5, 0.0 }
 0x3e6   :  { %v5629_v12 = vadd.f32 1e-05, %v5581_v33 }
 0x3e8   :  { %7136 = vrsqrt.f32 %v5629_v12 }
 0x3ef   :  { %v7135_v50 = vpop.eup %7134 }
 0x3f0   :  { %v5640_v0 = vmul.f32 %v7135_v50, %v5586_v37  ;;  %v5646_v56 = vmul.f32 %v7135_v50, %v5592_v2  ;;  %v5652_v28 = vmul.f32 %v7135_v50, %v5598_v27  ;;  %v5658_v59 = vmul.f32 %v7135_v50, %v5604_v7 }
 0x3f1   :  { %v5664_v24 = vmul.f32 %v7135_v50, %v5610_v45  ;;  %v5670_v48 = vmul.f32 %v7135_v50, %v5616_v19  ;;  %v5676_v16 = vmul.f32 %v7135_v50, %v5622_v4 }
 0x3f2   :  { %v5714_v63 = vmul.f32 %v5699_v47, %v5640_v0  ;;  %v5720_v6 = vmul.f32 %v5699_v47, %v5646_v56  ;;  %v5726_v17 = vmul.f32 %v5699_v47, %v5652_v28  ;;  %v5732_v3 = vmul.f32 %v5699_v47, %v5658_v59 }
 0x3f3   :  { %v5738_v18 = vmul.f32 %v5699_v47, %v5664_v24  ;;  %v5744_v38 = vmul.f32 %v5699_v47, %v5670_v48  ;;  %v5750_v29 = vmul.f32 %v5699_v47, %v5676_v16 }
 0x3f4   :  { %v5788_v40 = vadd.f32 %v5773_v55, %v5714_v63  ;;  %v5794_v20 = vadd.f32 %v5773_v55, %v5720_v6  ;;  %v5800_v14 = vadd.f32 %v5773_v55, %v5726_v17  ;;  %v5806_v25 = vadd.f32 %v5773_v55, %v5732_v3 }
 0x3f5   :  { %v5812_v9 = vadd.f32 %v5773_v55, %v5738_v18  ;;  %v5818_v44 = vadd.f32 %v5773_v55, %v5744_v38  ;;  %v5824_v46 = vadd.f32 %v5773_v55, %v5750_v29  ;;  %v7137_v35 = vpop.eup %7136 }
 0x3f6   :  { %5830 = vst [vmem:[#allocation2 + $0x58] sm:$0xff] %v5788_v40  ;;  %5836 = vst [vmem:[#allocation2 + $0xc0] sm:$0xff] %v5794_v20  ;;  %v5641_v53 = vmul.f32 %v7137_v35, %v5587_v22  ;;  %v5647_v42 = vmul.f32 %v7137_v35, %v5593_v23  ;;  %v5653_v30 = vmul.f32 %v7137_v35, %v5599_v31 }
 0x3f7   :  { %5842 = vst [vmem:[#allocation2 + $0x128] sm:$0xff] %v5800_v14  ;;  %5848 = vst [vmem:[#allocation2 + $0x190] sm:$0xff] %v5806_v25  ;;  %v5659_v26 = vmul.f32 %v7137_v35, %v5605_v36  ;;  %v5665_v52 = vmul.f32 %v7137_v35, %v5611_v8  ;;  %v5671_v34 = vmul.f32 %v7137_v35, %v5617_v41 }
 0x3f8   :  { %5854 = vst [vmem:[#allocation2 + $0x1f8] sm:$0xff] %v5812_v9  ;;  %5860 = vst [vmem:[#allocation2 + $0x260] sm:$0xff] %v5818_v44  ;;  %v5677_v54 = vmul.f32 %v7137_v35, %v5623_v62  ;;  %v5715_v58 = vmul.f32 %v5703_v39, %v5641_v53  ;;  %v5721_v21 = vmul.f32 %v5703_v39, %v5647_v42 }
 0x3f9   :  { %5866 = vst [vmem:[#allocation2 + $0x2c8] sm:$0xff] %v5824_v46  ;;  %v5727_v11 = vmul.f32 %v5703_v39, %v5653_v30  ;;  %v5733_v43 = vmul.f32 %v5703_v39, %v5659_v26  ;;  %v5739_v32 = vmul.f32 %v5703_v39, %v5665_v52  ;;  %v5745_v15 = vmul.f32 %v5703_v39, %v5671_v34 }
 0x3fa   :  { %v5751_v49 = vmul.f32 %v5703_v39, %v5677_v54  ;;  %v5789_v51 = vadd.f32 %v5777_v1, %v5715_v58  ;;  %v5795_v10 = vadd.f32 %v5777_v1, %v5721_v21 }
 0x3fb   :  { %v5801_v61 = vadd.f32 %v5777_v1, %v5727_v11  ;;  %v5807_v57 = vadd.f32 %v5777_v1, %v5733_v43  ;;  %v5813_v5 = vadd.f32 %v5777_v1, %v5739_v32  ;;  %v5819_v33 = vadd.f32 %v5777_v1, %v5745_v15 }
 0x3fc   :  { %v5825_v12 = vadd.f32 %v5777_v1, %v5751_v49  ;;  %5831 = vst [vmem:[#allocation2 + $0x60] sm:$0xff] %v5789_v51  ;;  %5837 = vst [vmem:[#allocation2 + $0xc8] sm:$0xff] %v5795_v10 }
 0x3fd   :  { %5843 = vst [vmem:[#allocation2 + $0x130] sm:$0xff] %v5801_v61  ;;  %5849 = vst [vmem:[#allocation2 + $0x198] sm:$0xff] %v5807_v57 }
 0x3fe   :  { %5855 = vst [vmem:[#allocation2 + $0x200] sm:$0xff] %v5813_v5  ;;  %5861 = vst [vmem:[#allocation2 + $0x268] sm:$0xff] %v5819_v33 }
 0x3ff   :  { %5867 = vst [vmem:[#allocation2 + $0x2d0] sm:$0xff] %v5825_v12 }
 0x400   :  { %7151 = shalt.err (!%p7148_p4)
}
 0x401   :  { %s7165_s0 = smov 1664   ;;  %s7166_s2 = smov 104  }
 0x402   :  { %5879 = dma.vmem_to_hbm [thread:$0]  %s5874_s7, 11648, %s10552_s8, [#allocation3], %s7165_s0, %s7165_s0, %s7166_s2  }
 0x403   :  { %7160 = dma.done.wait [#allocation3], 11648  }
 0x404   :  { %7161 = vsyncadd [#allocation3], 4294955648 }
 0x405   :  { %5883 = vsyncpa [#allocation3], 1 }

</bundles_post_ra>
